<compile_context>
chip_gen: v7x
topology: tpu7x:2x2x1
jax: 0.10.0
libtpu: 0.0.40
codegen_flags: <defaults>
</compile_context>

<pallas_src>
import functools

import jax
import jax.numpy as jnp
import numpy as np
from jax.experimental import pallas as pl
from jax.experimental.pallas import tpu as pltpu

EPS = 1e-3  # BatchNorm2d eps


def _fused_kernel(x_ref, params_ref, pw_ref, out_ref, *, W):
    # x_ref:      (N, C, H*W)  channels on sublanes, flattened spatial on lanes
    # params_ref: (C, 11)      columns 0..8 = 3x3 taps (t = (dh+1)*3 + (dw+1)),
    #                          column 9 = BN gamma, column 10 = BN beta
    # pw_ref:     (Cout, C)    pointwise (1x1 conv) weights
    # out_ref:    (N, Cout, H*W)
    N, C, HW = x_ref.shape
    NHW = N * HW

    params = params_ref[...]                                    # (C, 11), loaded once

    # Per-channel tap weights, sliced once (hoisted out of the batch loop).
    wts = {(dh, dw): params[:, (dh + 1) * 3 + (dw + 1):(dh + 1) * 3 + (dw + 1) + 1]
           for dh in (-1, 0, 1) for dw in (-1, 0, 1)}            # each (C, 1)
    gamma = params[:, 9:10]                                      # (C, 1)
    beta = params[:, 10:11]                                      # (C, 1)

    # Lane-position masks emulating the pad=1 zero border (batch-independent).
    pidx = jax.lax.broadcasted_iota(jnp.int32, (1, HW), 1)
    w_idx = pidx % W
    row_up_ok = pidx >= W              # dh = -1 taps valid (h >= 1)
    row_dn_ok = pidx < (HW - W)        # dh = +1 taps valid (h <= H-2)
    col_l_ok = w_idx >= 1              # dw = -1 taps valid (w >= 1)
    col_r_ok = w_idx <= (W - 2)        # dw = +1 taps valid (w <= W-2)

    # ---- depthwise 3x3 conv (padding=1, stride=1), separable-roll form ----
    acc_parts = []
    for n in range(N):                                           # N small & static
        xn = x_ref[n]                                            # (C, HW)
        # rows above / below via flattened-lane rolls, row-edge zero padding
        x_up = jnp.where(row_up_ok, pltpu.roll(xn, shift=W, axis=1), 0.0)
        x_dn = jnp.where(row_dn_ok, pltpu.roll(xn, shift=HW - W, axis=1), 0.0)

        # column groups: z_dw = sum_dh w[dh, dw] * x_dh   (all 9 MACs live here)
        z_l = wts[(-1, -1)] * x_up + wts[(0, -1)] * xn + wts[(1, -1)] * x_dn
        z_c = wts[(-1, 0)] * x_up + wts[(0, 0)] * xn + wts[(1, 0)] * x_dn
        z_r = wts[(-1, 1)] * x_up + wts[(0, 1)] * xn + wts[(1, 1)] * x_dn

        # shift the +/-1 column groups; column-edge masks kill wrapped pixels
        acc_n = (z_c
                 + jnp.where(col_l_ok, pltpu.roll(z_l, shift=1, axis=1), 0.0)
                 + jnp.where(col_r_ok, pltpu.roll(z_r, shift=HW - 1, axis=1), 0.0))
        acc_parts.append(acc_n)                                  # (C, HW)

    # Flatten batch into lanes -> one lane-dense (C, N*HW) slab for the rest.
    acc_flat = acc_parts[0] if N == 1 else jnp.concatenate(acc_parts, axis=1)

    # ---- BatchNorm2d (training-mode batch stats over N*H*W) ----
    # Lane reductions offloaded to the (otherwise idle) MXU via dots with a ones
    # column, keeping the XLU free for the rolls above.
    ones_col = jnp.ones((NHW, 1), jnp.float32)
    s1 = jnp.dot(acc_flat, ones_col, preferred_element_type=jnp.float32)              # (C, 1)
    s2 = jnp.dot(acc_flat * acc_flat, ones_col, preferred_element_type=jnp.float32)   # (C, 1)
    inv_count = 1.0 / float(NHW)
    mean = s1 * inv_count
    var = s2 * inv_count - mean * mean          # biased variance (matches PyTorch)
    # TODO(synk): single-pass E[x^2]-mean^2 can lose precision for large-mean
    # activations; switch to a two-pass variant if run with trained weights.
    scale = gamma * jax.lax.rsqrt(var + EPS)
    shift = beta - mean * scale

    # ---- BN + ReLU ----
    y = jnp.maximum(acc_flat * scale + shift, 0.0)               # (C, N*HW)

    # ---- 1x1 conv: single (Cout, C) @ (C, N*HW) MXU matmul ----
    out_flat = jnp.dot(pw_ref[...], y, preferred_element_type=jnp.float32)  # (Cout, N*HW)
    for n in range(N):                                           # lane-dense stores
        out_ref[n, :, :] = out_flat[:, n * HW:(n + 1) * HW]


def fused_forward(x_nchw, dw_w, gamma, beta, pw_w):
    """x_nchw: (N, C, H, W) f32.  dw_w: (C,1,3,3).  pw_w: (Cout,C,1,1)."""
    N, C, H, W = x_nchw.shape
    Cout = pw_w.shape[0]
    HW = H * W

    # Host-side transforms: contiguous reshapes + a tiny param concat only.
    xf = x_nchw.reshape(N, C, HW)
    params = jnp.concatenate(
        [dw_w.reshape(C, 9), gamma.reshape(C, 1), beta.reshape(C, 1)], axis=1)  # (C, 11)
    pwf = pw_w.reshape(Cout, C)

    out = pl.pallas_call(
        functools.partial(_fused_kernel, W=W),
        out_shape=jax.ShapeDtypeStruct((N, Cout, HW), jnp.float32),
        grid=(1,),
        in_specs=[
            pl.BlockSpec((N, C, HW), lambda i: (0, 0, 0)),
            pl.BlockSpec((C, 11), lambda i: (0, 0)),
            pl.BlockSpec((Cout, C), lambda i: (0, 0)),
        ],
        out_specs=pl.BlockSpec((N, Cout, HW), lambda i: (0, 0, 0)),
        compiler_params=pltpu.CompilerParams(
            dimension_semantics=("arbitrary",)),
    )(xf, params, pwf)

    return out.reshape(N, Cout, H, W)  # free contiguous reshape back to NCHW


def reference_forward(x_nchw, dw_w, gamma, beta, pw_w):
    """Pure-JAX reference mirroring the PyTorch module in training mode."""
    C = x_nchw.shape[1]
    y = jax.lax.conv_general_dilated(
        x_nchw, dw_w, window_strides=(1, 1), padding=((1, 1), (1, 1)),
        dimension_numbers=("NCHW", "OIHW", "NCHW"), feature_group_count=C)
    mean = jnp.mean(y, axis=(0, 2, 3), keepdims=True)
    var = jnp.mean((y - mean) ** 2, axis=(0, 2, 3), keepdims=True)
    y = (y - mean) / jnp.sqrt(var + EPS)
    y = y * gamma.reshape(1, -1, 1, 1) + beta.reshape(1, -1, 1, 1)
    y = jnp.maximum(y, 0.0)
    y = jax.lax.conv_general_dilated(
        y, pw_w, window_strides=(1, 1), padding=((0, 0), (0, 0)),
        dimension_numbers=("NCHW", "OIHW", "NCHW"))
    return y


if __name__ == "__main__":
    # Channel counts fixed by the module (88 -> 88 depthwise -> 24 pointwise);
    # batch/spatial kept small (H*W = 256 = two lane groups, C = 88 sublanes).
    N, C, H, W, COUT = 2, 88, 16, 16, 24

    key = jax.random.PRNGKey(0)
    kx, kdw, kpw, kg, kb = jax.random.split(key, 5)

    x = jax.random.normal(kx, (N, C, H, W), dtype=jnp.float32)
    dw_w = jax.random.normal(kdw, (C, 1, 3, 3), dtype=jnp.float32) * 0.1     # Conv2d(88,88,3,groups=88)
    pw_w = jax.random.normal(kpw, (COUT, C, 1, 1), dtype=jnp.float32) * 0.1  # Conv2d(88,24,1)
    gamma = 1.0 + 0.1 * jax.random.normal(kg, (C,), dtype=jnp.float32)       # BN weight
    beta = 0.1 * jax.random.normal(kb, (C,), dtype=jnp.float32)              # BN bias

    out = jax.block_until_ready(fused_forward(x, dw_w, gamma, beta, pw_w))

    ref = jax.block_until_ready(reference_forward(x, dw_w, gamma, beta, pw_w))
    np.testing.assert_allclose(np.asarray(out), np.asarray(ref), rtol=1e-3, atol=1e-3)

    assert out.shape == (N, COUT, H, W)
    print("KERNEL_OK")
</pallas_src>

<mosaic_0001>
module attributes {stable_mosaic.version = 11 : i64} {
  func.func @_fused_kernel(%arg0: i32, %arg1: memref<2x88x256xf32, #tpu.memory_space<vmem>>, %arg2: memref<88x11xf32, #tpu.memory_space<vmem>>, %arg3: memref<24x88xf32, #tpu.memory_space<vmem>>, %arg4: memref<2x24x256xf32, #tpu.memory_space<vmem>>) attributes {dimension_semantics = [#tpu.dimension_semantics<arbitrary>], iteration_bounds = array<i64: 1>, scalar_prefetch = 0 : i64, scratch_operands = 0 : i64, tpu.core_type = #tpu.core_type<tc>, window_params = [{pipeline_mode = #tpu.pipeline_mode<synchronous>, transform_indices = @transform_0, window_bounds = array<i64: 2, 88, 256>}, {pipeline_mode = #tpu.pipeline_mode<synchronous>, transform_indices = @transform_1, window_bounds = array<i64: 88, 11>}, {pipeline_mode = #tpu.pipeline_mode<synchronous>, transform_indices = @transform_2, window_bounds = array<i64: 24, 88>}, {pipeline_mode = #tpu.pipeline_mode<synchronous>, transform_indices = @transform_3, window_bounds = array<i64: 2, 24, 256>}]} {
    %c0 = arith.constant 0 : index
    %c0_0 = arith.constant 0 : index
    %0 = vector.load %arg2[%c0, %c0_0] : memref<88x11xf32, #tpu.memory_space<vmem>>, vector<88x11xf32>
    %1 = vector.extract_strided_slice %0 {offsets = [0, 0], sizes = [88, 1], strides = [1, 1]} : vector<88x11xf32> to vector<88x1xf32>
    %2 = vector.extract_strided_slice %0 {offsets = [0, 1], sizes = [88, 1], strides = [1, 1]} : vector<88x11xf32> to vector<88x1xf32>
    %3 = vector.extract_strided_slice %0 {offsets = [0, 2], sizes = [88, 1], strides = [1, 1]} : vector<88x11xf32> to vector<88x1xf32>
    %4 = vector.extract_strided_slice %0 {offsets = [0, 3], sizes = [88, 1], strides = [1, 1]} : vector<88x11xf32> to vector<88x1xf32>
    %5 = vector.extract_strided_slice %0 {offsets = [0, 4], sizes = [88, 1], strides = [1, 1]} : vector<88x11xf32> to vector<88x1xf32>
    %6 = vector.extract_strided_slice %0 {offsets = [0, 5], sizes = [88, 1], strides = [1, 1]} : vector<88x11xf32> to vector<88x1xf32>
    %7 = vector.extract_strided_slice %0 {offsets = [0, 6], sizes = [88, 1], strides = [1, 1]} : vector<88x11xf32> to vector<88x1xf32>
    %8 = vector.extract_strided_slice %0 {offsets = [0, 7], sizes = [88, 1], strides = [1, 1]} : vector<88x11xf32> to vector<88x1xf32>
    %9 = vector.extract_strided_slice %0 {offsets = [0, 8], sizes = [88, 1], strides = [1, 1]} : vector<88x11xf32> to vector<88x1xf32>
    %10 = vector.extract_strided_slice %0 {offsets = [0, 9], sizes = [88, 1], strides = [1, 1]} : vector<88x11xf32> to vector<88x1xf32>
    %11 = vector.extract_strided_slice %0 {offsets = [0, 10], sizes = [88, 1], strides = [1, 1]} : vector<88x11xf32> to vector<88x1xf32>
    %12 = tpu.iota {dimensions = array<i32: 1>} : vector<1x256xi32>
    %c16_i32 = arith.constant 16 : i32
    %c0_i32 = arith.constant 0 : i32
    %13 = arith.cmpi eq, %c16_i32, %c0_i32 : i32
    %c1_i32 = arith.constant 1 : i32
    %14 = arith.select %13, %c1_i32, %c16_i32 : i32
    %15 = vector.broadcast %14 : i32 to vector<1x256xi32>
    %16 = arith.remsi %12, %15 : vector<1x256xi32>
    %c0_i32_1 = arith.constant 0 : i32
    %17 = vector.broadcast %c0_i32_1 : i32 to vector<1x256xi32>
    %18 = arith.cmpi ne, %16, %17 : vector<1x256xi32>
    %c0_i32_2 = arith.constant 0 : i32
    %19 = vector.broadcast %c0_i32_2 : i32 to vector<1x256xi32>
    %20 = arith.cmpi slt, %16, %19 : vector<1x256xi32>
    %c0_i32_3 = arith.constant 0 : i32
    %21 = arith.cmpi slt, %14, %c0_i32_3 : i32
    %22 = vector.broadcast %21 : i1 to vector<1x256xi1>
    %23 = vector.broadcast %22 : vector<1x256xi1> to vector<1x256xi1>
    %24 = arith.xori %20, %23 : vector<1x256xi1>
    %25 = arith.andi %24, %18 : vector<1x256xi1>
    %26 = vector.broadcast %14 : i32 to vector<1x256xi32>
    %27 = arith.addi %16, %26 : vector<1x256xi32>
    %28 = arith.select %25, %27, %16 : vector<1x256xi1>, vector<1x256xi32>
    %c16_i32_4 = arith.constant 16 : i32
    %29 = vector.broadcast %c16_i32_4 : i32 to vector<1x256xi32>
    %30 = arith.cmpi sge, %12, %29 : vector<1x256xi32>
    %c240_i32 = arith.constant 240 : i32
    %31 = vector.broadcast %c240_i32 : i32 to vector<1x256xi32>
    %32 = arith.cmpi slt, %12, %31 : vector<1x256xi32>
    %c1_i32_5 = arith.constant 1 : i32
    %33 = vector.broadcast %c1_i32_5 : i32 to vector<1x256xi32>
    %34 = arith.cmpi sge, %28, %33 : vector<1x256xi32>
    %c14_i32 = arith.constant 14 : i32
    %35 = vector.broadcast %c14_i32 : i32 to vector<1x256xi32>
    %36 = arith.cmpi sle, %28, %35 : vector<1x256xi32>
    %c0_6 = arith.constant 0 : index
    %c0_7 = arith.constant 0 : index
    %c0_8 = arith.constant 0 : index
    %37 = vector.load %arg1[%c0_6, %c0_7, %c0_8] : memref<2x88x256xf32, #tpu.memory_space<vmem>>, vector<1x88x256xf32>
    %38 = vector.shape_cast %37 : vector<1x88x256xf32> to vector<88x256xf32>
    %c16_i32_9 = arith.constant 16 : i32
    %39 = tpu.dynamic_rotate %38 by %c16_i32_9 dim 1 : vector<88x256xf32>, i32 -> vector<88x256xf32>
    %cst = arith.constant 0.000000e+00 : f32
    %40 = vector.shape_cast %30 : vector<1x256xi1> to vector<1x256xi1>
    %41 = vector.broadcast %40 : vector<1x256xi1> to vector<88x256xi1>
    %42 = vector.broadcast %cst : f32 to vector<88x256xf32>
    %43 = arith.select %41, %39, %42 : vector<88x256xi1>, vector<88x256xf32>
    %c240_i32_10 = arith.constant 240 : i32
    %44 = tpu.dynamic_rotate %38 by %c240_i32_10 dim 1 : vector<88x256xf32>, i32 -> vector<88x256xf32>
    %cst_11 = arith.constant 0.000000e+00 : f32
    %45 = vector.shape_cast %32 : vector<1x256xi1> to vector<1x256xi1>
    %46 = vector.broadcast %45 : vector<1x256xi1> to vector<88x256xi1>
    %47 = vector.broadcast %cst_11 : f32 to vector<88x256xf32>
    %48 = arith.select %46, %44, %47 : vector<88x256xi1>, vector<88x256xf32>
    %49 = vector.broadcast %1 : vector<88x1xf32> to vector<88x256xf32>
    %50 = arith.mulf %49, %43 : vector<88x256xf32>
    %51 = vector.broadcast %4 : vector<88x1xf32> to vector<88x256xf32>
    %52 = arith.mulf %51, %38 : vector<88x256xf32>
    %53 = arith.addf %50, %52 : vector<88x256xf32>
    %54 = vector.broadcast %7 : vector<88x1xf32> to vector<88x256xf32>
    %55 = arith.mulf %54, %48 : vector<88x256xf32>
    %56 = arith.addf %53, %55 : vector<88x256xf32>
    %57 = vector.broadcast %2 : vector<88x1xf32> to vector<88x256xf32>
    %58 = arith.mulf %57, %43 : vector<88x256xf32>
    %59 = vector.broadcast %5 : vector<88x1xf32> to vector<88x256xf32>
    %60 = arith.mulf %59, %38 : vector<88x256xf32>
    %61 = arith.addf %58, %60 : vector<88x256xf32>
    %62 = vector.broadcast %8 : vector<88x1xf32> to vector<88x256xf32>
    %63 = arith.mulf %62, %48 : vector<88x256xf32>
    %64 = arith.addf %61, %63 : vector<88x256xf32>
    %65 = vector.broadcast %3 : vector<88x1xf32> to vector<88x256xf32>
    %66 = arith.mulf %65, %43 : vector<88x256xf32>
    %67 = vector.broadcast %6 : vector<88x1xf32> to vector<88x256xf32>
    %68 = arith.mulf %67, %38 : vector<88x256xf32>
    %69 = arith.addf %66, %68 : vector<88x256xf32>
    %70 = vector.broadcast %9 : vector<88x1xf32> to vector<88x256xf32>
    %71 = arith.mulf %70, %48 : vector<88x256xf32>
    %72 = arith.addf %69, %71 : vector<88x256xf32>
    %c1_i32_12 = arith.constant 1 : i32
    %73 = tpu.dynamic_rotate %56 by %c1_i32_12 dim 1 : vector<88x256xf32>, i32 -> vector<88x256xf32>
    %cst_13 = arith.constant 0.000000e+00 : f32
    %74 = vector.shape_cast %34 : vector<1x256xi1> to vector<1x256xi1>
    %75 = vector.broadcast %74 : vector<1x256xi1> to vector<88x256xi1>
    %76 = vector.broadcast %cst_13 : f32 to vector<88x256xf32>
    %77 = arith.select %75, %73, %76 : vector<88x256xi1>, vector<88x256xf32>
    %78 = arith.addf %64, %77 : vector<88x256xf32>
    %c255_i32 = arith.constant 255 : i32
    %79 = tpu.dynamic_rotate %72 by %c255_i32 dim 1 : vector<88x256xf32>, i32 -> vector<88x256xf32>
    %cst_14 = arith.constant 0.000000e+00 : f32
    %80 = vector.shape_cast %36 : vector<1x256xi1> to vector<1x256xi1>
    %81 = vector.broadcast %80 : vector<1x256xi1> to vector<88x256xi1>
    %82 = vector.broadcast %cst_14 : f32 to vector<88x256xf32>
    %83 = arith.select %81, %79, %82 : vector<88x256xi1>, vector<88x256xf32>
    %84 = arith.addf %78, %83 : vector<88x256xf32>
    %c1 = arith.constant 1 : index
    %c0_15 = arith.constant 0 : index
    %c0_16 = arith.constant 0 : index
    %85 = vector.load %arg1[%c1, %c0_15, %c0_16] : memref<2x88x256xf32, #tpu.memory_space<vmem>>, vector<1x88x256xf32>
    %86 = vector.shape_cast %85 : vector<1x88x256xf32> to vector<88x256xf32>
    %c16_i32_17 = arith.constant 16 : i32
    %87 = tpu.dynamic_rotate %86 by %c16_i32_17 dim 1 : vector<88x256xf32>, i32 -> vector<88x256xf32>
    %cst_18 = arith.constant 0.000000e+00 : f32
    %88 = vector.shape_cast %30 : vector<1x256xi1> to vector<1x256xi1>
    %89 = vector.broadcast %88 : vector<1x256xi1> to vector<88x256xi1>
    %90 = vector.broadcast %cst_18 : f32 to vector<88x256xf32>
    %91 = arith.select %89, %87, %90 : vector<88x256xi1>, vector<88x256xf32>
    %c240_i32_19 = arith.constant 240 : i32
    %92 = tpu.dynamic_rotate %86 by %c240_i32_19 dim 1 : vector<88x256xf32>, i32 -> vector<88x256xf32>
    %cst_20 = arith.constant 0.000000e+00 : f32
    %93 = vector.shape_cast %32 : vector<1x256xi1> to vector<1x256xi1>
    %94 = vector.broadcast %93 : vector<1x256xi1> to vector<88x256xi1>
    %95 = vector.broadcast %cst_20 : f32 to vector<88x256xf32>
    %96 = arith.select %94, %92, %95 : vector<88x256xi1>, vector<88x256xf32>
    %97 = vector.broadcast %1 : vector<88x1xf32> to vector<88x256xf32>
    %98 = arith.mulf %97, %91 : vector<88x256xf32>
    %99 = vector.broadcast %4 : vector<88x1xf32> to vector<88x256xf32>
    %100 = arith.mulf %99, %86 : vector<88x256xf32>
    %101 = arith.addf %98, %100 : vector<88x256xf32>
    %102 = vector.broadcast %7 : vector<88x1xf32> to vector<88x256xf32>
    %103 = arith.mulf %102, %96 : vector<88x256xf32>
    %104 = arith.addf %101, %103 : vector<88x256xf32>
    %105 = vector.broadcast %2 : vector<88x1xf32> to vector<88x256xf32>
    %106 = arith.mulf %105, %91 : vector<88x256xf32>
    %107 = vector.broadcast %5 : vector<88x1xf32> to vector<88x256xf32>
    %108 = arith.mulf %107, %86 : vector<88x256xf32>
    %109 = arith.addf %106, %108 : vector<88x256xf32>
    %110 = vector.broadcast %8 : vector<88x1xf32> to vector<88x256xf32>
    %111 = arith.mulf %110, %96 : vector<88x256xf32>
    %112 = arith.addf %109, %111 : vector<88x256xf32>
    %113 = vector.broadcast %3 : vector<88x1xf32> to vector<88x256xf32>
    %114 = arith.mulf %113, %91 : vector<88x256xf32>
    %115 = vector.broadcast %6 : vector<88x1xf32> to vector<88x256xf32>
    %116 = arith.mulf %115, %86 : vector<88x256xf32>
    %117 = arith.addf %114, %116 : vector<88x256xf32>
    %118 = vector.broadcast %9 : vector<88x1xf32> to vector<88x256xf32>
    %119 = arith.mulf %118, %96 : vector<88x256xf32>
    %120 = arith.addf %117, %119 : vector<88x256xf32>
    %c1_i32_21 = arith.constant 1 : i32
    %121 = tpu.dynamic_rotate %104 by %c1_i32_21 dim 1 : vector<88x256xf32>, i32 -> vector<88x256xf32>
    %cst_22 = arith.constant 0.000000e+00 : f32
    %122 = vector.shape_cast %34 : vector<1x256xi1> to vector<1x256xi1>
    %123 = vector.broadcast %122 : vector<1x256xi1> to vector<88x256xi1>
    %124 = vector.broadcast %cst_22 : f32 to vector<88x256xf32>
    %125 = arith.select %123, %121, %124 : vector<88x256xi1>, vector<88x256xf32>
    %126 = arith.addf %112, %125 : vector<88x256xf32>
    %c255_i32_23 = arith.constant 255 : i32
    %127 = tpu.dynamic_rotate %120 by %c255_i32_23 dim 1 : vector<88x256xf32>, i32 -> vector<88x256xf32>
    %cst_24 = arith.constant 0.000000e+00 : f32
    %128 = vector.shape_cast %36 : vector<1x256xi1> to vector<1x256xi1>
    %129 = vector.broadcast %128 : vector<1x256xi1> to vector<88x256xi1>
    %130 = vector.broadcast %cst_24 : f32 to vector<88x256xf32>
    %131 = arith.select %129, %127, %130 : vector<88x256xi1>, vector<88x256xf32>
    %132 = arith.addf %126, %131 : vector<88x256xf32>
    %133 = tpu.concatenate %84, %132 in 1 : vector<88x256xf32>, vector<88x256xf32> -> vector<88x512xf32>
    %cst_25 = arith.constant 1.000000e+00 : f32
    %134 = vector.broadcast %cst_25 : f32 to vector<512x1xf32>
    %cst_26 = arith.constant dense<0.000000e+00> : vector<88x1xf32>
    %135 = tpu.matmul %133, %134, %cst_26 {dimension_numbers = #tpu.dot_dimension_numbers<[1], [0], [0], [1], [0, 0, 1, 1], [], []>} : vector<88x512xf32>, vector<512x1xf32>, vector<88x1xf32> -> vector<88x1xf32>
    %136 = arith.mulf %133, %133 : vector<88x512xf32>
    %cst_27 = arith.constant dense<0.000000e+00> : vector<88x1xf32>
    %137 = tpu.matmul %136, %134, %cst_27 {dimension_numbers = #tpu.dot_dimension_numbers<[1], [0], [0], [1], [0, 0, 1, 1], [], []>} : vector<88x512xf32>, vector<512x1xf32>, vector<88x1xf32> -> vector<88x1xf32>
    %cst_28 = arith.constant 0.001953125 : f32
    %138 = vector.broadcast %cst_28 : f32 to vector<88x1xf32>
    %139 = arith.mulf %135, %138 : vector<88x1xf32>
    %cst_29 = arith.constant 0.001953125 : f32
    %140 = vector.broadcast %cst_29 : f32 to vector<88x1xf32>
    %141 = arith.mulf %137, %140 : vector<88x1xf32>
    %142 = arith.mulf %139, %139 : vector<88x1xf32>
    %143 = arith.subf %141, %142 : vector<88x1xf32>
    %cst_30 = arith.constant 1.000000e-03 : f32
    %144 = vector.broadcast %cst_30 : f32 to vector<88x1xf32>
    %145 = arith.addf %143, %144 : vector<88x1xf32>
    %146 = math.rsqrt %145 : vector<88x1xf32>
    %147 = arith.mulf %10, %146 : vector<88x1xf32>
    %148 = arith.mulf %139, %147 : vector<88x1xf32>
    %149 = arith.subf %11, %148 : vector<88x1xf32>
    %150 = vector.broadcast %147 : vector<88x1xf32> to vector<88x512xf32>
    %151 = arith.mulf %133, %150 : vector<88x512xf32>
    %152 = vector.broadcast %149 : vector<88x1xf32> to vector<88x512xf32>
    %153 = arith.addf %151, %152 : vector<88x512xf32>
    %cst_31 = arith.constant 0.000000e+00 : f32
    %154 = vector.broadcast %cst_31 : f32 to vector<88x512xf32>
    %155 = arith.maximumf %153, %154 : vector<88x512xf32>
    %c0_32 = arith.constant 0 : index
    %c0_33 = arith.constant 0 : index
    %156 = vector.load %arg3[%c0_32, %c0_33] : memref<24x88xf32, #tpu.memory_space<vmem>>, vector<24x88xf32>
    %cst_34 = arith.constant dense<0.000000e+00> : vector<24x512xf32>
    %157 = tpu.matmul %156, %155, %cst_34 {dimension_numbers = #tpu.dot_dimension_numbers<[1], [0], [0], [1], [0, 0, 1, 1], [], []>} : vector<24x88xf32>, vector<88x512xf32>, vector<24x512xf32> -> vector<24x512xf32>
    %158 = vector.extract_strided_slice %157 {offsets = [0, 0], sizes = [24, 256], strides = [1, 1]} : vector<24x512xf32> to vector<24x256xf32>
    %c0_35 = arith.constant 0 : index
    %c0_36 = arith.constant 0 : index
    %c0_37 = arith.constant 0 : index
    %159 = vector.load %arg4[%c0_35, %c0_36, %c0_37] : memref<2x24x256xf32, #tpu.memory_space<vmem>>, vector<1x24x256xf32>
    %160 = vector.shape_cast %159 : vector<1x24x256xf32> to vector<24x256xf32>
    %161 = vector.shape_cast %158 : vector<24x256xf32> to vector<1x24x256xf32>
    tpu.vector_store %arg4[%c0_35, %c0_36, %c0_37], %161 {strides = array<i32>} : memref<2x24x256xf32, #tpu.memory_space<vmem>>, vector<1x24x256xf32>,
    %162 = vector.extract_strided_slice %157 {offsets = [0, 256], sizes = [24, 256], strides = [1, 1]} : vector<24x512xf32> to vector<24x256xf32>
    %c1_38 = arith.constant 1 : index
    %c0_39 = arith.constant 0 : index
    %c0_40 = arith.constant 0 : index
    %163 = vector.load %arg4[%c1_38, %c0_39, %c0_40] : memref<2x24x256xf32, #tpu.memory_space<vmem>>, vector<1x24x256xf32>
    %164 = vector.shape_cast %163 : vector<1x24x256xf32> to vector<24x256xf32>
    %165 = vector.shape_cast %162 : vector<24x256xf32> to vector<1x24x256xf32>
    tpu.vector_store %arg4[%c1_38, %c0_39, %c0_40], %165 {strides = array<i32>} : memref<2x24x256xf32, #tpu.memory_space<vmem>>, vector<1x24x256xf32>,
    return
  }
  func.func @transform_0(%arg0: i32) -> (i32, i32, i32) {
    %c0_i32 = arith.constant 0 : i32
    %c0_i32_0 = arith.constant 0 : i32
    %c0_i32_1 = arith.constant 0 : i32
    %c0_i32_2 = arith.constant 0 : i32
    return %c0_i32, %c0_i32_0, %c0_i32_1 : i32, i32, i32
  }
  func.func @transform_1(%arg0: i32) -> (i32, i32) {
    %c0_i32 = arith.constant 0 : i32
    %c0_i32_0 = arith.constant 0 : i32
    %c0_i32_1 = arith.constant 0 : i32
    return %c0_i32, %c0_i32_0 : i32, i32
  }
  func.func @transform_2(%arg0: i32) -> (i32, i32) {
    %c0_i32 = arith.constant 0 : i32
    %c0_i32_0 = arith.constant 0 : i32
    %c0_i32_1 = arith.constant 0 : i32
    return %c0_i32, %c0_i32_0 : i32, i32
  }
  func.func @transform_3(%arg0: i32) -> (i32, i32, i32) {
    %c0_i32 = arith.constant 0 : i32
    %c0_i32_0 = arith.constant 0 : i32
    %c0_i32_1 = arith.constant 0 : i32
    %c0_i32_2 = arith.constant 0 : i32
    return %c0_i32, %c0_i32_0, %c0_i32_1 : i32, i32, i32
  }
}

</mosaic_0001>

<bundles_post_ra>
// kernel: tpu_custom_call.1
= control target key start
LH: loop header
LB: loop body
LE: loop exit
PB: predicated region body
PF: predicated region fallthrough
CT: control target
= control target key end

     0   :  { %8 = vsyncpa [#allocation3], 0  ;;  %s7297_s0 = inlined_call_operand.hbm [shape: f32[2,88,256], index: 0, kind: input, shape index: {}]   ;;  %s7298_s1 = inlined_call_operand.vmem [shape: f32[88,11], index: 1, kind: input, shape index: {}]   ;;  %s7299_s2 = inlined_call_operand.vmem [shape: f32[24,88], index: 2, kind: input, shape index: {}]   ;;  %s7300_s3 = inlined_call_operand.hbm [shape: f32[2,24,256], index: 3, kind: output, shape index: {}]  }
   0x1   :  { %9 = vsyncpa [#allocation4], 0  ;;  %s3817_s12 = smov [#allocation2]   ;;  %s3769_s16 = scalar_lea.hbm %s7297_s0, 5632 }
   0x2   :  { %s15_s13 = sshll.u32 %s3817_s12, 4  ;;  %p3770_p0 = scmp.ne.s32.totalorder %s7297_s0, %s3769_s16  ;;  %s16_s13 = int_to_ptr.vmem [resolvable:$true] %s15_s13 }
   0x3   :  { %p3773_p1 = scmp.lt.u32.totalorder %s3769_s16, %s7297_s0 }
   0x5   :  { %p3775_p2 = pnand %p3773_p1, %p3770_p0 }
   0x7   :  { %3778 = shalt.err (!%p3775_p2)
}
   0x8   :  { %s3779_s21 = scalar_lea.vmem %s16_s13, 5632  ;;  %p3784_p4 = scmp.lt.s32.totalorder %s16_s13, %s16_s13 }
   0x9   :  { %p3780_p3 = scmp.ne.s32.totalorder %s16_s13, %s3779_s21  ;;  %p3785_p5 = scmp.lt.s32.totalorder %s3779_s21, %s3779_s21 }
   0xb   :  { %p3786_p6 = por %p3785_p5, %p3784_p4 }
   0xd   :  { %p3787_p7 = pnand %p3786_p6, %p3780_p3 }
   0xf   :  { %3790 = shalt.err (!%p3787_p7)
}
  0x10   :  { %s3818_s22 = smov 256   ;;  %s3819_s23 = smov 16  }
  0x11   :  { %21 = dma.hbm_to_vmem [thread:$0]  %s7297_s0, 5632, %s16_s13, [#allocation3], %s3818_s22, %s3818_s22, %s3819_s23  }
  0x12   :  { %3813 = dma.done.wait [#allocation3], 5632  }
  0x13   :  { %3814 = vsyncadd [#allocation3], 4294961664  ;;  %v3820_v0 = vmov 6   ;;  %v3821_v1 = vmov 0   ;;  %v29_v2 = vld [vmem:[%s7298_s1] sm:$0xff]  ;;  %v7310_v3 = vmov 2  }
  0x14   :  { %3589 = vset.pattern.permute.xlu1 %v3820_v0  ;;  %3587 = vset.pattern.permute.xlu0 %v3821_v1  ;;  %v7301_v4 = vmov 3   ;;  %v3884_v5 = vld [vmem:[%s7298_s1 + $0x8] sm:$0xff]  ;;  %v7303_v6 = vmov 5   ;;  %v75_v7 = vld [vmem:[#allocation2] sm:$0xff]  ;;  %v3891_v8 = vld [vmem:[#allocation2 + $0xb0] sm:$0xff]  ;;  %v7305_v9 = vmov 8  }
  0x15   :  { %449 = vperm.xlu1 %3589, %v29_v2   ;;  %285 = vperm.xlu0 %3587, %v29_v2   ;;  %v3896_v10 = vld [vmem:[#allocation2 + $0x8] sm:$0xff]  ;;  %s3826_s29 = smov 112   ;;  %v3901_v11 = vld [vmem:[#allocation2 + $0xb8] sm:$0xff]  ;;  %v3909_v12 = vld [vmem:[%s7298_s1 + $0x10] sm:$0xff]  ;;  %s3828_s21 = smov 1   ;;  %vm2988_vm10 = vcmask 719872  }
  0x16   :  { %v77_v13 = vld [vmem:[#allocation2 + $0x10] sm:$0xff]  ;;  %v3916_v14 = vld [vmem:[#allocation2 + $0xc0] sm:$0xff]  ;;  %v3933_v15 = vld [vmem:[%s7298_s1 + $0x18] sm:$0xff]  ;;  %s3830_s24 = smov 127   ;;  %s3833_s19 = smov 9  }
  0x17   :  { %v3937_v16 = vld [vmem:[#allocation2 + $0x20] sm:$0xff]  ;;  %v3943_v17 = vld [vmem:[#allocation2 + $0x18] sm:$0xff]  ;;  %v3945_v18 = vld [vmem:[#allocation2 + $0xd0] sm:$0xff]  ;;  %s3836_s17 = smov 10   ;;  %s3839_s25 = smov [#allocation5]  }
  0x18   :  { %7728 = vst [vmem:[#allocation8_spill] sm:$0xff] %v3945_v18  ;;  %v3951_v19 = vld [vmem:[#allocation2 + $0xc8] sm:$0xff]  ;;  %v3964_v20 = vld [vmem:[%s7298_s1 + $0x20] sm:$0xff]  ;;  %v81_v21 = vld [vmem:[#allocation2 + $0x30] sm:$0xff]  ;;  %s3182_s26 = sshll.u32 %s3839_s25, 4  ;;  %s3183_s26 = int_to_ptr.vmem [resolvable:$true] %s3182_s26 }
  0x19   :  { %3590 = vset.pattern.permute.xlu1 %v7310_v3  ;;  %3588 = vset.pattern.permute.xlu0 %v7301_v4  ;;  %v3972_v22 = vld [vmem:[#allocation2 + $0xe0] sm:$0xff]  ;;  %v3987_v23 = vld [vmem:[%s7298_s1 + $0x28] sm:$0xff]  ;;  %v1256_v26 = vld [vmem:[#allocation2 + $0xd8] sm:$0xff]  ;;  %p3796_p9 = scmp.lt.s32.totalorder %s3183_s26, %s3183_s26 }
  0x1a   :  { %779 = vperm.xlu1 %3590, %v29_v2   ;;  %361 = vperm.xlu0 %3588, %v29_v2   ;;  %7729 = vst [vmem:[#allocation9_spill] sm:$0xff] %v3972_v22  ;;  %7730 = vst [vmem:[#allocation10_spill] sm:$0xff] %v3987_v23  ;;  %v80_v24 = vld [vmem:[#allocation2 + $0x28] sm:$0xff]  ;;  %v3991_v25 = vld [vmem:[#allocation2 + $0x40] sm:$0xff] }
  0x1b   :  { %7731 = vst [vmem:[#allocation11_spill] sm:$0xff] %v3991_v25  ;;  %v3997_v27 = vld [vmem:[#allocation2 + $0xf0] sm:$0xff]  ;;  %v4019_v30 = vld [vmem:[#allocation2 + $0x100] sm:$0xff]  ;;  %v4027_v31 = vld [vmem:[#allocation2 + $0x38] sm:$0xff] }
  0x1c   :  { %7732 = vst [vmem:[#allocation12_spill] sm:$0xff] %v3997_v27  ;;  %v4012_v28 = vld [vmem:[%s7298_s1 + $0x30] sm:$0xff]  ;;  %7733 = vst [vmem:[#allocation13_spill] sm:$0xff] %v4019_v30  ;;  %v4037_v34 = vld [vmem:[#allocation2 + $0xe8] sm:$0xff] }
  0x1d   :  { %v85_v29 = vld [vmem:[#allocation2 + $0x50] sm:$0xff]  ;;  %7734 = vst [vmem:[#allocation14_spill] sm:$0xff] %v4027_v31  ;;  %7735 = vst [vmem:[#allocation15_spill] sm:$0xff] %v4037_v34  ;;  %v4042_v35 = vld [vmem:[%s7298_s1 + $0x38] sm:$0xff] }
  0x1e   :  { %3591 = vset.pattern.permute.xlu1 %v7303_v6  ;;  %3592 = vset.pattern.permute.xlu0 %v3821_v1  ;;  %7736 = vst [vmem:[#allocation16_spill] sm:$0xff] %v4042_v35  ;;  %v4048_v36 = vld [vmem:[#allocation2 + $0x60] sm:$0xff]  ;;  %v4057_v39 = vld [vmem:[#allocation2 + $0x110] sm:$0xff]  ;;  %v84_v54 = vld [vmem:[#allocation2 + $0x48] sm:$0xff] }
  0x1f   :  { %845 = vperm.xlu1 %3591, %v29_v2   ;;  %290 = vperm.xlu0 %3592, %v3884_v5   ;;  %7737 = vst [vmem:[#allocation17_spill] sm:$0xff] %v4048_v36  ;;  %7738 = vst [vmem:[#allocation18_spill] sm:$0xff] %v4057_v39  ;;  %v4087_v46 = vld [vmem:[%s7298_s1 + $0x40] sm:$0xff]  ;;  %v89_v49 = vld [vmem:[#allocation2 + $0x70] sm:$0xff] }
  0x20   :  { %v1265_v52 = vld [vmem:[#allocation2 + $0x120] sm:$0xff]  ;;  %v1260_v57 = vld [vmem:[#allocation2 + $0xf8] sm:$0xff]  ;;  %v4123_v61 = vld [vmem:[%s7298_s1 + $0x48] sm:$0xff] }
  0x21   :  { %v91_v1 = vld [vmem:[#allocation2 + $0x80] sm:$0xff] }
  0x23   :  { %3593 = vset.pattern.permute.xlu1 %v7301_v4  ;;  %97 = vrot.lane.b32.xlu0 %v75_v7, %s3819_s23 }
  0x24   :  { %365 = vperm.xlu1 %3593, %v3884_v5  }
  0x27   :  { %1273 = vrot.lane.b32.xlu0 %v3891_v8, %s3819_s23 }
  0x28   :  { %3594 = vset.pattern.permute.xlu1 %v7305_v9 }
  0x29   :  { %933 = vperm.xlu1 %3594, %v29_v2  }
  0x2b   :  { %190 = vrot.lane.b32.xlu0 %v75_v7, %s3826_s29 }
  0x2d   :  { %119 = vrot.lane.b32.xlu1 %v3896_v10, %s3819_s23 }
  0x2e   :  { %3595 = vset.pattern.permute.xlu1 %v7310_v3 }
  0x2f   :  { %1361 = vrot.lane.b32.xlu0 %v3891_v8, %s3826_s29 }
  0x31   :  { %1295 = vrot.lane.b32.xlu1 %v3901_v11, %s3819_s23 }
  0x33   :  { %295 = vperm.xlu0 %3592, %v3909_v12  }
  0x35   :  { %783 = vperm.xlu1 %3595, %v3884_v5  }
  0x37   :  { %99 = vrot.lane.b32.xlu0 %v77_v13, %s3819_s23 }
  0x39   :  { %3596 = vset.pattern.permute.xlu1 %v7303_v6 }
  0x3a   :  { %849 = vperm.xlu1 %3596, %v3884_v5  }
  0x3b   :  { %1275 = vrot.lane.b32.xlu0 %v3916_v14, %s3819_s23 }
  0x3e   :  { %212 = vrot.lane.b32.xlu1 %v3896_v10, %s3826_s29 }
  0x3f   :  { %192 = vrot.lane.b32.xlu0 %v77_v13, %s3826_s29  ;;  %3597 = vset.pattern.permute.xlu1 %v7301_v4  ;;  %v1267_v13 = vld [vmem:[#allocation2 + $0x130] sm:$0xff] }
  0x42   :  { %1383 = vrot.lane.b32.xlu1 %v3901_v11, %s3826_s29 }
  0x43   :  { %1363 = vrot.lane.b32.xlu0 %v3916_v14, %s3826_s29 }
  0x46   :  { %369 = vperm.xlu1 %3597, %v3909_v12  }
  0x47   :  { %300 = vperm.xlu0 %3592, %v3933_v15  }
  0x4a   :  { %3598 = vset.pattern.permute.xlu1 %v7305_v9 }
  0x4b   :  { %937 = vperm.xlu1 %3598, %v3884_v5   ;;  %101 = vrot.lane.b32.xlu0 %v3937_v16, %s3819_s23 }
  0x4f   :  { %121 = vrot.lane.b32.xlu1 %v3943_v17, %s3819_s23  ;;  %1277 = vrot.lane.b32.xlu0 %v3945_v18, %s3819_s23 }
  0x50   :  { %3599 = vset.pattern.permute.xlu1 %v7310_v3 }
  0x53   :  { %1297 = vrot.lane.b32.xlu1 %v3951_v19, %s3819_s23  ;;  %194 = vrot.lane.b32.xlu0 %v3937_v16, %s3826_s29 }
  0x57   :  { %787 = vperm.xlu1 %3599, %v3909_v12   ;;  %1365 = vrot.lane.b32.xlu0 %v3945_v18, %s3826_s29 }
  0x5b   :  { %3600 = vset.pattern.permute.xlu1 %v7303_v6  ;;  %305 = vperm.xlu0 %3592, %v3964_v20  }
  0x5c   :  { %853 = vperm.xlu1 %3600, %v3909_v12  }
  0x5f   :  { %103 = vrot.lane.b32.xlu0 %v81_v21, %s3819_s23 }
  0x60   :  { %214 = vrot.lane.b32.xlu1 %v3943_v17, %s3826_s29 }
  0x61   :  { %3601 = vset.pattern.permute.xlu1 %v7301_v4 }
  0x63   :  { %1279 = vrot.lane.b32.xlu0 %v3972_v22, %s3819_s23 }
  0x64   :  { %1385 = vrot.lane.b32.xlu1 %v3951_v19, %s3826_s29 }
  0x67   :  { %196 = vrot.lane.b32.xlu0 %v81_v21, %s3826_s29 }
  0x68   :  { %373 = vperm.xlu1 %3601, %v3933_v15  }
  0x6b   :  { %1367 = vrot.lane.b32.xlu0 %v3972_v22, %s3826_s29 }
  0x6c   :  { %3602 = vset.pattern.permute.xlu1 %v7305_v9 }
  0x6d   :  { %941 = vperm.xlu1 %3602, %v3909_v12  }
  0x6f   :  { %310 = vperm.xlu0 %3592, %v3987_v23  }
  0x71   :  { %123 = vrot.lane.b32.xlu1 %v80_v24, %s3819_s23 }
  0x72   :  { %3603 = vset.pattern.permute.xlu1 %v7310_v3 }
  0x73   :  { %105 = vrot.lane.b32.xlu0 %v3991_v25, %s3819_s23 }
  0x75   :  { %1299 = vrot.lane.b32.xlu1 %v1256_v26, %s3819_s23 }
  0x77   :  { %1281 = vrot.lane.b32.xlu0 %v3997_v27, %s3819_s23 }
  0x79   :  { %791 = vperm.xlu1 %3603, %v3933_v15  }
  0x7b   :  { %198 = vrot.lane.b32.xlu0 %v3991_v25, %s3826_s29 }
  0x7d   :  { %3604 = vset.pattern.permute.xlu1 %v7303_v6 }
  0x7e   :  { %857 = vperm.xlu1 %3604, %v3933_v15  }
  0x7f   :  { %1369 = vrot.lane.b32.xlu0 %v3997_v27, %s3826_s29  ;;  %v7764_v27 = vmov 5  }
  0x82   :  { %216 = vrot.lane.b32.xlu1 %v80_v24, %s3826_s29 }
  0x83   :  { %315 = vperm.xlu0 %3592, %v4012_v28   ;;  %3605 = vset.pattern.permute.xlu1 %v7301_v4 }
  0x86   :  { %1387 = vrot.lane.b32.xlu1 %v1256_v26, %s3826_s29 }
  0x87   :  { %107 = vrot.lane.b32.xlu0 %v85_v29, %s3819_s23 }
  0x8a   :  { %377 = vperm.xlu1 %3605, %v3964_v20  }
  0x8b   :  { %1283 = vrot.lane.b32.xlu0 %v4019_v30, %s3819_s23 }
  0x8e   :  { %3606 = vset.pattern.permute.xlu1 %v7305_v9 }
  0x8f   :  { %945 = vperm.xlu1 %3606, %v3933_v15   ;;  %200 = vrot.lane.b32.xlu0 %v85_v29, %s3826_s29 }
  0x93   :  { %125 = vrot.lane.b32.xlu1 %v4027_v31, %s3819_s23  ;;  %1371 = vrot.lane.b32.xlu0 %v4019_v30, %s3826_s29 }
  0x94   :  { %v4033_v32 = vpop.permute.xlu1 %449  ;;  %v4035_v33 = vpop.permute.xlu0 %285  ;;  %3607 = vset.pattern.permute.xlu1 %v7310_v3 }
  0x97   :  { %1301 = vrot.lane.b32.xlu1 %v4037_v34, %s3819_s23  ;;  %320 = vperm.xlu0 %3592, %v4042_v35  }
  0x99   :  { %v4050_v37 = vpop.permute.xlu1 %779  ;;  %v4052_v38 = vpop.permute.xlu0 %361 }
  0x9b   :  { %795 = vperm.xlu1 %3607, %v3964_v20   ;;  %109 = vrot.lane.b32.xlu0 %v4048_v36, %s3819_s23 }
  0x9e   :  { %v4059_v40 = vpop.permute.xlu1 %845  ;;  %v4061_v41 = vpop.permute.xlu0 %290 }
  0x9f   :  { %7739 = vst [vmem:[#allocation19_spill] sm:$0xff] %v4061_v41  ;;  %3608 = vset.pattern.permute.xlu1 %v7303_v6  ;;  %1285 = vrot.lane.b32.xlu0 %v4057_v39, %s3819_s23 }
  0xa0   :  { %861 = vperm.xlu1 %3608, %v3964_v20  }
  0xa2   :  { %v4067_v42 = vpop.permute.xlu0 %97 }
  0xa3   :  { %7740 = vst [vmem:[#allocation20_spill] sm:$0xff] %v4067_v42  ;;  %v4069_v43 = vpop.permute.xlu1 %365  ;;  %202 = vrot.lane.b32.xlu0 %v4048_v36, %s3826_s29 }
  0xa4   :  { %218 = vrot.lane.b32.xlu1 %v4027_v31, %s3826_s29  ;;  %v7768_v31 = vmov 3  }
  0xa5   :  { %3609 = vset.pattern.permute.xlu1 %v7301_v4 }
  0xa6   :  { %v4075_v44 = vpop.permute.xlu0 %1273 }
  0xa7   :  { %1373 = vrot.lane.b32.xlu0 %v4057_v39, %s3826_s29 }
  0xa8   :  { %v4080_v45 = vpop.permute.xlu1 %933  ;;  %1389 = vrot.lane.b32.xlu1 %v4037_v34, %s3826_s29 }
  0xaa   :  { %v4089_v47 = vpop.permute.xlu0 %190 }
  0xab   :  { %7741 = vst [vmem:[#allocation21_spill] sm:$0xff] %v4089_v47  ;;  %325 = vperm.xlu0 %3592, %v4087_v46  }
  0xac   :  { %v4092_v48 = vpop.permute.xlu1 %119  ;;  %381 = vperm.xlu1 %3609, %v3987_v23  }
  0xad   :  { %7742 = vst [vmem:[#allocation22_spill] sm:$0xff] %v4092_v48 }
  0xae   :  { %v4095_v50 = vpop.permute.xlu0 %1361 }
  0xaf   :  { %111 = vrot.lane.b32.xlu0 %v89_v49, %s3819_s23 }
  0xb0   :  { %v4098_v51 = vpop.permute.xlu1 %1295  ;;  %3610 = vset.pattern.permute.xlu1 %v7305_v9 }
  0xb1   :  { %949 = vperm.xlu1 %3610, %v3964_v20  }
  0xb2   :  { %v4102_v53 = vpop.permute.xlu0 %295 }
  0xb3   :  { %7743 = vst [vmem:[#allocation23_spill] sm:$0xff] %v4102_v53  ;;  %1287 = vrot.lane.b32.xlu0 %v1265_v52, %s3819_s23 }
  0xb4   :  { %v4105_v55 = vpop.permute.xlu1 %783 }
  0xb5   :  { %7744 = vst [vmem:[#allocation24_spill] sm:$0xff] %v4105_v55  ;;  %127 = vrot.lane.b32.xlu1 %v84_v54, %s3819_s23 }
  0xb6   :  { %v4108_v56 = vpop.permute.xlu0 %99  ;;  %3611 = vset.pattern.permute.xlu1 %v7310_v3 }
  0xb7   :  { %204 = vrot.lane.b32.xlu0 %v89_v49, %s3826_s29 }
  0xb9   :  { %v4112_v58 = vpop.permute.xlu1 %849  ;;  %1303 = vrot.lane.b32.xlu1 %v1260_v57, %s3819_s23 }
  0xba   :  { %7745 = vst [vmem:[#allocation25_spill] sm:$0xff] %v4112_v58  ;;  %v4115_v59 = vpop.permute.xlu0 %1275 }
  0xbb   :  { %1375 = vrot.lane.b32.xlu0 %v1265_v52, %s3826_s29  ;;  %v4158_v52 = vld [vmem:[%s7298_s1 + $0x50] sm:$0xff] }
  0xbd   :  { %v4118_v60 = vpop.permute.xlu1 %212  ;;  %799 = vperm.xlu1 %3611, %v3987_v23  }
  0xbe   :  { %7746 = vst [vmem:[#allocation26_spill] sm:$0xff] %v4118_v60  ;;  %v4126_v62 = vpop.permute.xlu0 %192 }
  0xbf   :  { %7747 = vst [vmem:[#allocation27_spill] sm:$0xff] %v4126_v62  ;;  %330 = vperm.xlu0 %3592, %v4123_v61  }
  0xc1   :  { %v4129_v63 = vpop.permute.xlu1 %1383  ;;  %3612 = vset.pattern.permute.xlu1 %v7303_v6  ;;  %v4177_v6 = vld [vmem:[#allocation2 + $0x108] sm:$0xff] }
  0xc2   :  { %v4132_v2 = vpop.permute.xlu0 %1363  ;;  %865 = vperm.xlu1 %3612, %v3987_v23   ;;  %7758 = vst [vmem:[#allocation38_spill] sm:$0xff] %v4177_v6 }
  0xc3   :  { %113 = vrot.lane.b32.xlu0 %v91_v1, %s3819_s23 }
  0xc5   :  { %v4136_v7 = vpop.permute.xlu1 %369 }
  0xc6   :  { %7748 = vst [vmem:[#allocation28_spill] sm:$0xff] %v4136_v7  ;;  %v4138_v21 = vpop.permute.xlu0 %300  ;;  %220 = vrot.lane.b32.xlu1 %v84_v54, %s3826_s29 }
  0xc7   :  { %7749 = vst [vmem:[#allocation29_spill] sm:$0xff] %v4138_v21  ;;  %1289 = vrot.lane.b32.xlu0 %v1267_v13, %s3819_s23  ;;  %3613 = vset.pattern.permute.xlu1 %v7301_v4  ;;  %v1264_v21 = vld [vmem:[#allocation2 + $0x118] sm:$0xff] }
  0xca   :  { %v4143_v24 = vpop.permute.xlu1 %937  ;;  %v4145_v26 = vpop.permute.xlu0 %101  ;;  %1391 = vrot.lane.b32.xlu1 %v1260_v57, %s3826_s29  ;;  %v4167_v57 = vld [vmem:[#allocation2 + $0x58] sm:$0xff] }
  0xcb   :  { %7750 = vst [vmem:[#allocation30_spill] sm:$0xff] %v4143_v24  ;;  %7751 = vst [vmem:[#allocation31_spill] sm:$0xff] %v4145_v26  ;;  %206 = vrot.lane.b32.xlu0 %v91_v1, %s3826_s29 }
  0xcc   :  { %7755 = vst [vmem:[#allocation35_spill] sm:$0xff] %v4167_v57 }
  0xce   :  { %v4149_v29 = vpop.permute.xlu1 %121  ;;  %v4151_v49 = vpop.permute.xlu0 %1277  ;;  %385 = vperm.xlu1 %3613, %v4012_v28  }
  0xcf   :  { %7752 = vst [vmem:[#allocation32_spill] sm:$0xff] %v4149_v29  ;;  %7753 = vst [vmem:[#allocation33_spill] sm:$0xff] %v4151_v49  ;;  %1377 = vrot.lane.b32.xlu0 %v1267_v13, %s3826_s29 }
  0xd2   :  { %v4160_v54 = vpop.permute.xlu1 %1297  ;;  %v4162_v4 = vpop.permute.xlu0 %194  ;;  %3614 = vset.pattern.permute.xlu1 %v7305_v9 }
  0xd3   :  { %7754 = vst [vmem:[#allocation34_spill] sm:$0xff] %v4162_v4  ;;  %953 = vperm.xlu1 %3614, %v3987_v23   ;;  %335 = vperm.xlu0 %3592, %v4158_v52  }
  0xd6   :  { %v4169_v1 = vpop.permute.xlu1 %787  ;;  %v4171_v13 = vpop.permute.xlu0 %1365 }
  0xd7   :  { %7756 = vst [vmem:[#allocation36_spill] sm:$0xff] %v4169_v1  ;;  %7757 = vst [vmem:[#allocation37_spill] sm:$0xff] %v4171_v13  ;;  %129 = vrot.lane.b32.xlu1 %v4167_v57, %s3819_s23  ;;  %3629 = vset.pattern.permute.xlu0 %v3820_v0 }
  0xd8   :  { %453 = vperm.xlu0 %3629, %v3884_v5   ;;  %3615 = vset.pattern.permute.xlu1 %v7310_v3 }
  0xda   :  { %v4180_v9 = vpop.permute.xlu0 %305 }
  0xdb   :  { %7759 = vst [vmem:[#allocation39_spill] sm:$0xff] %v4180_v9  ;;  %v4182_v39 = vpop.permute.xlu1 %853  ;;  %1305 = vrot.lane.b32.xlu1 %v4177_v6, %s3819_s23 }
  0xdc   :  { %7760 = vst [vmem:[#allocation40_spill] sm:$0xff] %v4182_v39  ;;  %457 = vperm.xlu0 %3629, %v3909_v12  }
  0xde   :  { %v4187_v36 = vpop.permute.xlu0 %103 }
  0xdf   :  { %7761 = vst [vmem:[#allocation41_spill] sm:$0xff] %v4187_v36  ;;  %v4189_v30 = vpop.permute.xlu1 %214  ;;  %803 = vperm.xlu1 %3615, %v4012_v28  }
  0xe0   :  { %7762 = vst [vmem:[#allocation42_spill] sm:$0xff] %v4189_v30  ;;  %461 = vperm.xlu0 %3629, %v3933_v15  }
  0xe2   :  { %v4193_v0 = vpop.permute.xlu0 %1279 }
  0xe3   :  { %7763 = vst [vmem:[#allocation43_spill] sm:$0xff] %v4193_v0  ;;  %v4195_v3 = vpop.permute.xlu1 %1385  ;;  %3616 = vset.pattern.permute.xlu1 %v7764_v27  ;;  %v7778_v0 = vmov 2  }
  0xe4   :  { %869 = vperm.xlu1 %3616, %v4012_v28   ;;  %465 = vperm.xlu0 %3629, %v3964_v20  }
  0xe6   :  { %v4200_v25 = vpop.permute.xlu0 %196 }
  0xe7   :  { %7765 = vst [vmem:[#allocation44_spill] sm:$0xff] %v4200_v25  ;;  %v4202_v9 = vpop.permute.xlu1 %373 }
  0xe8   :  { %7766 = vst [vmem:[#allocation45_spill] sm:$0xff] %v4202_v9  ;;  %222 = vrot.lane.b32.xlu1 %v4167_v57, %s3826_s29  ;;  %469 = vperm.xlu0 %3629, %v3987_v23   ;;  %v7774_v9 = vmov 8  }
  0xe9   :  { %3617 = vset.pattern.permute.xlu1 %v7768_v31 }
  0xea   :  { %v4207_v34 = vpop.permute.xlu0 %1367 }
  0xeb   :  { %7767 = vst [vmem:[#allocation46_spill] sm:$0xff] %v4207_v34  ;;  %v88_v34 = vld [vmem:[#allocation2 + $0x68] sm:$0xff] }
  0xec   :  { %v4210_v22 = vpop.permute.xlu1 %941  ;;  %1393 = vrot.lane.b32.xlu1 %v4177_v6, %s3826_s29  ;;  %473 = vperm.xlu0 %3629, %v4012_v28  }
  0xed   :  { %7769 = vst [vmem:[#allocation47_spill] sm:$0xff] %v4210_v22 }
  0xee   :  { %v4215_v20 = vpop.permute.xlu0 %310 }
  0xef   :  { %7770 = vst [vmem:[#allocation48_spill] sm:$0xff] %v4215_v20 }
  0xf0   :  { %v4217_v36 = vpop.permute.xlu1 %123  ;;  %389 = vperm.xlu1 %3617, %v4042_v35   ;;  %477 = vperm.xlu0 %3629, %v4042_v35  }
  0xf1   :  { %7771 = vst [vmem:[#allocation49_spill] sm:$0xff] %v4217_v36 }
  0xf2   :  { %v4221_v57 = vpop.permute.xlu0 %105 }
  0xf3   :  { %7772 = vst [vmem:[#allocation50_spill] sm:$0xff] %v4221_v57  ;;  %v93_v57 = vld [vmem:[#allocation2 + $0x90] sm:$0xff] }
  0xf4   :  { %v4223_v23 = vpop.permute.xlu1 %1299  ;;  %3618 = vset.pattern.permute.xlu1 %v7774_v9  ;;  %481 = vperm.xlu0 %3629, %v4087_v46  }
  0xf5   :  { %7773 = vst [vmem:[#allocation51_spill] sm:$0xff] %v4223_v23  ;;  %957 = vperm.xlu1 %3618, %v4012_v28  }
  0xf6   :  { %v4228_v6 = vpop.permute.xlu0 %1281 }
  0xf7   :  { %7775 = vst [vmem:[#allocation52_spill] sm:$0xff] %v4228_v6  ;;  %v1269_v6 = vld [vmem:[#allocation2 + $0x140] sm:$0xff] }
  0xf8   :  { %v4230_v20 = vpop.permute.xlu1 %791  ;;  %485 = vperm.xlu0 %3629, %v4123_v61  }
  0xf9   :  { %7776 = vst [vmem:[#allocation53_spill] sm:$0xff] %v4230_v20  ;;  %131 = vrot.lane.b32.xlu1 %v88_v34, %s3819_s23 }
  0xfa   :  { %v4234_v25 = vpop.permute.xlu0 %198  ;;  %3619 = vset.pattern.permute.xlu1 %v7778_v0 }
  0xfb   :  { %7777 = vst [vmem:[#allocation54_spill] sm:$0xff] %v4234_v25 }
  0xfc   :  { %115 = vrot.lane.b32.xlu0 %v93_v57, %s3819_s23 }
  0xfd   :  { %v4237_v22 = vpop.permute.xlu1 %857  ;;  %1307 = vrot.lane.b32.xlu1 %v1264_v21, %s3819_s23 }
  0xfe   :  { %7779 = vst [vmem:[#allocation55_spill] sm:$0xff] %v4237_v22  ;;  %v4241_v28 = vpop.permute.xlu0 %1369 }
  0xff   :  { %7780 = vst [vmem:[#allocation56_spill] sm:$0xff] %v4241_v28 }
 0x100   :  { %1291 = vrot.lane.b32.xlu0 %v1269_v6, %s3819_s23 }
 0x101   :  { %v4243_v20 = vpop.permute.xlu1 %216  ;;  %807 = vperm.xlu1 %3619, %v4042_v35  }
 0x102   :  { %7781 = vst [vmem:[#allocation57_spill] sm:$0xff] %v4243_v20  ;;  %v4247_v25 = vpop.permute.xlu0 %315 }
 0x103   :  { %7782 = vst [vmem:[#allocation58_spill] sm:$0xff] %v4247_v25  ;;  %v40_v25 = vlaneseq }
 0x104   :  { %489 = vperm.xlu0 %3629, %v4158_v52  }
 0x105   :  { %v4249_v39 = vpop.permute.xlu1 %1387  ;;  %3620 = vset.pattern.permute.xlu1 %v7764_v27 }
 0x106   :  { %7783 = vst [vmem:[#allocation59_spill] sm:$0xff] %v4249_v39  ;;  %v4253_v22 = vpop.permute.xlu0 %107  ;;  %873 = vperm.xlu1 %3620, %v4042_v35  }
 0x107   :  { %7784 = vst [vmem:[#allocation60_spill] sm:$0xff] %v4253_v22 }
 0x108   :  { %208 = vrot.lane.b32.xlu0 %v93_v57, %s3826_s29 }
 0x109   :  { %v4256_v28 = vpop.permute.xlu1 %377  ;;  %3634 = vset.pattern.permute.xlu0 %v7774_v9 }
 0x10a   :  { %7785 = vst [vmem:[#allocation61_spill] sm:$0xff] %v4256_v28  ;;  %v4259_v1 = vpop.permute.xlu0 %1283  ;;  %224 = vrot.lane.b32.xlu1 %v88_v34, %s3826_s29  ;;  %v4270_v28 = vand.u32 127, %v40_v25 }
 0x10b   :  { %7786 = vst [vmem:[#allocation62_spill] sm:$0xff] %v4259_v1  ;;  %3621 = vset.pattern.permute.xlu1 %v7768_v31 }
 0x10c   :  { %1379 = vrot.lane.b32.xlu0 %v1269_v6, %s3826_s29  ;;  %v4273_v57 = vadd.s32 128, %v4270_v28  ;;  %vm234_vm0 = vcmp.lt.s32.totalorder %v4270_v28, 112  ;;  %v1271_v6 = vld [vmem:[#allocation2 + $0x150] sm:$0xff]  ;;  %vm141_vm1 = vcmp.lt.s32.totalorder %v4270_v28, 16  ;;  %vm67_vm3 = vcmp.ge.s32.totalorder %v4270_v28, 16 }
 0x10d   :  { %v246_v25 = vsel %vm234_vm0, %v4118_v60, %v4089_v47  ;;  %v405_v60 = vmul.f32 %v4052_v38, %v3896_v10  ;;  %v4326_v10 = vsel %vm141_vm1, %v4075_v44, %v4098_v51  ;;  %vm1064_vm4 = vcmp.lt.s32.totalorder %v4270_v28, 1 }
 0x10e   :  { %v4265_v18 = vpop.permute.xlu1 %945  ;;  %v4267_v22 = vpop.permute.xlu0 %200  ;;  %1395 = vrot.lane.b32.xlu1 %v1264_v21, %s3826_s29  ;;  %7789 = vst [vmem:[#allocation65_spill] sm:$0xff] %v4273_v57  ;;  %vm70_vm2 = vcmp.lt.s32.totalorder %v4273_v57, 240  ;;  %7799 = vst [vmem:[#allocation75_spill] sm:$0xff] %v4326_v10  ;;  %vm1179_vm5 = vcmp.lt.s32.totalorder %v4270_v28, 127 }
 0x10f   :  { %7787 = vst [vmem:[#allocation63_spill] sm:$0xff] %v4265_v18  ;;  %7788 = vst [vmem:[#allocation64_spill] sm:$0xff] %v4267_v22  ;;  %v4300_v18 = vld [vmem:[#allocation2 + $0xa0] sm:$0xff]  ;;  %v4306_v47 = vsel %vm70_vm2, %v246_v25, 0.0 }
 0x110   :  { %973 = vperm.xlu0 %3634, %v4158_v52   ;;  %7795 = vst [vmem:[#allocation71_spill] sm:$0xff] %v4300_v18  ;;  %7796 = vst [vmem:[#allocation72_spill] sm:$0xff] %v4306_v47  ;;  %v493_v25 = vmul.f32 %v4033_v32, %v4306_v47 }
 0x112   :  { %v4276_v34 = vpop.permute.xlu1 %125  ;;  %v4278_v1 = vpop.permute.xlu0 %1371  ;;  %393 = vperm.xlu1 %3621, %v4087_v46  }
 0x113   :  { %7790 = vst [vmem:[#allocation66_spill] sm:$0xff] %v4276_v34  ;;  %7791 = vst [vmem:[#allocation67_spill] sm:$0xff] %v4278_v1  ;;  %v4297_v1 = vsel %vm141_vm1, %v4067_v42, %v4092_v48  ;;  %v7354_v34 = vmov 4   ;;  %v1416_v42 = vsel %vm234_vm0, %v4129_v63, %v4095_v50 }
 0x114   :  { %1293 = vrot.lane.b32.xlu0 %v1271_v6, %s3819_s23  ;;  %7794 = vst [vmem:[#allocation70_spill] sm:$0xff] %v4297_v1  ;;  %v339_v48 = vmul.f32 %v4035_v33, %v4297_v1  ;;  %v4333_v1 = vsel %vm70_vm2, %v1416_v42, 0.0 }
 0x115   :  { %3641 = vset.pattern.permute.xlu0 %v7354_v34  ;;  %7800 = vst [vmem:[#allocation76_spill] sm:$0xff] %v4333_v1  ;;  %v1516_v42 = vmul.f32 %v4333_v1, %v4033_v32 }
 0x116   :  { %v4289_v21 = vpop.permute.xlu1 %1301  ;;  %v4291_v22 = vpop.permute.xlu0 %320  ;;  %3622 = vset.pattern.permute.xlu1 %v7774_v9 }
 0x117   :  { %7792 = vst [vmem:[#allocation68_spill] sm:$0xff] %v4289_v21  ;;  %7793 = vst [vmem:[#allocation69_spill] sm:$0xff] %v4291_v22  ;;  %961 = vperm.xlu1 %3622, %v4042_v35   ;;  %v90_v22 = vld [vmem:[#allocation2 + $0x78] sm:$0xff]  ;;  %v1450_v21 = vmul.f32 %v4326_v10, %v4035_v33 }
 0x118   :  { %210 = vrot.lane.b32.xlu0 %v4300_v18, %s3826_s29  ;;  %v1266_v18 = vld [vmem:[#allocation2 + $0x128] sm:$0xff] }
 0x11a   :  { %v4318_v34 = vpop.permute.xlu1 %795  ;;  %v4320_v35 = vpop.permute.xlu0 %109 }
 0x11b   :  { %7797 = vst [vmem:[#allocation73_spill] sm:$0xff] %v4318_v34  ;;  %7798 = vst [vmem:[#allocation74_spill] sm:$0xff] %v4320_v35  ;;  %133 = vrot.lane.b32.xlu1 %v90_v22, %s3819_s23  ;;  %v1472_v35 = vmul.f32 %v3901_v11, %v4052_v38  ;;  %v427_v34 = vadd.f32 %v405_v60, %v339_v48 }
 0x11c   :  { %3623 = vset.pattern.permute.xlu1 %v7778_v0  ;;  %1381 = vrot.lane.b32.xlu0 %v1271_v6, %s3826_s29 }
 0x11d   :  { %v515_v39 = vadd.f32 %v493_v25, %v427_v34  ;;  %v1494_v7 = vadd.f32 %v1472_v35, %v1450_v21  ;;  %v1328_v35 = vsel %vm141_vm1, %v4098_v51, %v4075_v44  ;;  %v4380_v44 = vsel %vm234_vm0, %v4095_v50, %v4129_v63 }
 0x11e   :  { %v4341_v13 = vpop.permute.xlu0 %1285  ;;  %7808 = vst [vmem:[#allocation84_spill] sm:$0xff] %v4380_v44  ;;  %v7370_v51 = vmov 7  }
 0x11f   :  { %7801 = vst [vmem:[#allocation77_spill] sm:$0xff] %v4341_v13  ;;  %v4343_v47 = vpop.permute.xlu1 %861  ;;  %1309 = vrot.lane.b32.xlu1 %v1266_v18, %s3819_s23  ;;  %v1538_v60 = vadd.f32 %v1516_v42, %v1494_v7  ;;  %v4371_v7 = vsel %vm67_vm3, %v1328_v35, 0.0  ;;  %v1735_v42 = vmul.f32 %v4380_v44, %v4080_v45 }
 0x120   :  { %7802 = vst [vmem:[#allocation78_spill] sm:$0xff] %v4343_v47  ;;  %1042 = vrot.lane.b32.xlu0 %v515_v39, %s3828_s21  ;;  %7806 = vst [vmem:[#allocation82_spill] sm:$0xff] %v4371_v7  ;;  %v1669_v21 = vmul.f32 %v4371_v7, %v4050_v37 }
 0x122   :  { %v4349_v11 = vpop.permute.xlu0 %202 }
 0x123   :  { %v4351_v48 = vpop.permute.xlu1 %218  ;;  %811 = vperm.xlu1 %3623, %v4087_v46  }
 0x124   :  { %7803 = vst [vmem:[#allocation79_spill] sm:$0xff] %v4351_v48  ;;  %1801 = vrot.lane.b32.xlu0 %v1538_v60, %s3828_s21 }
 0x126   :  { %v4355_v6 = vpop.permute.xlu0 %1373 }
 0x127   :  { %7804 = vst [vmem:[#allocation80_spill] sm:$0xff] %v4355_v6  ;;  %v4357_v10 = vpop.permute.xlu1 %1389  ;;  %3624 = vset.pattern.permute.xlu1 %v7764_v27 }
 0x128   :  { %877 = vperm.xlu1 %3624, %v4087_v46   ;;  %615 = vperm.xlu0 %3641, %v3933_v15  }
 0x12a   :  { %v4367_v39 = vpop.permute.xlu0 %325 }
 0x12b   :  { %7805 = vst [vmem:[#allocation81_spill] sm:$0xff] %v4367_v39  ;;  %v4373_v34 = vpop.permute.xlu1 %381 }
 0x12c   :  { %7807 = vst [vmem:[#allocation83_spill] sm:$0xff] %v4373_v34  ;;  %226 = vrot.lane.b32.xlu1 %v90_v22, %s3826_s29  ;;  %3642 = vset.pattern.permute.xlu0 %v7370_v51  ;;  %v1691_v22 = vmul.f32 %v3891_v8, %v4059_v40 }
 0x12d   :  { %3625 = vset.pattern.permute.xlu1 %v7768_v31  ;;  %695 = vperm.xlu0 %3642, %v3884_v5  }
 0x12e   :  { %v4387_v25 = vpop.permute.xlu0 %111  ;;  %v1713_v63 = vadd.f32 %v1691_v22, %v1669_v21  ;;  %v92_v21 = vld [vmem:[#allocation2 + $0x88] sm:$0xff] }
 0x12f   :  { %7809 = vst [vmem:[#allocation85_spill] sm:$0xff] %v4387_v25 }
 0x130   :  { %1397 = vrot.lane.b32.xlu1 %v1266_v18, %s3826_s29  ;;  %v4394_v50 = vpop.permute.xlu1 %949  ;;  %v1757_v35 = vadd.f32 %v1735_v42, %v1713_v63  ;;  %v1268_v63 = vld [vmem:[#allocation2 + $0x138] sm:$0xff] }
 0x131   :  { %7810 = vst [vmem:[#allocation86_spill] sm:$0xff] %v4394_v50  ;;  %699 = vperm.xlu0 %3642, %v3909_v12  }
 0x132   :  { %v4397_v60 = vpop.permute.xlu0 %1287 }
 0x133   :  { %7811 = vst [vmem:[#allocation87_spill] sm:$0xff] %v4397_v60  ;;  %v1473_v60 = vmul.f32 %v3916_v14, %v4069_v43  ;;  %v1417_v14 = vsel %vm234_vm0, %v4195_v3, %v4132_v2 }
 0x134   :  { %397 = vperm.xlu1 %3625, %v4123_v61   ;;  %v4400_v5 = vpop.permute.xlu1 %127 }
 0x135   :  { %7812 = vst [vmem:[#allocation88_spill] sm:$0xff] %v4400_v5  ;;  %1889 = vrot.lane.b32.xlu0 %v1757_v35, %s3830_s24 }
 0x136   :  { %v4403_v8 = vpop.permute.xlu0 %204 }
 0x137   :  { %7813 = vst [vmem:[#allocation89_spill] sm:$0xff] %v4403_v8 }
 0x138   :  { %3626 = vset.pattern.permute.xlu1 %v7774_v9  ;;  %v4406_v18 = vpop.permute.xlu1 %1303 }
 0x139   :  { %7814 = vst [vmem:[#allocation90_spill] sm:$0xff] %v4406_v18  ;;  %965 = vperm.xlu1 %3626, %v4087_v46   ;;  %703 = vperm.xlu0 %3642, %v3933_v15  }
 0x13a   :  { %v4410_v12 = vpop.permute.xlu0 %1375 }
 0x13b   :  { %7815 = vst [vmem:[#allocation91_spill] sm:$0xff] %v4410_v12 }
 0x13c   :  { %v4412_v22 = vpop.permute.xlu1 %799 }
 0x13d   :  { %135 = vrot.lane.b32.xlu1 %v92_v21, %s3819_s23 }
 0x13e   :  { %v4415_v42 = vpop.permute.xlu0 %330  ;;  %3627 = vset.pattern.permute.xlu1 %v7778_v0 }
 0x13f   :  { %7816 = vst [vmem:[#allocation92_spill] sm:$0xff] %v4415_v42 }
 0x141   :  { %1311 = vrot.lane.b32.xlu1 %v1268_v63, %s3819_s23  ;;  %v4419_v35 = vpop.permute.xlu1 %865 }
 0x142   :  { %v4421_v51 = vpop.permute.xlu0 %113 }
 0x143   :  { %7817 = vst [vmem:[#allocation93_spill] sm:$0xff] %v4421_v51 }
 0x145   :  { %815 = vperm.xlu1 %3627, %v4123_v61   ;;  %v4424_v15 = vpop.permute.xlu1 %220 }
 0x146   :  { %7818 = vst [vmem:[#allocation94_spill] sm:$0xff] %v4424_v15  ;;  %v4426_v46 = vpop.permute.xlu0 %1289 }
 0x147   :  { %7819 = vst [vmem:[#allocation95_spill] sm:$0xff] %v4426_v46  ;;  %v1329_v46 = vsel %vm141_vm1, %v4160_v54, %v4115_v59 }
 0x149   :  { %3628 = vset.pattern.permute.xlu1 %v7764_v27  ;;  %v4429_v39 = vpop.permute.xlu1 %1391 }
 0x14a   :  { %7820 = vst [vmem:[#allocation96_spill] sm:$0xff] %v4429_v39  ;;  %881 = vperm.xlu1 %3628, %v4123_v61   ;;  %v4432_v42 = vpop.permute.xlu0 %206 }
 0x14b   :  { %7821 = vst [vmem:[#allocation97_spill] sm:$0xff] %v4432_v42  ;;  %v4451_v42 = vsel %vm67_vm3, %v1329_v46, 0.0  ;;  %v4468_v46 = vsel %vm141_vm1, %v4108_v56, %v4149_v29 }
 0x14c   :  { %7825 = vst [vmem:[#allocation101_spill] sm:$0xff] %v4451_v42  ;;  %7827 = vst [vmem:[#allocation103_spill] sm:$0xff] %v4468_v46  ;;  %v825_v1 = vmul.f32 %v4105_v55, %v4468_v46 }
 0x14d   :  { %v4434_v25 = vpop.permute.xlu1 %385 }
 0x14e   :  { %7822 = vst [vmem:[#allocation98_spill] sm:$0xff] %v4434_v25  ;;  %228 = vrot.lane.b32.xlu1 %v92_v21, %s3826_s29  ;;  %v4437_v8 = vpop.permute.xlu0 %1377 }
 0x14f   :  { %7823 = vst [vmem:[#allocation99_spill] sm:$0xff] %v4437_v8  ;;  %3630 = vset.pattern.permute.xlu1 %v7768_v31  ;;  %v1451_v8 = vmul.f32 %v4451_v42, %v4061_v41 }
 0x151   :  { %v1495_v29 = vadd.f32 %v1473_v60, %v1451_v8  ;;  %v155_v60 = vsel %vm141_vm1, %v4217_v36, %v4145_v26 }
 0x152   :  { %1399 = vrot.lane.b32.xlu1 %v1268_v63, %s3826_s29  ;;  %v4445_v51 = vpop.permute.xlu1 %953  ;;  %v4447_v12 = vpop.permute.xlu0 %335  ;;  %v247_v63 = vsel %vm234_vm0, %v4189_v30, %v4126_v62 }
 0x153   :  { %7824 = vst [vmem:[#allocation100_spill] sm:$0xff] %v4447_v12  ;;  %v4474_v12 = vsel %vm234_vm0, %v4132_v2, %v4195_v3  ;;  %v4485_v30 = vsel %vm70_vm2, %v247_v63, 0.0  ;;  %v4500_v63 = vsel %vm141_vm1, %v4115_v59, %v4160_v54  ;;  %v4514_v2 = vsel %vm70_vm2, %v1417_v14, 0.0 }
 0x154   :  { %7828 = vst [vmem:[#allocation104_spill] sm:$0xff] %v4474_v12  ;;  %7829 = vst [vmem:[#allocation105_spill] sm:$0xff] %v4485_v30  ;;  %v1672_v54 = vmul.f32 %v4500_v63, %v4105_v55  ;;  %v1738_v14 = vmul.f32 %v4514_v2, %v4143_v24 }
 0x155   :  { %7831 = vst [vmem:[#allocation107_spill] sm:$0xff] %v4500_v63  ;;  %7833 = vst [vmem:[#allocation109_spill] sm:$0xff] %v4514_v2 }
 0x156   :  { %401 = vperm.xlu1 %3630, %v4158_v52   ;;  %v4454_v21 = vpop.permute.xlu1 %129 }
 0x157   :  { %7826 = vst [vmem:[#allocation102_spill] sm:$0xff] %v4454_v21  ;;  %v4456_v31 = vpop.permute.xlu0 %453 }
 0x158   :  { %v1517_v42 = vmul.f32 %v4474_v12, %v4456_v31  ;;  %v979_v12 = vmul.f32 %v4143_v24, %v4485_v30  ;;  %v1270_v30 = vld [vmem:[#allocation2 + $0x148] sm:$0xff] }
 0x15a   :  { %3631 = vset.pattern.permute.xlu1 %v7774_v9  ;;  %v4481_v62 = vpop.permute.xlu1 %1305  ;;  %v94_v9 = vld [vmem:[#allocation2 + $0x98] sm:$0xff]  ;;  %v1539_v8 = vadd.f32 %v1517_v42, %v1495_v29  ;;  %v4524_v29 = vsel %vm67_vm3, %v155_v60, 0.0  ;;  %v1694_v42 = vmul.f32 %v3951_v19, %v4112_v58 }
 0x15b   :  { %969 = vperm.xlu1 %3631, %v4123_v61   ;;  %v4488_v41 = vpop.permute.xlu0 %457  ;;  %v891_v61 = vmul.f32 %v4112_v58, %v3943_v17  ;;  %7835 = vst [vmem:[#allocation111_spill] sm:$0xff] %v4524_v29 }
 0x15c   :  { %7830 = vst [vmem:[#allocation106_spill] sm:$0xff] %v4488_v41  ;;  %1781 = vrot.lane.b32.xlu0 %v1539_v8, %s3828_s21  ;;  %v1716_v26 = vadd.f32 %v1694_v42, %v1672_v54 }
 0x15d   :  { %v913_v17 = vadd.f32 %v891_v61, %v825_v1  ;;  %v1330_v1 = vsel %vm141_vm1, %v4223_v23, %v4151_v49 }
 0x15e   :  { %v4510_v3 = vpop.permute.xlu1 %803  ;;  %v4545_v19 = vsel %vm67_vm3, %v1330_v1, 0.0  ;;  %v1760_v42 = vadd.f32 %v1738_v14, %v1716_v26  ;;  %v7846_v26 = vld [vmem:[#allocation8_spill] sm:$0xff] }
 0x15f   :  { %7832 = vst [vmem:[#allocation108_spill] sm:$0xff] %v4510_v3  ;;  %137 = vrot.lane.b32.xlu1 %v94_v9, %s3819_s23  ;;  %v4517_v59 = vpop.permute.xlu0 %461  ;;  %v1001_v61 = vadd.f32 %v979_v12, %v913_v17  ;;  %7838 = vst [vmem:[#allocation114_spill] sm:$0xff] %v4545_v19  ;;  %v4551_v12 = vsel %vm234_vm0, %v4162_v4, %v4243_v20  ;;  %v7840_v17 = vld [vmem:[#allocation28_spill] sm:$0xff]  ;;  %v1453_v36 = vmul.f32 %v4545_v19, %v4102_v53  ;;  %v7843_v20 = vld [vmem:[#allocation59_spill] sm:$0xff] }
 0x160   :  { %7834 = vst [vmem:[#allocation110_spill] sm:$0xff] %v4517_v59  ;;  %3632 = vset.pattern.permute.xlu1 %v7778_v0  ;;  %v342_v0 = vmul.f32 %v4102_v53, %v4524_v29  ;;  %7839 = vst [vmem:[#allocation115_spill] sm:$0xff] %v4551_v12  ;;  %v408_v49 = vmul.f32 %v7840_v17, %v3937_v16  ;;  %v496_v54 = vmul.f32 %v4488_v41, %v4551_v12  ;;  %v7844_v4 = vld [vmem:[#allocation37_spill] sm:$0xff] }
 0x161   :  { %1159 = vrot.lane.b32.xlu0 %v1001_v61, %s3830_s24  ;;  %v4569_v24 = vsel %vm234_vm0, %v7844_v4, %v7843_v20  ;;  %v1475_v14 = vmul.f32 %v7846_v26, %v7840_v17  ;;  %v7849_v20 = vld [vmem:[#allocation40_spill] sm:$0xff] }
 0x162   :  { %v430_v1 = vadd.f32 %v408_v49, %v342_v0  ;;  %7845 = vst [vmem:[#allocation118_spill] sm:$0xff] %v4569_v24  ;;  %v1519_v58 = vmul.f32 %v4569_v24, %v4488_v41  ;;  %v892_v4 = vmul.f32 %v7849_v20, %v3937_v16  ;;  %v7850_v41 = vld [vmem:[#allocation47_spill] sm:$0xff] }
 0x163   :  { %1313 = vrot.lane.b32.xlu1 %v1270_v30, %s3819_s23  ;;  %v4536_v8 = vpop.permute.xlu1 %869  ;;  %v4538_v60 = vpop.permute.xlu0 %465  ;;  %v1497_v2 = vadd.f32 %v1475_v14, %v1453_v36  ;;  %v1695_v36 = vmul.f32 %v7846_v26, %v7849_v20  ;;  %v1739_v16 = vmul.f32 %v4569_v24, %v7850_v41 }
 0x164   :  { %7836 = vst [vmem:[#allocation112_spill] sm:$0xff] %v4536_v8  ;;  %7837 = vst [vmem:[#allocation113_spill] sm:$0xff] %v4538_v60  ;;  %v518_v55 = vadd.f32 %v496_v54, %v430_v1  ;;  %v980_v54 = vmul.f32 %v7850_v41, %v4551_v12  ;;  %v7868_v12 = vld [vmem:[#allocation71_spill] sm:$0xff]  ;;  %v7873_v41 = vld [vmem:[#allocation10_spill] sm:$0xff] }
 0x165   :  { %1913 = vrot.lane.b32.xlu0 %v1760_v42, %s3830_s24  ;;  %v7848_v42 = vld [vmem:[#allocation36_spill] sm:$0xff]  ;;  %v1541_v1 = vadd.f32 %v1519_v58, %v1497_v2 }
 0x166   :  { %v826_v53 = vmul.f32 %v7848_v42, %v4524_v29  ;;  %v1673_v29 = vmul.f32 %v4545_v19, %v7848_v42  ;;  %v7854_v58 = vld [vmem:[#allocation68_spill] sm:$0xff]  ;;  %v7859_v19 = vld [vmem:[#allocation29_spill] sm:$0xff] }
 0x167   :  { %819 = vperm.xlu1 %3632, %v4158_v52   ;;  %v4558_v61 = vpop.permute.xlu1 %222  ;;  %v4560_v23 = vpop.permute.xlu0 %469 }
 0x168   :  { %7841 = vst [vmem:[#allocation116_spill] sm:$0xff] %v4558_v61  ;;  %7842 = vst [vmem:[#allocation117_spill] sm:$0xff] %v4560_v23  ;;  %v914_v63 = vadd.f32 %v892_v4, %v826_v53  ;;  %v7855_v4 = vmov 4   ;;  %v1717_v53 = vadd.f32 %v1695_v36, %v1673_v29 }
 0x169   :  { %1024 = vrot.lane.b32.xlu0 %v518_v55, %s3828_s21  ;;  %v7853_v55 = vld [vmem:[#allocation43_spill] sm:$0xff] }
 0x16a   :  { %v1002_v2 = vadd.f32 %v980_v54, %v914_v63  ;;  %v7860_v63 = vld [vmem:[#allocation44_spill] sm:$0xff] }
 0x16b   :  { %3633 = vset.pattern.permute.xlu1 %v7764_v27  ;;  %v4576_v49 = vpop.permute.xlu1 %1393  ;;  %v4578_v0 = vpop.permute.xlu0 %473  ;;  %v249_v29 = vsel %vm234_vm0, %v4351_v48, %v7860_v63  ;;  %v96_v63 = vld [vmem:[#allocation2 + $0xa8] sm:$0xff] }
 0x16c   :  { %7847 = vst [vmem:[#allocation8_spill] sm:$0xff] %v4578_v0  ;;  %885 = vperm.xlu1 %3633, %v4158_v52   ;;  %v1331_v52 = vsel %vm141_vm1, %v7854_v58, %v7853_v55  ;;  %v4646_v48 = vsel %vm70_vm2, %v249_v29, 0.0  ;;  %v4663_v29 = vsel %vm141_vm1, %v7853_v55, %v7854_v58 }
 0x16d   :  { %1783 = vrot.lane.b32.xlu0 %v1541_v1, %s3828_s21  ;;  %v4612_v26 = vsel %vm67_vm3, %v1331_v52, 0.0  ;;  %v1761_v1 = vadd.f32 %v1739_v16, %v1717_v53  ;;  %v7864_v52 = vld [vmem:[#allocation41_spill] sm:$0xff]  ;;  %v7866_v16 = vld [vmem:[#allocation46_spill] sm:$0xff]  ;;  %7871 = vst [vmem:[#allocation71_spill] sm:$0xff] %v4646_v48  ;;  %7876 = vst [vmem:[#allocation125_spill] sm:$0xff] %v4663_v29 }
 0x16e   :  { %7858 = vst [vmem:[#allocation121_spill] sm:$0xff] %v4612_v26  ;;  %v1455_v24 = vmul.f32 %v4612_v26, %v7859_v19  ;;  %v4636_v53 = vsel %vm234_vm0, %v7866_v16, %v4357_v10  ;;  %v7870_v26 = vld [vmem:[#allocation9_spill] sm:$0xff] }
 0x16f   :  { %v4588_v27 = vpop.permute.xlu1 %389  ;;  %v4590_v17 = vpop.permute.xlu0 %477  ;;  %7867 = vst [vmem:[#allocation46_spill] sm:$0xff] %v4636_v53  ;;  %v7872_v19 = vld [vmem:[#allocation53_spill] sm:$0xff] }
 0x170   :  { %7851 = vst [vmem:[#allocation119_spill] sm:$0xff] %v4588_v27  ;;  %7852 = vst [vmem:[#allocation120_spill] sm:$0xff] %v4590_v17  ;;  %230 = vrot.lane.b32.xlu1 %v94_v9, %s3826_s29  ;;  %v1676_v58 = vmul.f32 %v4663_v29, %v7872_v19 }
 0x171   :  { %3635 = vset.pattern.permute.xlu1 %v7855_v4  ;;  %1139 = vrot.lane.b32.xlu0 %v1002_v2, %s3830_s24  ;;  %v7863_v2 = vld [vmem:[#allocation66_spill] sm:$0xff] }
 0x173   :  { %v4606_v14 = vpop.permute.xlu0 %481 }
 0x174   :  { %7856 = vst [vmem:[#allocation43_spill] sm:$0xff] %v4606_v14  ;;  %v4608_v9 = vpop.permute.xlu1 %957  ;;  %1401 = vrot.lane.b32.xlu1 %v1270_v30, %s3826_s29  ;;  %v4630_v30 = vsel %vm141_vm1, %v7864_v52, %v7863_v2  ;;  %v1521_v14 = vmul.f32 %v4636_v53, %v4517_v59  ;;  %v1272_v59 = vld [vmem:[#allocation2 + $0x158] sm:$0xff] }
 0x175   :  { %7857 = vst [vmem:[#allocation68_spill] sm:$0xff] %v4608_v9  ;;  %1893 = vrot.lane.b32.xlu0 %v1761_v1, %s3830_s24  ;;  %7865 = vst [vmem:[#allocation124_spill] sm:$0xff] %v4630_v30  ;;  %v7869_v1 = vld [vmem:[#allocation45_spill] sm:$0xff]  ;;  %v829_v2 = vmul.f32 %v7872_v19, %v4630_v30  ;;  %v7879_v30 = vld [vmem:[#allocation63_spill] sm:$0xff] }
 0x177   :  { %v4622_v54 = vpop.permute.xlu0 %485 }
 0x178   :  { %7861 = vst [vmem:[#allocation122_spill] sm:$0xff] %v4622_v54  ;;  %v4624_v36 = vpop.permute.xlu1 %131  ;;  %117 = vrot.lane.b32.xlu1 %v7868_v12, %s3819_s23  ;;  %v1477_v54 = vmul.f32 %v7870_v26, %v7869_v1  ;;  %v1419_v12 = vsel %vm234_vm0, %v4357_v10, %v7866_v16  ;;  %v983_v10 = vmul.f32 %v7879_v30, %v4646_v48  ;;  %v7880_v16 = vld [vmem:[#allocation50_spill] sm:$0xff] }
 0x179   :  { %7862 = vst [vmem:[#allocation123_spill] sm:$0xff] %v4624_v36  ;;  %711 = vperm.xlu0 %3642, %v7873_v41   ;;  %v157_v41 = vsel %vm141_vm1, %v4400_v5, %v7880_v16  ;;  %v4676_v20 = vsel %vm70_vm2, %v1419_v12, 0.0  ;;  %v7887_v5 = vld [vmem:[#allocation39_spill] sm:$0xff] }
 0x17a   :  { %v1499_v52 = vadd.f32 %v1477_v54, %v1455_v24  ;;  %v7877_v24 = vld [vmem:[#allocation14_spill] sm:$0xff]  ;;  %v7878_v54 = vld [vmem:[#allocation55_spill] sm:$0xff]  ;;  %v4687_v42 = vsel %vm67_vm3, %v157_v41, 0.0 }
 0x17b   :  { %v4655_v26 = vpop.permute.xlu0 %115  ;;  %v895_v53 = vmul.f32 %v7878_v54, %v7877_v24  ;;  %7881 = vst [vmem:[#allocation14_spill] sm:$0xff] %v4676_v20  ;;  %7884 = vst [vmem:[#allocation128_spill] sm:$0xff] %v4687_v42 }
 0x17c   :  { %7874 = vst [vmem:[#allocation9_spill] sm:$0xff] %v4655_v26  ;;  %v4657_v1 = vpop.permute.xlu1 %1307  ;;  %139 = vrot.lane.b32.xlu1 %v96_v63, %s3819_s23  ;;  %v1543_v26 = vadd.f32 %v1521_v14, %v1499_v52  ;;  %v7885_v14 = vld [vmem:[#allocation15_spill] sm:$0xff] }
 0x17d   :  { %7875 = vst [vmem:[#allocation10_spill] sm:$0xff] %v4657_v1  ;;  %v917_v55 = vadd.f32 %v895_v53, %v829_v2  ;;  %v1698_v52 = vmul.f32 %v7885_v14, %v7878_v54  ;;  %v1742_v2 = vmul.f32 %v4676_v20, %v7879_v30  ;;  %v7886_v53 = vld [vmem:[#allocation52_spill] sm:$0xff]  ;;  %v7890_v30 = vld [vmem:[#allocation54_spill] sm:$0xff] }
 0x17e   :  { %1785 = vrot.lane.b32.xlu0 %v1543_v26, %s3828_s21  ;;  %v1332_v12 = vsel %vm141_vm1, %v4406_v18, %v7886_v53  ;;  %v4711_v54 = vsel %vm234_vm0, %v7890_v30, %v4424_v15  ;;  %v7896_v15 = vld [vmem:[#allocation56_spill] sm:$0xff] }
 0x17f   :  { %v4681_v24 = vpop.permute.xlu0 %1291  ;;  %v1005_v26 = vadd.f32 %v983_v10, %v917_v55  ;;  %v1720_v16 = vadd.f32 %v1698_v52, %v1676_v58  ;;  %v4705_v14 = vsel %vm67_vm3, %v1332_v12, 0.0  ;;  %7891 = vst [vmem:[#allocation130_spill] sm:$0xff] %v4711_v54  ;;  %v7893_v55 = vld [vmem:[#allocation11_spill] sm:$0xff]  ;;  %v7894_v58 = vld [vmem:[#allocation61_spill] sm:$0xff] }
 0x180   :  { %7882 = vst [vmem:[#allocation126_spill] sm:$0xff] %v4681_v24  ;;  %v4683_v48 = vpop.permute.xlu1 %807  ;;  %1315 = vrot.lane.b32.xlu1 %v1272_v59, %s3819_s23  ;;  %v346_v24 = vmul.f32 %v7887_v5, %v4687_v42  ;;  %7889 = vst [vmem:[#allocation129_spill] sm:$0xff] %v4705_v14  ;;  %v412_v52 = vmul.f32 %v7894_v58, %v7893_v55  ;;  %v1457_v12 = vmul.f32 %v4705_v14, %v7887_v5 }
 0x181   :  { %7883 = vst [vmem:[#allocation127_spill] sm:$0xff] %v4683_v48 }
 0x182   :  { %1163 = vrot.lane.b32.xlu0 %v1005_v26, %s3830_s24  ;;  %v500_v26 = vmul.f32 %v4538_v60, %v4711_v54  ;;  %v434_v53 = vadd.f32 %v412_v52, %v346_v24 }
 0x183   :  { %v4701_v41 = vpop.permute.xlu0 %489 }
 0x184   :  { %7888 = vst [vmem:[#allocation15_spill] sm:$0xff] %v4701_v41  ;;  %232 = vrot.lane.b32.xlu1 %v96_v63, %s3826_s29  ;;  %v1764_v41 = vadd.f32 %v1742_v2, %v1720_v16  ;;  %v4729_v63 = vsel %vm234_vm0, %v7896_v15, %v4429_v39  ;;  %v7898_v16 = vld [vmem:[#allocation12_spill] sm:$0xff]  ;;  %v522_v52 = vadd.f32 %v500_v26, %v434_v53  ;;  %v7903_v15 = vld [vmem:[#allocation62_spill] sm:$0xff] }
 0x185   :  { %v4714_v10 = vpop.permute.xlu1 %873  ;;  %7897 = vst [vmem:[#allocation132_spill] sm:$0xff] %v4729_v63  ;;  %v1479_v24 = vmul.f32 %v7898_v16, %v7894_v58  ;;  %v1523_v2 = vmul.f32 %v4729_v63, %v4538_v60  ;;  %v896_v53 = vmul.f32 %v4343_v47, %v7893_v55  ;;  %v984_v26 = vmul.f32 %v4394_v50, %v4711_v54  ;;  %v7908_v54 = vld [vmem:[#allocation22_spill] sm:$0xff] }
 0x186   :  { %7892 = vst [vmem:[#allocation131_spill] sm:$0xff] %v4714_v10  ;;  %1917 = vrot.lane.b32.xlu0 %v1764_v41, %s3830_s24  ;;  %v7899_v41 = vld [vmem:[#allocation73_spill] sm:$0xff]  ;;  %v1699_v39 = vmul.f32 %v7898_v16, %v4343_v47  ;;  %v1743_v55 = vmul.f32 %v4729_v63, %v4394_v50 }
 0x187   :  { %v4723_v18 = vpop.permute.xlu0 %208  ;;  %v830_v5 = vmul.f32 %v7899_v41, %v4687_v42  ;;  %v7902_v42 = vmov 7   ;;  %v7919_v47 = vld [vmem:[#allocation21_spill] sm:$0xff] }
 0x188   :  { %7895 = vst [vmem:[#allocation11_spill] sm:$0xff] %v4723_v18  ;;  %1403 = vrot.lane.b32.xlu1 %v1272_v59, %s3826_s29  ;;  %v1501_v18 = vadd.f32 %v1479_v24, %v1457_v12  ;;  %v4746_v59 = vld [vmem:[%s7298_s1] sm:$0xff] }
 0x189   :  { %v4732_v30 = vpop.permute.xlu1 %224  ;;  %v918_v24 = vadd.f32 %v896_v53, %v830_v5  ;;  %v1333_v5 = vsel %vm141_vm1, %v4481_v62, %v7903_v15 }
 0x18a   :  { %1028 = vrot.lane.b32.xlu0 %v522_v52, %s3828_s21  ;;  %v1545_v12 = vadd.f32 %v1523_v2, %v1501_v18  ;;  %v1677_v52 = vmul.f32 %v4705_v14, %v7899_v41  ;;  %v7907_v14 = vld [vmem:[#allocation20_spill] sm:$0xff] }
 0x18b   :  { %v4741_v19 = vpop.permute.xlu0 %1379  ;;  %v1006_v18 = vadd.f32 %v984_v26, %v918_v24  ;;  %v153_v26 = vsel %vm141_vm1, %v7908_v54, %v7907_v14  ;;  %v7909_v24 = vld [vmem:[#allocation67_spill] sm:$0xff]  ;;  %v7913_v14 = vld [vmem:[#allocation60_spill] sm:$0xff] }
 0x18c   :  { %7900 = vst [vmem:[#allocation12_spill] sm:$0xff] %v4741_v19  ;;  %603 = vperm.xlu1 %3635, %v4746_v59   ;;  %v1721_v53 = vadd.f32 %v1699_v39, %v1677_v52  ;;  %v4788_v39 = vsel %vm234_vm0, %v7909_v24, %v4576_v49  ;;  %v4793_v52 = vld [vmem:[%s7298_s1 + $0x8] sm:$0xff]  ;;  %v4813_v50 = vsel %vm67_vm3, %v153_v26, 0.0  ;;  %v7471_v26 = vmov 1  }
 0x18d   :  { %v4749_v58 = vpop.permute.xlu1 %1395  ;;  %7910 = vst [vmem:[#allocation20_spill] sm:$0xff] %v4788_v39  ;;  %7916 = vst [vmem:[#allocation136_spill] sm:$0xff] %v4813_v50 }
 0x18e   :  { %7901 = vst [vmem:[#allocation133_spill] sm:$0xff] %v4749_v58  ;;  %1787 = vrot.lane.b32.xlu0 %v1545_v12, %s3828_s21  ;;  %v4775_v12 = vsel %vm67_vm3, %v1333_v5, 0.0  ;;  %v1765_v16 = vadd.f32 %v1743_v55, %v1721_v53  ;;  %v7911_v55 = vld [vmem:[#allocation48_spill] sm:$0xff]  ;;  %v4807_v53 = vsel %vm141_vm1, %v7913_v14, %v4454_v21 }
 0x18f   :  { %v4770_v2 = vpop.permute.xlu0 %973  ;;  %7905 = vst [vmem:[#allocation134_spill] sm:$0xff] %v4775_v12  ;;  %v1459_v5 = vmul.f32 %v4775_v12, %v7911_v55  ;;  %7914 = vst [vmem:[#allocation22_spill] sm:$0xff] %v4807_v53  ;;  %v7917_v12 = vld [vmem:[#allocation13_spill] sm:$0xff] }
 0x190   :  { %3636 = vset.pattern.permute.xlu1 %v7902_v42  ;;  %7904 = vst [vmem:[#allocation62_spill] sm:$0xff] %v4770_v2  ;;  %v1481_v55 = vmul.f32 %v7917_v12, %v4373_v34  ;;  %v833_v12 = vmul.f32 %v4412_v22, %v4807_v53 }
 0x191   :  { %v4759_v60 = vpop.permute.xlu1 %393  ;;  %691 = vperm.xlu1 %3636, %v4746_v59  }
 0x192   :  { %1143 = vrot.lane.b32.xlu0 %v1006_v18, %s3830_s24  ;;  %v7912_v18 = vld [vmem:[#allocation64_spill] sm:$0xff]  ;;  %v1503_v34 = vadd.f32 %v1481_v55, %v1459_v5  ;;  %v4849_v55 = vsel %vm141_vm1, %v7903_v15, %v4481_v62  ;;  %v7925_v5 = vld [vmem:[#allocation74_spill] sm:$0xff] }
 0x193   :  { %v251_v54 = vsel %vm234_vm0, %v4558_v61, %v7912_v18  ;;  %v4809_v2 = vpop.permute.xlu0 %1293  ;;  %v1525_v18 = vmul.f32 %v4788_v39, %v4560_v23  ;;  %v1421_v39 = vsel %vm234_vm0, %v4576_v49, %v7909_v24  ;;  %v7922_v23 = vld [vmem:[#allocation16_spill] sm:$0xff]  ;;  %7923 = vst [vmem:[#allocation21_spill] sm:$0xff] %v4849_v55  ;;  %v7924_v49 = vld [vmem:[#allocation35_spill] sm:$0xff]  ;;  %v159_v53 = vsel %vm141_vm1, %v4624_v36, %v7925_v5 }
 0x194   :  { %7915 = vst [vmem:[#allocation67_spill] sm:$0xff] %v4809_v2  ;;  %v4829_v14 = vsel %vm70_vm2, %v251_v54, 0.0  ;;  %v3685_v54 = vld [vmem:[#allocation2] sm:$0xff]  ;;  %v4865_v62 = vsel %vm70_vm2, %v1421_v39, 0.0  ;;  %v1449_v36 = vmul.f32 %v4371_v7, %v4035_v33  ;;  %v4878_v39 = vsel %vm67_vm3, %v159_v53, 0.0 }
 0x195   :  { %3637 = vset.pattern.permute.xlu1 %v7855_v4  ;;  %v987_v24 = vmul.f32 %v4445_v51, %v4829_v14  ;;  %v1547_v41 = vadd.f32 %v1525_v18, %v1503_v34  ;;  %7926 = vst [vmem:[#allocation16_spill] sm:$0xff] %v4865_v62  ;;  %v3686_v34 = vld [vmem:[#allocation2 + $0xb0] sm:$0xff]  ;;  %7928 = vst [vmem:[#allocation137_spill] sm:$0xff] %v4878_v39  ;;  %v4896_v53 = vsel %vm234_vm0, %v4349_v11, %v4732_v30 }
 0x196   :  { %v4778_v63 = vpop.permute.xlu1 %961  ;;  %607 = vperm.xlu1 %3637, %v4793_v52   ;;  %1897 = vrot.lane.b32.xlu0 %v1765_v16, %s3830_s24  ;;  %v7918_v16 = vld [vmem:[#allocation26_spill] sm:$0xff]  ;;  %v1471_v18 = vmul.f32 %v3686_v34, %v4052_v38  ;;  %7931 = vst [vmem:[#allocation138_spill] sm:$0xff] %v4896_v53 }
 0x197   :  { %7906 = vst [vmem:[#allocation135_spill] sm:$0xff] %v4778_v63  ;;  %v4825_v21 = vsel %vm234_vm0, %v7919_v47, %v7918_v16  ;;  %7921 = vst [vmem:[#allocation26_spill] sm:$0xff] %v4829_v14  ;;  %v3684_v47 = vld [vmem:[%s7298_s1 + $0x10] sm:$0xff]  ;;  %v404_v16 = vmul.f32 %v3685_v54, %v4052_v38  ;;  %v4867_v15 = vpop.permute.xlu0 %210  ;;  %v1680_v14 = vmul.f32 %v4849_v55, %v4412_v22 }
 0x198   :  { %7920 = vst [vmem:[#allocation13_spill] sm:$0xff] %v4825_v21  ;;  %v492_v19 = vmul.f32 %v4033_v32, %v4825_v21  ;;  %7927 = vst [vmem:[#allocation35_spill] sm:$0xff] %v4867_v15  ;;  %v1334_v38 = vsel %vm141_vm1, %v4657_v1, %v4341_v13  ;;  %v1493_v13 = vadd.f32 %v1471_v18, %v1449_v36  ;;  %v8010_v1 = vld [vmem:[#allocation85_spill] sm:$0xff] }
 0x199   :  { %v4917_v36 = vsel %vm234_vm0, %v4355_v6, %v4749_v58  ;;  %v5196_v6 = vld [vmem:[%s7298_s1 + $0x40] sm:$0xff] }
 0x19a   :  { %v4819_v61 = vpop.permute.xlu1 %133  ;;  %3638 = vset.pattern.permute.xlu1 %v7471_v26  ;;  %719 = vperm.xlu0 %3642, %v7922_v23   ;;  %v338_v26 = vmul.f32 %v4035_v33, %v4813_v50  ;;  %v899_v23 = vmul.f32 %v4419_v35, %v7924_v49  ;;  %v1515_v33 = vmul.f32 %v4380_v44, %v4033_v32  ;;  %v7935_v32 = vld [vmem:[#allocation17_spill] sm:$0xff] }
 0x19b   :  { %545 = vperm.xlu1 %3638, %v3684_v47   ;;  %v416_v44 = vmul.f32 %v4434_v25, %v7935_v32  ;;  %7937 = vst [vmem:[#allocation17_spill] sm:$0xff] %v4917_v36  ;;  %v1527_v32 = vmul.f32 %v4917_v36, %v4578_v0 }
 0x19c   :  { %v921_v49 = vadd.f32 %v899_v23, %v833_v12  ;;  %v426_v5 = vadd.f32 %v404_v16, %v338_v26  ;;  %v7929_v12 = vld [vmem:[#allocation38_spill] sm:$0xff] }
 0x19d   :  { %v1702_v23 = vmul.f32 %v7929_v12, %v4419_v35  ;;  %v7932_v12 = vld [vmem:[#allocation58_spill] sm:$0xff] }
 0x19e   :  { %v4859_v2 = vpop.permute.xlu1 %1309  ;;  %1789 = vrot.lane.b32.xlu0 %v1547_v41, %s3828_s21  ;;  %v1746_v41 = vmul.f32 %v4865_v62, %v4445_v51  ;;  %v1009_v26 = vadd.f32 %v987_v24, %v921_v49  ;;  %v350_v7 = vmul.f32 %v7932_v12, %v4878_v39  ;;  %v4903_v24 = vsel %vm67_vm3, %v1334_v38, 0.0  ;;  %v4905_v49 = vpop.permute.xlu0 %1381 }
 0x19f   :  { %3639 = vset.pattern.permute.xlu1 %v7855_v4  ;;  %v1724_v34 = vadd.f32 %v1702_v23, %v1680_v14  ;;  %7933 = vst [vmem:[#allocation139_spill] sm:$0xff] %v4903_v24  ;;  %7934 = vst [vmem:[#allocation140_spill] sm:$0xff] %v4905_v49  ;;  %v1537_v23 = vadd.f32 %v1515_v33, %v1493_v13  ;;  %v888_v13 = vmul.f32 %v3685_v54, %v4059_v40 }
 0x1a0   :  { %611 = vperm.xlu1 %3639, %v3684_v47   ;;  %v514_v47 = vadd.f32 %v492_v19, %v426_v5  ;;  %v504_v19 = vmul.f32 %v4578_v0, %v4896_v53  ;;  %v7936_v5 = vmov 1   ;;  %v438_v38 = vadd.f32 %v416_v44, %v350_v7 }
 0x1a1   :  { %v1768_v14 = vadd.f32 %v1746_v41, %v1724_v34  ;;  %v822_v41 = vmul.f32 %v4050_v37, %v4813_v50  ;;  %v976_v7 = vmul.f32 %v4080_v45, %v4825_v21  ;;  %v7942_v50 = vld [vmem:[#allocation70_spill] sm:$0xff] }
 0x1a2   :  { %v4888_v16 = vpop.permute.xlu1 %811  ;;  %1167 = vrot.lane.b32.xlu0 %v1009_v26, %s3830_s24  ;;  %v1461_v26 = vmul.f32 %v4903_v24, %v7932_v12  ;;  %v526_v58 = vadd.f32 %v504_v19, %v438_v38  ;;  %v4934_v44 = vpop.permute.xlu0 %1042  ;;  %v823_v19 = vmul.f32 %v4050_v37, %v7942_v50  ;;  %v3687_v38 = vld [vmem:[%s7298_s1 + $0x18] sm:$0xff]  ;;  %v5202_v12 = vld [vmem:[#allocation2 + $0x120] sm:$0xff] }
 0x1a3   :  { %7930 = vst [vmem:[#allocation38_spill] sm:$0xff] %v4888_v16  ;;  %v910_v54 = vadd.f32 %v888_v13, %v822_v41  ;;  %v7944_v41 = vld [vmem:[#allocation72_spill] sm:$0xff]  ;;  %8007 = vst [vmem:[#allocation158_spill] sm:$0xff] %v5202_v12 }
 0x1a4   :  { %1020 = vrot.lane.b32.xlu1 %v514_v47, %s3828_s21  ;;  %v7939_v47 = vld [vmem:[#allocation18_spill] sm:$0xff]  ;;  %v977_v13 = vmul.f32 %v4080_v45, %v7944_v41 }
 0x1a5   :  { %3640 = vset.pattern.permute.xlu1 %v7936_v5  ;;  %v1483_v34 = vmul.f32 %v7939_v47, %v4434_v25  ;;  %7940 = vst [vmem:[#allocation18_spill] sm:$0xff] %v4934_v44  ;;  %v7504_v47 = vmov 1.0|1.0   ;;  %v4948_v44 = vld [vmem:[#allocation2 + $0x8] sm:$0xff] }
 0x1a6   :  { %1921 = vrot.lane.b32.xlu0 %v1768_v14, %s3830_s24  ;;  %v834_v14 = vmul.f32 %v4510_v3, %v4878_v39  ;;  %3460 = vmatprep.subr.bf16.mxu0 %v7504_v47  ;;  %7943 = vst [vmem:[#allocation143_spill] sm:$0xff] %v4948_v44  ;;  %v988_v39 = vmul.f32 %v4608_v9, %v4896_v53  ;;  %v7946_v53 = vld [vmem:[#allocation75_spill] sm:$0xff] }
 0x1a7   :  { %v4919_v18 = vpop.permute.xlu1 %877  ;;  %3476 = vmatprep.subr.bf16.mxu1 %v7504_v47  ;;  %3461 = vmatpush3.bf16.msra.mxu0 %v7504_v47  ;;  %v1670_v41 = vmul.f32 %v7946_v53, %v4050_v37 }
 0x1a8   :  { %7938 = vst [vmem:[#allocation141_spill] sm:$0xff] %v4919_v18  ;;  %1779 = vrot.lane.b32.xlu1 %v1537_v23, %s3828_s21  ;;  %v1505_v23 = vadd.f32 %v1483_v34, %v1461_v26  ;;  %v889_v26 = vmul.f32 %v4948_v44, %v4059_v40  ;;  %v998_v44 = vadd.f32 %v976_v7, %v910_v54 }
 0x1a9   :  { %3477 = vmatpush3.bf16.msra.mxu1 %v7504_v47  ;;  %3462 = vmatprep.subr.bf16.mxu0 %v7504_v47 }
 0x1aa   :  { %1032 = vrot.lane.b32.xlu0 %v526_v58, %s3828_s21  ;;  %v3689_v58 = vld [vmem:[#allocation2 + $0x60] sm:$0xff]  ;;  %v1549_v21 = vadd.f32 %v1527_v32, %v1505_v23  ;;  %v1681_v32 = vmul.f32 %v4903_v24, %v4510_v3  ;;  %3478 = vmatprep.subr.bf16.mxu1 %v7504_v47  ;;  %v911_v23 = vadd.f32 %v889_v26, %v823_v19  ;;  %v4983_v19 = vld [vmem:[#allocation2 + $0xb8] sm:$0xff] }
 0x1ab   :  { %v4936_v33 = vpop.permute.xlu1 %226  ;;  %v900_v34 = vmul.f32 %v3689_v58, %v4536_v8  ;;  %7949 = vst [vmem:[#allocation145_spill] sm:$0xff] %v4983_v19  ;;  %v1692_v37 = vmul.f32 %v4983_v19, %v4059_v40  ;;  %3463 = vmatpush3.bf16.msra.mxu0 %v7504_v47  ;;  %v7953_v40 = vld [vmem:[#allocation42_spill] sm:$0xff]  ;;  %v5149_v19 = vld [vmem:[#allocation2 + $0x28] sm:$0xff] }
 0x1ac   :  { %7941 = vst [vmem:[#allocation142_spill] sm:$0xff] %v4936_v33  ;;  %549 = vperm.xlu1 %3640, %v3687_v38   ;;  %v7945_v38 = vld [vmem:[#allocation32_spill] sm:$0xff]  ;;  %3464 = vmatprep.subr.bf16.mxu0 %v7504_v47 }
 0x1ad   :  { %v154_v50 = vsel %vm141_vm1, %v7945_v38, %v4108_v56  ;;  %v922_v58 = vadd.f32 %v900_v34, %v834_v14  ;;  %v4972_v56 = vpop.permute.xlu0 %1801  ;;  %v3690_v14 = vld [vmem:[#allocation2 + $0x110] sm:$0xff]  ;;  %3479 = vmatpush3.bf16.msra.mxu1 %v7504_v47 }
 0x1ae   :  { %1791 = vrot.lane.b32.xlu0 %v1549_v21, %s3828_s21  ;;  %7947 = vst [vmem:[#allocation32_spill] sm:$0xff] %v4972_v56  ;;  %v4977_v7 = vsel %vm67_vm3, %v154_v50, 0.0  ;;  %v1703_v54 = vmul.f32 %v3690_v14, %v4536_v8  ;;  %v1747_v21 = vmul.f32 %v4917_v36, %v4608_v9  ;;  %v999_v50 = vadd.f32 %v977_v13, %v911_v23 }
 0x1af   :  { %v4962_v0 = vpop.permute.xlu1 %1397  ;;  %7948 = vst [vmem:[#allocation144_spill] sm:$0xff] %v4977_v7  ;;  %v1010_v34 = vadd.f32 %v988_v39, %v922_v58  ;;  %v1714_v39 = vadd.f32 %v1692_v37, %v1670_v41  ;;  %v7952_v58 = vld [vmem:[#allocation19_spill] sm:$0xff]  ;;  %3480 = vmatprep.subr.bf16.mxu1 %v7504_v47  ;;  %3465 = vmatpush3.bf16.msra.mxu0 %v7504_v47 }
 0x1b0   :  { %1135 = vrot.lane.b32.xlu1 %v998_v44, %s3830_s24  ;;  %v7950_v44 = vld [vmem:[#allocation76_spill] sm:$0xff]  ;;  %v1725_v14 = vadd.f32 %v1703_v54, %v1681_v32  ;;  %v340_v36 = vmul.f32 %v7952_v58, %v4977_v7  ;;  %v5005_v32 = vld [vmem:[#allocation2 + $0x10] sm:$0xff]  ;;  %3466 = vmatprep.subr.bf16.mxu0 %v7504_v47 }
 0x1b1   :  { %3643 = vset.pattern.permute.xlu1 %v7855_v4  ;;  %v1736_v26 = vmul.f32 %v7950_v44, %v4080_v45  ;;  %v7954_v45 = vld [vmem:[#allocation27_spill] sm:$0xff]  ;;  %7956 = vst [vmem:[#allocation42_spill] sm:$0xff] %v5005_v32  ;;  %v406_v41 = vmul.f32 %v5005_v32, %v4069_v43  ;;  %3481 = vmatpush3.bf16.msra.mxu1 %v7504_v47 }
 0x1b2   :  { %1147 = vrot.lane.b32.xlu0 %v1010_v34, %s3830_s24  ;;  %v5002_v13 = vsel %vm234_vm0, %v7954_v45, %v7953_v40  ;;  %v1769_v23 = vadd.f32 %v1747_v21, %v1725_v14  ;;  %v5011_v34 = vpop.permute.xlu0 %615  ;;  %3482 = vmatprep.subr.bf16.mxu1 %v7504_v47  ;;  %v341_v14 = vmul.f32 %v7952_v58, %v4468_v46  ;;  %v7960_v45 = vld [vmem:[#allocation105_spill] sm:$0xff] }
 0x1b3   :  { %v4989_v38 = vpop.permute.xlu1 %397  ;;  %7955 = vst [vmem:[#allocation19_spill] sm:$0xff] %v5002_v13  ;;  %v494_v54 = vmul.f32 %v4456_v31, %v5002_v13  ;;  %7957 = vst [vmem:[#allocation27_spill] sm:$0xff] %v5011_v34  ;;  %v1758_v37 = vadd.f32 %v1736_v26, %v1714_v39  ;;  %3467 = vmatpush3.bf16.msra.mxu0 %v7504_v47  ;;  %v5025_v26 = vld [vmem:[#allocation2 + $0x18] sm:$0xff]  ;;  %v5048_v34 = vld [vmem:[#allocation2 + $0xc8] sm:$0xff] }
 0x1b4   :  { %7951 = vst [vmem:[#allocation146_spill] sm:$0xff] %v4989_v38  ;;  %1157 = vrot.lane.b32.xlu1 %v999_v50, %s3830_s24  ;;  %v428_v50 = vadd.f32 %v406_v41, %v340_v36  ;;  %7959 = vst [vmem:[#allocation148_spill] sm:$0xff] %v5025_v26  ;;  %v407_v39 = vmul.f32 %v5025_v26, %v4069_v43  ;;  %v495_v36 = vmul.f32 %v4456_v31, %v7960_v45  ;;  %v7966_v26 = vld [vmem:[#allocation109_spill] sm:$0xff]  ;;  %v7996_v45 = vld [vmem:[#allocation59_spill] sm:$0xff] }
 0x1b5   :  { %3483 = vmatpush3.bf16.msra.mxu1 %v7504_v47  ;;  %3468 = vmatprep.subr.bf16.mxu0 %v7504_v47  ;;  %7965 = vst [vmem:[#allocation152_spill] sm:$0xff] %v5048_v34  ;;  %v1474_v46 = vmul.f32 %v5048_v34, %v4069_v43  ;;  %v1518_v44 = vmul.f32 %v7966_v26, %v4456_v31 }
 0x1b6   :  { %1901 = vrot.lane.b32.xlu0 %v1769_v23, %s3830_s24  ;;  %v516_v40 = vadd.f32 %v494_v54, %v428_v50  ;;  %v5034_v23 = vld [vmem:[%s7298_s1 + $0x48] sm:$0xff]  ;;  %v5040_v54 = vpop.permute.xlu0 %695  ;;  %3484 = vmatprep.subr.bf16.mxu1 %v7504_v47  ;;  %v7964_v50 = vld [vmem:[#allocation107_spill] sm:$0xff] }
 0x1b7   :  { %7961 = vst [vmem:[#allocation149_spill] sm:$0xff] %v5034_v23  ;;  %7963 = vst [vmem:[#allocation151_spill] sm:$0xff] %v5040_v54  ;;  %v1452_v24 = vmul.f32 %v7964_v50, %v7952_v58  ;;  %3469 = vmatpush3.bf16.msra.mxu0 %v7504_v47  ;;  %v5092_v50 = vld [vmem:[#allocation2 + $0xc0] sm:$0xff]  ;;  %v5162_v54 = vld [vmem:[%s7298_s1 + $0x38] sm:$0xff] }
 0x1b8   :  { %v5016_v21 = vpop.permute.xlu1 %965  ;;  %1911 = vrot.lane.b32.xlu1 %v1758_v37, %s3830_s24  ;;  %v429_v37 = vadd.f32 %v407_v39, %v341_v14  ;;  %3470 = vmatprep.subr.bf16.mxu0 %v7504_v47 }
 0x1b9   :  { %7958 = vst [vmem:[#allocation147_spill] sm:$0xff] %v5016_v21  ;;  %3485 = vmatpush3.bf16.msra.mxu1 %v7504_v47  ;;  %v1496_v58 = vadd.f32 %v1474_v46, %v1452_v24  ;;  %v7970_v46 = vld [vmem:[#allocation24_spill] sm:$0xff]  ;;  %v7971_v24 = vld [vmem:[#allocation25_spill] sm:$0xff] }
 0x1ba   :  { %727 = vperm.xlu0 %3642, %v5034_v23   ;;  %v517_v14 = vadd.f32 %v495_v36, %v429_v37  ;;  %3486 = vmatprep.subr.bf16.mxu1 %v7504_v47  ;;  %v5061_v39 = vpop.permute.xlu0 %699  ;;  %v3696_v37 = vld [vmem:[%s7298_s1 + $0x20] sm:$0xff]  ;;  %v1693_v34 = vmul.f32 %v5092_v50, %v7971_v24 }
 0x1bb   :  { %7968 = vst [vmem:[#allocation154_spill] sm:$0xff] %v5061_v39  ;;  %3471 = vmatpush3.bf16.msra.mxu0 %v7504_v47  ;;  %v1540_v31 = vadd.f32 %v1518_v44, %v1496_v58  ;;  %v7972_v44 = vld [vmem:[#allocation30_spill] sm:$0xff] }
 0x1bc   :  { %v5037_v41 = vpop.permute.xlu1 %135  ;;  %1022 = vrot.lane.b32.xlu1 %v516_v40, %s3828_s21  ;;  %3472 = vmatprep.subr.bf16.mxu0 %v7504_v47  ;;  %v978_v36 = vmul.f32 %v7972_v44, %v5002_v13  ;;  %7976 = vst [vmem:[#allocation30_spill] sm:$0xff] %v5092_v50  ;;  %v7980_v50 = vld [vmem:[#allocation31_spill] sm:$0xff] }
 0x1bd   :  { %7962 = vst [vmem:[#allocation150_spill] sm:$0xff] %v5037_v41  ;;  %3487 = vmatpush3.bf16.msra.mxu1 %v7504_v47 }
 0x1be   :  { %3650 = vset.pattern.permute.xlu0 %v7936_v5  ;;  %3488 = vmatprep.subr.bf16.mxu1 %v7504_v47  ;;  %v890_v5 = vmul.f32 %v5005_v32, %v7971_v24  ;;  %v7979_v24 = vld [vmem:[#allocation49_spill] sm:$0xff] }
 0x1bf   :  { %537 = vperm.xlu0 %3650, %v4746_v59   ;;  %v824_v59 = vmul.f32 %v7970_v46, %v4977_v7  ;;  %3473 = vmatpush3.bf16.msra.mxu0 %v7504_v47  ;;  %v7977_v7 = vld [vmem:[#allocation104_spill] sm:$0xff] }
 0x1c0   :  { %v5055_v40 = vpop.permute.xlu1 %1311  ;;  %1044 = vrot.lane.b32.xlu1 %v517_v14, %s3828_s21  ;;  %3474 = vmatprep.subr.bf16.mxu0 %v7504_v47 }
 0x1c1   :  { %7967 = vst [vmem:[#allocation153_spill] sm:$0xff] %v5055_v40  ;;  %3489 = vmatpush3.bf16.msra.mxu1 %v7504_v47  ;;  %v912_v58 = vadd.f32 %v890_v5, %v824_v59 }
 0x1c2   :  { %3490 = vmatprep.subr.bf16.mxu1 %v7504_v47 }
 0x1c3   :  { %541 = vperm.xlu0 %3650, %v4793_v52   ;;  %v5081_v52 = vpop.permute.xlu0 %1889  ;;  %3475 = vmatpush3.bf16.msra.mxu0 %v7504_v47  ;;  %v1000_v32 = vadd.f32 %v978_v36, %v912_v58  ;;  %v7983_v58 = vld [vmem:[#allocation34_spill] sm:$0xff] }
 0x1c4   :  { %v5065_v43 = vpop.permute.xlu1 %815  ;;  %1803 = vrot.lane.b32.xlu1 %v1540_v31, %s3828_s21  ;;  %7973 = vst [vmem:[#allocation24_spill] sm:$0xff] %v5081_v52  ;;  %v7975_v31 = vld [vmem:[#allocation101_spill] sm:$0xff]  ;;  %v1737_v52 = vmul.f32 %v7977_v7, %v7972_v44  ;;  %3492 = vmatprep.subr.bf16.mxu0 %v7504_v47  ;;  %v5113_v44 = vsel %vm141_vm1, %v7980_v50, %v7979_v24  ;;  %v7986_v50 = vld [vmem:[#allocation23_spill] sm:$0xff] }
 0x1c5   :  { %7969 = vst [vmem:[#allocation155_spill] sm:$0xff] %v5065_v43  ;;  %v1671_v39 = vmul.f32 %v7975_v31, %v7970_v46  ;;  %3491 = vmatpush3.bf16.msra.mxu1 %v7504_v47  ;;  %v5103_v46 = vld [vmem:[%s7298_s1 + $0x28] sm:$0xff]  ;;  %7981 = vst [vmem:[#allocation49_spill] sm:$0xff] %v5113_v44  ;;  %v7987_v24 = vld [vmem:[#allocation51_spill] sm:$0xff] }
 0x1c6   :  { %3508 = vmatprep.subr.bf16.mxu1 %v7504_v47  ;;  %v7984_v47 = vld [vmem:[#allocation57_spill] sm:$0xff] }
 0x1c7   :  { %553 = vperm.xlu0 %3650, %v3696_v37   ;;  %v1715_v5 = vadd.f32 %v1693_v34, %v1671_v39  ;;  %v5115_v36 = vpop.permute.xlu0 %703  ;;  %v248_v31 = vsel %vm234_vm0, %v7984_v47, %v7983_v58  ;;  %v343_v39 = vmul.f32 %v7986_v50, %v5113_v44  ;;  %v7995_v7 = vld [vmem:[#allocation37_spill] sm:$0xff] }
 0x1c8   :  { %619 = vperm.xlu1 %3643, %v3696_v37   ;;  %7982 = vst [vmem:[#allocation31_spill] sm:$0xff] %v5115_v36  ;;  %v7988_v36 = vld [vmem:[#allocation33_spill] sm:$0xff] }
 0x1c9   :  { %v5086_v14 = vpop.permute.xlu1 %881  ;;  %v1759_v56 = vadd.f32 %v1737_v52, %v1715_v5  ;;  %v5137_v47 = vsel %vm141_vm1, %v7988_v36, %v7987_v24  ;;  %v5141_v52 = vsel %vm70_vm2, %v248_v31, 0.0  ;;  %v7991_v5 = vld [vmem:[#allocation87_spill] sm:$0xff]  ;;  %7993 = vst [vmem:[#allocation33_spill] sm:$0xff] %v5149_v19  ;;  %v1418_v36 = vsel %vm234_vm0, %v7996_v45, %v7995_v7  ;;  %v7997_v31 = vld [vmem:[#allocation106_spill] sm:$0xff] }
 0x1ca   :  { %7974 = vst [vmem:[#allocation25_spill] sm:$0xff] %v5086_v14  ;;  %7989 = vst [vmem:[#allocation57_spill] sm:$0xff] %v5137_v47  ;;  %v1335_v58 = vsel %vm141_vm1, %v4859_v2, %v7991_v5  ;;  %v497_v24 = vmul.f32 %v7997_v31, %v5141_v52  ;;  %v1454_v9 = vmul.f32 %v5137_v47, %v7986_v50  ;;  %v5175_v7 = vsel %vm70_vm2, %v1418_v36, 0.0  ;;  %v5177_v45 = vld [vmem:[#allocation2 + $0xd8] sm:$0xff] }
 0x1cb   :  { %557 = vperm.xlu0 %3650, %v5103_v46   ;;  %7990 = vst [vmem:[#allocation23_spill] sm:$0xff] %v5141_v52  ;;  %v5171_v3 = vsel %vm67_vm3, %v1335_v58, 0.0  ;;  %8000 = vst [vmem:[#allocation37_spill] sm:$0xff] %v5175_v7 }
 0x1cc   :  { %1137 = vrot.lane.b32.xlu1 %v1000_v32, %s3830_s24  ;;  %v5125_v32 = vld [vmem:[%s7298_s1 + $0x30] sm:$0xff]  ;;  %8001 = vst [vmem:[#allocation59_spill] sm:$0xff] %v5177_v45 }
 0x1cd   :  { %v5106_v59 = vpop.permute.xlu1 %228  ;;  %3644 = vset.pattern.permute.xlu1 %v7902_v42 }
 0x1ce   :  { %7978 = vst [vmem:[#allocation156_spill] sm:$0xff] %v5106_v59  ;;  %v5147_v53 = vpop.permute.xlu0 %1781 }
 0x1cf   :  { %561 = vperm.xlu0 %3650, %v5125_v32   ;;  %7992 = vst [vmem:[#allocation51_spill] sm:$0xff] %v5147_v53 }
 0x1d0   :  { %1891 = vrot.lane.b32.xlu1 %v1759_v56, %s3830_s24  ;;  %v7994_v56 = vld [vmem:[#allocation28_spill] sm:$0xff] }
 0x1d1   :  { %v5128_v34 = vpop.permute.xlu1 %1399  ;;  %v409_v26 = vmul.f32 %v5149_v19, %v7994_v56  ;;  %7999 = vst [vmem:[#allocation28_spill] sm:$0xff] %v5171_v3  ;;  %v1476_v8 = vmul.f32 %v5177_v45, %v7994_v56 }
 0x1d2   :  { %7985 = vst [vmem:[#allocation34_spill] sm:$0xff] %v5128_v34 }
 0x1d3   :  { %565 = vperm.xlu0 %3650, %v5162_v54   ;;  %v431_v13 = vadd.f32 %v409_v26, %v343_v39  ;;  %v1520_v26 = vmul.f32 %v5175_v7, %v7997_v31  ;;  %v8002_v39 = vld [vmem:[#allocation91_spill] sm:$0xff]  ;;  %v5191_v36 = vpop.permute.xlu0 %1159  ;;  %v1498_v56 = vadd.f32 %v1476_v8, %v1454_v9  ;;  %v8009_v9 = vld [vmem:[#allocation36_spill] sm:$0xff] }
 0x1d4   :  { %707 = vperm.xlu1 %3644, %v3696_v37   ;;  %v5187_v50 = vsel %vm234_vm0, %v8002_v39, %v4962_v0  ;;  %v8004_v37 = vld [vmem:[#allocation69_spill] sm:$0xff]  ;;  %8005 = vst [vmem:[#allocation91_spill] sm:$0xff] %v5191_v36 }
 0x1d5   :  { %v5165_v53 = vpop.permute.xlu1 %401  ;;  %8003 = vst [vmem:[#allocation106_spill] sm:$0xff] %v5187_v50  ;;  %v519_v58 = vadd.f32 %v497_v24, %v431_v13  ;;  %v1463_v25 = vmul.f32 %v5171_v3, %v8004_v37  ;;  %v1485_v13 = vmul.f32 %v5202_v12, %v4588_v27  ;;  %v1529_v24 = vmul.f32 %v5187_v50, %v4590_v17  ;;  %v8008_v37 = vld [vmem:[#allocation89_spill] sm:$0xff]  ;;  %v8017_v27 = vld [vmem:[#allocation66_spill] sm:$0xff] }
 0x1d6   :  { %7998 = vst [vmem:[#allocation87_spill] sm:$0xff] %v5165_v53  ;;  %v1542_v3 = vadd.f32 %v1520_v26, %v1498_v56  ;;  %v253_v8 = vsel %vm234_vm0, %v4936_v33, %v8008_v37  ;;  %v5220_v12 = vsel %vm141_vm1, %v8010_v1, %v4819_v61 }
 0x1d7   :  { %569 = vperm.xlu0 %3650, %v5196_v6   ;;  %v1507_v36 = vadd.f32 %v1485_v13, %v1463_v25  ;;  %8011 = vst [vmem:[#allocation36_spill] sm:$0xff] %v5220_v12  ;;  %v5225_v25 = vpop.permute.xlu0 %1913  ;;  %v8014_v13 = vld [vmem:[#allocation40_spill] sm:$0xff]  ;;  %v5237_v33 = vsel %vm70_vm2, %v253_v8, 0.0 }
 0x1d8   :  { %1046 = vrot.lane.b32.xlu1 %v519_v58, %s3828_s21  ;;  %v827_v58 = vmul.f32 %v8009_v9, %v5113_v44  ;;  %8013 = vst [vmem:[#allocation159_spill] sm:$0xff] %v5225_v25  ;;  %v893_v50 = vmul.f32 %v5149_v19, %v8014_v13  ;;  %v8016_v44 = vld [vmem:[#allocation41_spill] sm:$0xff]  ;;  %8018 = vst [vmem:[#allocation40_spill] sm:$0xff] %v5237_v33 }
 0x1d9   :  { %3645 = vset.pattern.permute.xlu1 %v7855_v4  ;;  %v1551_v56 = vadd.f32 %v1529_v24, %v1507_v36  ;;  %v156_v37 = vsel %vm141_vm1, %v8017_v27, %v8016_v44  ;;  %v1423_v36 = vsel %vm234_vm0, %v4962_v0, %v8002_v39  ;;  %v5252_v27 = vsel %vm141_vm1, %v7991_v5, %v4859_v2  ;;  %v5261_v0 = vld [vmem:[#allocation2 + $0x78] sm:$0xff]  ;;  %v8037_v25 = vld [vmem:[#allocation97_spill] sm:$0xff] }
 0x1da   :  { %v5200_v31 = vpop.permute.xlu1 %969  ;;  %v915_v24 = vadd.f32 %v893_v50, %v827_v58  ;;  %v5259_v8 = vsel %vm67_vm3, %v156_v37, 0.0  ;;  %8022 = vst [vmem:[#allocation160_spill] sm:$0xff] %v5261_v0  ;;  %v903_v39 = vmul.f32 %v5261_v0, %v4714_v10  ;;  %v991_v50 = vmul.f32 %v4778_v63, %v5237_v33  ;;  %v3709_v0 = vld [vmem:[#allocation2 + $0x80] sm:$0xff] }
 0x1db   :  { %8006 = vst [vmem:[#allocation157_spill] sm:$0xff] %v5200_v31  ;;  %573 = vperm.xlu0 %3650, %v5034_v23   ;;  %v8015_v23 = vld [vmem:[#allocation47_spill] sm:$0xff]  ;;  %8021 = vst [vmem:[#allocation66_spill] sm:$0xff] %v5259_v8  ;;  %v5277_v37 = vsel %vm70_vm2, %v1423_v36, 0.0  ;;  %v5281_v19 = vpop.permute.xlu0 %1024 }
 0x1dc   :  { %1805 = vrot.lane.b32.xlu1 %v1542_v3, %s3828_s21  ;;  %v981_v17 = vmul.f32 %v8015_v23, %v5141_v52  ;;  %v837_v3 = vmul.f32 %v4683_v48, %v5220_v12  ;;  %v1674_v52 = vmul.f32 %v5137_v47, %v8009_v9  ;;  %8019 = vst [vmem:[#allocation47_spill] sm:$0xff] %v5252_v27  ;;  %v8023_v9 = vld [vmem:[#allocation93_spill] sm:$0xff]  ;;  %8024 = vst [vmem:[#allocation161_spill] sm:$0xff] %v5277_v37  ;;  %v8028_v36 = vld [vmem:[#allocation79_spill] sm:$0xff] }
 0x1dd   :  { %v161_v2 = vsel %vm141_vm1, %v5037_v41, %v8023_v9  ;;  %v1740_v5 = vmul.f32 %v5175_v7, %v8015_v23  ;;  %v1684_v47 = vmul.f32 %v5252_v27, %v4683_v48  ;;  %8025 = vst [vmem:[#allocation162_spill] sm:$0xff] %v5281_v19  ;;  %v5286_v9 = vld [vmem:[%s7298_s1 + $0x50] sm:$0xff]  ;;  %v8027_v23 = vld [vmem:[#allocation29_spill] sm:$0xff]  ;;  %v8034_v19 = vld [vmem:[#allocation95_spill] sm:$0xff] }
 0x1de   :  { %v5223_v26 = vpop.permute.xlu1 %137  ;;  %v1003_v58 = vadd.f32 %v981_v17, %v915_v24  ;;  %8026 = vst [vmem:[#allocation163_spill] sm:$0xff] %v5286_v9  ;;  %v344_v7 = vmul.f32 %v8027_v23, %v5259_v8 }
 0x1df   :  { %8012 = vst [vmem:[#allocation85_spill] sm:$0xff] %v5223_v26  ;;  %1793 = vrot.lane.b32.xlu0 %v1551_v56, %s3828_s21  ;;  %v925_v56 = vadd.f32 %v903_v39, %v837_v3  ;;  %v5299_v3 = vsel %vm67_vm3, %v161_v2, 0.0  ;;  %v5304_v39 = vld [vmem:[#allocation2 + $0x128] sm:$0xff]  ;;  %v3708_v2 = vld [vmem:[#allocation2 + $0x30] sm:$0xff] }
 0x1e0   :  { %623 = vperm.xlu1 %3645, %v5103_v46   ;;  %v1696_v46 = vmul.f32 %v5177_v45, %v8014_v13  ;;  %v8029_v45 = vld [vmem:[#allocation44_spill] sm:$0xff]  ;;  %8031 = vst [vmem:[#allocation79_spill] sm:$0xff] %v5299_v3  ;;  %8033 = vst [vmem:[#allocation164_spill] sm:$0xff] %v5304_v39 }
 0x1e1   :  { %v5295_v17 = vsel %vm234_vm0, %v8029_v45, %v8028_v36  ;;  %v1336_v45 = vsel %vm141_vm1, %v5055_v40, %v8034_v19  ;;  %v1013_v36 = vadd.f32 %v991_v50, %v925_v56  ;;  %v8040_v50 = vld [vmem:[#allocation124_spill] sm:$0xff] }
 0x1e2   :  { %v5255_v44 = vpop.permute.xlu1 %1313  ;;  %v1718_v13 = vadd.f32 %v1696_v46, %v1674_v52  ;;  %8030 = vst [vmem:[#allocation29_spill] sm:$0xff] %v5295_v17  ;;  %v1706_v52 = vmul.f32 %v5304_v39, %v4714_v10  ;;  %v1750_v46 = vmul.f32 %v5277_v37, %v4778_v63  ;;  %v5321_v10 = vsel %vm234_vm0, %v8037_v25, %v5106_v59  ;;  %v8039_v37 = vld [vmem:[#allocation81_spill] sm:$0xff]  ;;  %v5340_v25 = vld [vmem:[#allocation2 + $0x38] sm:$0xff] }
 0x1e3   :  { %8020 = vst [vmem:[#allocation41_spill] sm:$0xff] %v5255_v44  ;;  %577 = vperm.xlu0 %3650, %v5286_v9   ;;  %v8035_v9 = vld [vmem:[#allocation45_spill] sm:$0xff]  ;;  %v354_v39 = vmul.f32 %v8039_v37, %v5299_v3  ;;  %v345_v56 = vmul.f32 %v8027_v23, %v8040_v50  ;;  %v5330_v40 = vsel %vm67_vm3, %v1336_v45, 0.0  ;;  %v420_v59 = vmul.f32 %v3709_v0, %v4759_v60 }
 0x1e4   :  { %1161 = vrot.lane.b32.xlu1 %v1003_v58, %s3830_s24  ;;  %v410_v41 = vmul.f32 %v3708_v2, %v8035_v9  ;;  %v8036_v58 = vld [vmem:[#allocation110_spill] sm:$0xff]  ;;  %8038 = vst [vmem:[#allocation45_spill] sm:$0xff] %v5321_v10  ;;  %v1762_v33 = vadd.f32 %v1740_v5, %v1718_v13  ;;  %v1728_v63 = vadd.f32 %v1706_v52, %v1684_v47  ;;  %v8042_v47 = vld [vmem:[#allocation43_spill] sm:$0xff]  ;;  %v5336_v13 = vpop.permute.xlu0 %1783  ;;  %8045 = vst [vmem:[#allocation166_spill] sm:$0xff] %v5340_v25 }
 0x1e5   :  { %v498_v48 = vmul.f32 %v8036_v58, %v5295_v17  ;;  %8041 = vst [vmem:[#allocation110_spill] sm:$0xff] %v5330_v40  ;;  %v508_v5 = vmul.f32 %v8042_v47, %v5321_v10  ;;  %8043 = vst [vmem:[#allocation81_spill] sm:$0xff] %v5336_v13  ;;  %v442_v12 = vadd.f32 %v420_v59, %v354_v39 }
 0x1e6   :  { %v5302_v24 = vpop.permute.xlu1 %819  ;;  %v432_v19 = vadd.f32 %v410_v41, %v344_v7  ;;  %v1772_v52 = vadd.f32 %v1750_v46, %v1728_v63  ;;  %v411_v41 = vmul.f32 %v5340_v25, %v8035_v9  ;;  %v8046_v7 = vld [vmem:[#allocation71_spill] sm:$0xff]  ;;  %v1465_v63 = vmul.f32 %v5330_v40, %v8039_v37 }
 0x1e7   :  { %8032 = vst [vmem:[#allocation44_spill] sm:$0xff] %v5302_v24  ;;  %1171 = vrot.lane.b32.xlu0 %v1013_v36, %s3830_s24  ;;  %v499_v45 = vmul.f32 %v8036_v58, %v8046_v7  ;;  %v1456_v25 = vmul.f32 %v4663_v29, %v8027_v23  ;;  %v3711_v7 = vld [vmem:[#allocation2 + $0x130] sm:$0xff]  ;;  %v1522_v39 = vmul.f32 %v4676_v20, %v8036_v58 }
 0x1e8   :  { %1915 = vrot.lane.b32.xlu1 %v1762_v33, %s3830_s24  ;;  %v8047_v33 = vld [vmem:[#allocation99_spill] sm:$0xff]  ;;  %v520_v27 = vadd.f32 %v498_v48, %v432_v19  ;;  %v433_v46 = vadd.f32 %v411_v41, %v345_v56  ;;  %v1487_v13 = vmul.f32 %v3711_v7, %v4759_v60  ;;  %v5363_v19 = vld [vmem:[#allocation2 + $0xe8] sm:$0xff] }
 0x1e9   :  { %v5350_v50 = vsel %vm234_vm0, %v8047_v33, %v5128_v34  ;;  %v530_v33 = vadd.f32 %v508_v5, %v442_v12  ;;  %8050 = vst [vmem:[#allocation169_spill] sm:$0xff] %v5363_v19  ;;  %v1478_v59 = vmul.f32 %v5363_v19, %v8035_v9  ;;  %v904_v5 = vmul.f32 %v3709_v0, %v4919_v18  ;;  %v8052_v41 = vld [vmem:[#allocation9_spill] sm:$0xff] }
 0x1ea   :  { %8048 = vst [vmem:[#allocation167_spill] sm:$0xff] %v5350_v50  ;;  %v1531_v34 = vmul.f32 %v5350_v50, %v8042_v47  ;;  %v521_v23 = vadd.f32 %v499_v45, %v433_v46  ;;  %v1509_v56 = vadd.f32 %v1487_v13, %v1465_v63  ;;  %v992_v9 = vmul.f32 %v5016_v21, %v5321_v10  ;;  %v8054_v0 = vld [vmem:[#allocation53_spill] sm:$0xff]  ;;  %v8192_v47 = vld [vmem:[#allocation30_spill] sm:$0xff] }
 0x1eb   :  { %v5338_v36 = vpop.permute.xlu1 %885  ;;  %1925 = vrot.lane.b32.xlu0 %v1772_v52, %s3830_s24  ;;  %v5371_v52 = vpop.permute.xlu0 %1139  ;;  %v1500_v12 = vadd.f32 %v1478_v59, %v1456_v25  ;;  %v162_v58 = vsel %vm141_vm1, %v5223_v26, %v8052_v41  ;;  %v1685_v25 = vmul.f32 %v5330_v40, %v4888_v16  ;;  %v8060_v40 = vld [vmem:[#allocation63_spill] sm:$0xff] }
 0x1ec   :  { %8044 = vst [vmem:[#allocation165_spill] sm:$0xff] %v5338_v36  ;;  %1026 = vrot.lane.b32.xlu1 %v520_v27, %s3828_s21  ;;  %v838_v27 = vmul.f32 %v4888_v16, %v5299_v3  ;;  %8051 = vst [vmem:[#allocation170_spill] sm:$0xff] %v5371_v52  ;;  %v1553_v45 = vadd.f32 %v1531_v34, %v1509_v56  ;;  %v5391_v59 = vsel %vm67_vm3, %v162_v58, 0.0  ;;  %v8063_v3 = vld [vmem:[#allocation92_spill] sm:$0xff] }
 0x1ed   :  { %v1544_v13 = vadd.f32 %v1522_v39, %v1500_v12  ;;  %8055 = vst [vmem:[#allocation53_spill] sm:$0xff] %v5391_v59  ;;  %v1707_v34 = vmul.f32 %v3711_v7, %v4919_v18  ;;  %v1751_v39 = vmul.f32 %v5350_v50, %v5016_v21  ;;  %v8061_v7 = vld [vmem:[#allocation11_spill] sm:$0xff]  ;;  %v356_v20 = vmul.f32 %v8063_v3, %v5391_v59 }
 0x1ee   :  { %v926_v63 = vadd.f32 %v904_v5, %v838_v27 }
 0x1ef   :  { %v5361_v48 = vpop.permute.xlu1 %230  ;;  %1036 = vrot.lane.b32.xlu0 %v530_v33, %s3828_s21  ;;  %v828_v33 = vmul.f32 %v8054_v0, %v5259_v8  ;;  %v5401_v56 = vpop.permute.xlu0 %1893  ;;  %v1729_v10 = vadd.f32 %v1707_v34, %v1685_v25  ;;  %v8066_v25 = vld [vmem:[#allocation122_spill] sm:$0xff] }
 0x1f0   :  { %8049 = vst [vmem:[#allocation168_spill] sm:$0xff] %v5361_v48  ;;  %1048 = vrot.lane.b32.xlu1 %v521_v23, %s3828_s21  ;;  %v8056_v23 = vld [vmem:[#allocation126_spill] sm:$0xff]  ;;  %8057 = vst [vmem:[#allocation172_spill] sm:$0xff] %v5401_v56  ;;  %v1014_v12 = vadd.f32 %v992_v9, %v926_v63  ;;  %v5412_v50 = vsel %vm234_vm0, %v8061_v7, %v5361_v48  ;;  %v8064_v63 = vld [vmem:[#allocation121_spill] sm:$0xff] }
 0x1f1   :  { %v1337_v27 = vsel %vm141_vm1, %v5255_v44, %v8056_v23  ;;  %v1675_v29 = vmul.f32 %v8064_v63, %v8054_v0  ;;  %v510_v34 = vmul.f32 %v8066_v25, %v5412_v50  ;;  %v1773_v23 = vadd.f32 %v1751_v39, %v1729_v10  ;;  %v8071_v63 = vld [vmem:[#allocation12_spill] sm:$0xff]  ;;  %v8074_v48 = vld [vmem:[#allocation50_spill] sm:$0xff] }
 0x1f2   :  { %v8186_v7 = vld [vmem:[#allocation82_spill] sm:$0xff] }
 0x1f3   :  { %v5382_v46 = vpop.permute.xlu1 %1401  ;;  %1795 = vrot.lane.b32.xlu0 %v1553_v45, %s3828_s21  ;;  %v8059_v45 = vld [vmem:[#allocation55_spill] sm:$0xff] }
 0x1f4   :  { %8053 = vst [vmem:[#allocation171_spill] sm:$0xff] %v5382_v46  ;;  %1807 = vrot.lane.b32.xlu1 %v1544_v13, %s3828_s21  ;;  %v894_v58 = vmul.f32 %v3708_v2, %v8059_v45  ;;  %v982_v13 = vmul.f32 %v8060_v40, %v5295_v17  ;;  %8062 = vst [vmem:[#allocation55_spill] sm:$0xff] %v5412_v50  ;;  %v5421_v2 = vsel %vm67_vm3, %v1337_v27, 0.0  ;;  %v3713_v17 = vld [vmem:[#allocation2 + $0x90] sm:$0xff] }
 0x1f5   :  { %8065 = vst [vmem:[#allocation63_spill] sm:$0xff] %v5421_v2  ;;  %v422_v8 = vmul.f32 %v3713_v17, %v4989_v38  ;;  %v8070_v27 = vld [vmem:[#allocation46_spill] sm:$0xff]  ;;  %v5441_v44 = vsel %vm234_vm0, %v8071_v63, %v5382_v46  ;;  %v1467_v10 = vmul.f32 %v5421_v2, %v8063_v3  ;;  %v8082_v46 = vld [vmem:[#allocation52_spill] sm:$0xff] }
 0x1f6   :  { %v916_v9 = vadd.f32 %v894_v58, %v828_v33  ;;  %v5431_v33 = vld [vmem:[#allocation2 + $0xe0] sm:$0xff]  ;;  %v1741_v58 = vmul.f32 %v8070_v27, %v8060_v40  ;;  %8072 = vst [vmem:[#allocation177_spill] sm:$0xff] %v5441_v44  ;;  %v8076_v40 = vld [vmem:[#allocation54_spill] sm:$0xff] }
 0x1f7   :  { %v5403_v5 = vpop.permute.xlu1 %117  ;;  %1151 = vrot.lane.b32.xlu0 %v1014_v12, %s3830_s24  ;;  %8069 = vst [vmem:[#allocation176_spill] sm:$0xff] %v5431_v33  ;;  %v1697_v0 = vmul.f32 %v5431_v33, %v8059_v45  ;;  %v444_v26 = vadd.f32 %v422_v8, %v356_v20  ;;  %v8077_v27 = vld [vmem:[#allocation94_spill] sm:$0xff]  ;;  %v3715_v20 = vld [vmem:[#allocation2 + $0x140] sm:$0xff] }
 0x1f8   :  { %8058 = vst [vmem:[#allocation173_spill] sm:$0xff] %v5403_v5  ;;  %627 = vperm.xlu1 %3645, %v5125_v32   ;;  %v5427_v19 = vpop.permute.xlu0 %711  ;;  %v1004_v41 = vadd.f32 %v982_v13, %v916_v9  ;;  %v250_v13 = vsel %vm234_vm0, %v8077_v27, %v8076_v40  ;;  %v1489_v8 = vmul.f32 %v3715_v20, %v4989_v38  ;;  %v8080_v27 = vld [vmem:[#allocation39_spill] sm:$0xff]  ;;  %v8081_v38 = vld [vmem:[#allocation90_spill] sm:$0xff]  ;;  %v8185_v3 = vld [vmem:[#allocation136_spill] sm:$0xff] }
 0x1f9   :  { %8067 = vst [vmem:[#allocation174_spill] sm:$0xff] %v5427_v19  ;;  %v1719_v39 = vadd.f32 %v1697_v0, %v1675_v29  ;;  %v8073_v19 = vld [vmem:[#allocation88_spill] sm:$0xff]  ;;  %v532_v9 = vadd.f32 %v510_v34, %v444_v26  ;;  %v5478_v26 = vsel %vm70_vm2, %v250_v13, 0.0 }
 0x1fa   :  { %v5450_v45 = vsel %vm141_vm1, %v8074_v48, %v8073_v19  ;;  %v840_v19 = vmul.f32 %v5065_v43, %v5391_v59  ;;  %8084 = vst [vmem:[#allocation39_spill] sm:$0xff] %v5478_v26  ;;  %v8085_v34 = vld [vmem:[#allocation56_spill] sm:$0xff]  ;;  %v3716_v59 = vld [vmem:[#allocation2 + $0x48] sm:$0xff] }
 0x1fb   :  { %v5429_v12 = vpop.permute.xlu1 %139  ;;  %1905 = vrot.lane.b32.xlu0 %v1773_v23, %s3830_s24  ;;  %8075 = vst [vmem:[#allocation88_spill] sm:$0xff] %v5450_v45  ;;  %v1533_v23 = vmul.f32 %v5441_v44, %v8066_v25  ;;  %v1763_v48 = vadd.f32 %v1741_v58, %v1719_v39  ;;  %v347_v40 = vmul.f32 %v8080_v27, %v5450_v45  ;;  %v8086_v58 = vld [vmem:[#allocation96_spill] sm:$0xff]  ;;  %v8089_v25 = vld [vmem:[#allocation61_spill] sm:$0xff] }
 0x1fc   :  { %8068 = vst [vmem:[#allocation175_spill] sm:$0xff] %v5429_v12  ;;  %1141 = vrot.lane.b32.xlu1 %v1004_v41, %s3830_s24  ;;  %v5460_v29 = vpop.permute.xlu0 %1785  ;;  %v1511_v41 = vadd.f32 %v1489_v8, %v1467_v10  ;;  %v1420_v10 = vsel %vm234_vm0, %v8086_v58, %v8085_v34  ;;  %v906_v39 = vmul.f32 %v3713_v17, %v5086_v14 }
 0x1fd   :  { %8078 = vst [vmem:[#allocation50_spill] sm:$0xff] %v5460_v29  ;;  %3646 = vset.pattern.permute.xlu1 %v7902_v42  ;;  %v5474_v29 = vsel %vm141_vm1, %v8082_v46, %v8081_v38  ;;  %v994_v8 = vmul.f32 %v5200_v31, %v5412_v50  ;;  %v163_v38 = vsel %vm141_vm1, %v5429_v12, %v5403_v5  ;;  %v8175_v12 = vld [vmem:[#allocation13_spill] sm:$0xff] }
 0x1fe   :  { %8083 = vst [vmem:[#allocation94_spill] sm:$0xff] %v5474_v29  ;;  %v1555_v13 = vadd.f32 %v1533_v23, %v1511_v41  ;;  %v413_v34 = vmul.f32 %v3716_v59, %v8089_v25  ;;  %v928_v17 = vadd.f32 %v906_v39, %v840_v19  ;;  %v1687_v50 = vmul.f32 %v5421_v2, %v5065_v43  ;;  %v3717_v2 = vld [vmem:[#allocation2 + $0xf8] sm:$0xff] }
 0x1ff   :  { %v5462_v0 = vpop.permute.xlu1 %1315  ;;  %1038 = vrot.lane.b32.xlu0 %v532_v9, %s3828_s21  ;;  %v1458_v5 = vmul.f32 %v5474_v29, %v8080_v27  ;;  %v5506_v23 = vsel %vm70_vm2, %v1420_v10, 0.0  ;;  %v5510_v41 = vsel %vm67_vm3, %v163_v38, 0.0  ;;  %v1709_v19 = vmul.f32 %v3715_v20, %v5086_v14  ;;  %v8183_v14 = vld [vmem:[#allocation76_spill] sm:$0xff] }
 0x200   :  { %8079 = vst [vmem:[#allocation54_spill] sm:$0xff] %v5462_v0  ;;  %1895 = vrot.lane.b32.xlu1 %v1763_v48, %s3830_s24  ;;  %v5492_v46 = vpop.permute.xlu0 %1163  ;;  %v8090_v48 = vld [vmem:[#allocation113_spill] sm:$0xff]  ;;  %v435_v63 = vadd.f32 %v413_v34, %v347_v40  ;;  %8091 = vst [vmem:[#allocation56_spill] sm:$0xff] %v5506_v23  ;;  %v1753_v39 = vmul.f32 %v5441_v44, %v5200_v31  ;;  %v1016_v10 = vadd.f32 %v994_v8, %v928_v17 }
 0x201   :  { %8087 = vst [vmem:[#allocation90_spill] sm:$0xff] %v5492_v46  ;;  %v501_v58 = vmul.f32 %v8090_v48, %v5478_v26  ;;  %8092 = vst [vmem:[#allocation96_spill] sm:$0xff] %v5510_v41  ;;  %v1480_v38 = vmul.f32 %v3717_v2, %v8089_v25  ;;  %v1731_v46 = vadd.f32 %v1709_v19, %v1687_v50 }
 0x203   :  { %v5494_v9 = vpop.permute.xlu1 %232  ;;  %1797 = vrot.lane.b32.xlu0 %v1555_v13, %s3828_s21  ;;  %v8093_v13 = vld [vmem:[#allocation67_spill] sm:$0xff]  ;;  %v523_v44 = vadd.f32 %v501_v58, %v435_v63  ;;  %v1502_v8 = vadd.f32 %v1480_v38, %v1458_v5  ;;  %v1775_v50 = vadd.f32 %v1753_v39, %v1731_v46  ;;  %v3719_v39 = vld [vmem:[#allocation2 + $0x150] sm:$0xff] }
 0x204   :  { %8088 = vst [vmem:[#allocation52_spill] sm:$0xff] %v5494_v9  ;;  %715 = vperm.xlu1 %3646, %v5125_v32   ;;  %v1338_v27 = vsel %vm141_vm1, %v5462_v0, %v8093_v13  ;;  %v5520_v40 = vpop.permute.xlu0 %1917  ;;  %v1524_v32 = vmul.f32 %v5506_v23, %v8090_v48  ;;  %v5531_v20 = vsel %vm234_vm0, %v4867_v15, %v5494_v9  ;;  %v8097_v13 = vld [vmem:[#allocation100_spill] sm:$0xff] }
 0x205   :  { %8094 = vst [vmem:[#allocation61_spill] sm:$0xff] %v5520_v40  ;;  %8096 = vst [vmem:[#allocation178_spill] sm:$0xff] %v5531_v20  ;;  %v358_v0 = vmul.f32 %v8097_v13, %v5510_v41  ;;  %v5538_v25 = vsel %vm67_vm3, %v1338_v27, 0.0  ;;  %v3718_v48 = vld [vmem:[#allocation2 + $0xa0] sm:$0xff]  ;;  %v8099_v40 = vld [vmem:[#allocation15_spill] sm:$0xff]  ;;  %v1491_v38 = vmul.f32 %v3719_v39, %v5165_v53 }
 0x206   :  { %8098 = vst [vmem:[#allocation179_spill] sm:$0xff] %v5538_v25  ;;  %v424_v17 = vmul.f32 %v3718_v48, %v5165_v53  ;;  %v512_v9 = vmul.f32 %v8099_v40, %v5531_v20  ;;  %v1469_v27 = vmul.f32 %v5538_v25, %v8097_v13  ;;  %v8107_v13 = vld [vmem:[#allocation102_spill] sm:$0xff] }
 0x207   :  { %v5522_v34 = vpop.permute.xlu1 %1403  ;;  %1153 = vrot.lane.b32.xlu0 %v1016_v10, %s3830_s24  ;;  %v8102_v10 = vld [vmem:[#allocation73_spill] sm:$0xff] }
 0x208   :  { %8095 = vst [vmem:[#allocation113_spill] sm:$0xff] %v5522_v34  ;;  %1050 = vrot.lane.b32.xlu1 %v523_v44, %s3828_s21  ;;  %v5544_v63 = vpop.permute.xlu0 %1028  ;;  %v5551_v5 = vsel %vm234_vm0, %v4905_v49, %v5522_v34  ;;  %v1546_v44 = vadd.f32 %v1524_v32, %v1502_v8  ;;  %v446_v19 = vadd.f32 %v424_v17, %v358_v0  ;;  %v8104_v0 = vld [vmem:[#allocation78_spill] sm:$0xff] }
 0x209   :  { %8100 = vst [vmem:[#allocation180_spill] sm:$0xff] %v5544_v63  ;;  %3647 = vset.pattern.permute.xlu1 %v7855_v4  ;;  %8101 = vst [vmem:[#allocation181_spill] sm:$0xff] %v5551_v5  ;;  %v831_v46 = vmul.f32 %v8102_v10, %v5450_v45  ;;  %v1535_v63 = vmul.f32 %v5551_v5, %v8099_v40  ;;  %v897_v8 = vmul.f32 %v3716_v59, %v8104_v0  ;;  %v8105_v17 = vld [vmem:[#allocation86_spill] sm:$0xff] }
 0x20a   :  { %v534_v32 = vadd.f32 %v512_v9, %v446_v19  ;;  %v985_v49 = vmul.f32 %v8105_v17, %v5478_v26  ;;  %v1513_v53 = vadd.f32 %v1491_v38, %v1469_v27  ;;  %v1678_v59 = vmul.f32 %v5474_v29, %v8102_v10  ;;  %v8109_v19 = vld [vmem:[#allocation62_spill] sm:$0xff] }
 0x20b   :  { %v5553_v58 = vpop.permute.xlu1 %603  ;;  %1907 = vrot.lane.b32.xlu0 %v1775_v50, %s3830_s24  ;;  %v8106_v50 = vld [vmem:[#allocation60_spill] sm:$0xff] }
 0x20c   :  { %1809 = vrot.lane.b32.xlu1 %v1546_v44, %s3828_s21  ;;  %v5564_v34 = vpop.permute.xlu0 %1787  ;;  %v158_v45 = vsel %vm141_vm1, %v8107_v13, %v8106_v50  ;;  %v842_v44 = vmul.f32 %v5302_v24, %v5510_v41  ;;  %v908_v13 = vmul.f32 %v3718_v48, %v5338_v36  ;;  %v996_v50 = vmul.f32 %v8109_v19, %v5531_v20 }
 0x20d   :  { %8103 = vst [vmem:[#allocation73_spill] sm:$0xff] %v5564_v34  ;;  %v919_v34 = vadd.f32 %v897_v8, %v831_v46  ;;  %v5583_v9 = vsel %vm67_vm3, %v158_v45, 0.0  ;;  %v1557_v38 = vadd.f32 %v1535_v63, %v1513_v53  ;;  %v1744_v46 = vmul.f32 %v5506_v23, %v8105_v17  ;;  %v8111_v8 = vld [vmem:[#allocation116_spill] sm:$0xff]  ;;  %v8120_v23 = vld [vmem:[#allocation26_spill] sm:$0xff] }
 0x20e   :  { %8108 = vst [vmem:[#allocation78_spill] sm:$0xff] %v5583_v9  ;;  %v930_v41 = vadd.f32 %v908_v13, %v842_v44  ;;  %v1689_v48 = vmul.f32 %v5538_v25, %v5302_v24  ;;  %v8114_v53 = vld [vmem:[#allocation48_spill] sm:$0xff]  ;;  %v3720_v44 = vld [vmem:[#allocation2 + $0x50] sm:$0xff]  ;;  %v8116_v13 = vld [vmem:[#allocation83_spill] sm:$0xff] }
 0x20f   :  { %1040 = vrot.lane.b32.xlu0 %v534_v32, %s3828_s21  ;;  %v1700_v32 = vmul.f32 %v3717_v2, %v8104_v0  ;;  %v1007_v10 = vadd.f32 %v985_v49, %v919_v34  ;;  %v348_v2 = vmul.f32 %v8114_v53, %v5583_v9  ;;  %v1711_v49 = vmul.f32 %v3719_v39, %v5338_v36  ;;  %v8174_v24 = vld [vmem:[#allocation75_spill] sm:$0xff] }
 0x210   :  { %v5576_v40 = vpop.permute.xlu1 %691  ;;  %631 = vperm.xlu1 %3647, %v5162_v54   ;;  %v5588_v27 = vpop.permute.xlu0 %1143  ;;  %v8112_v54 = vld [vmem:[#allocation64_spill] sm:$0xff]  ;;  %v1755_v34 = vmul.f32 %v5551_v5, %v8109_v19  ;;  %v1018_v17 = vadd.f32 %v996_v50, %v930_v41  ;;  %v3721_v50 = vld [vmem:[#allocation2 + $0x58] sm:$0xff] }
 0x211   :  { %8110 = vst [vmem:[#allocation86_spill] sm:$0xff] %v5588_v27  ;;  %v5597_v45 = vsel %vm234_vm0, %v8112_v54, %v8111_v8  ;;  %v1722_v20 = vadd.f32 %v1700_v32, %v1678_v59  ;;  %v414_v8 = vmul.f32 %v3720_v44, %v8116_v13  ;;  %v8117_v59 = vld [vmem:[#allocation117_spill] sm:$0xff]  ;;  %v1733_v54 = vadd.f32 %v1711_v49, %v1689_v48 }
 0x212   :  { %8113 = vst [vmem:[#allocation60_spill] sm:$0xff] %v5597_v45  ;;  %v415_v27 = vmul.f32 %v3721_v50, %v8116_v13  ;;  %v734_v31 = vmul.f32 %v5576_v40, %v8175_v12  ;;  %v1626_v43 = vmul.f32 %v8183_v14, %v5576_v40 }
 0x213   :  { %1799 = vrot.lane.b32.xlu0 %v1557_v38, %s3828_s21  ;;  %v502_v38 = vmul.f32 %v8117_v59, %v5597_v45  ;;  %v1766_v32 = vadd.f32 %v1744_v46, %v1722_v20  ;;  %v436_v39 = vadd.f32 %v414_v8, %v348_v2  ;;  %v503_v20 = vmul.f32 %v8117_v59, %v8120_v23  ;;  %v8146_v23 = vld [vmem:[#allocation108_spill] sm:$0xff] }
 0x214   :  { %1165 = vrot.lane.b32.xlu1 %v1007_v10, %s3830_s24  ;;  %v5610_v0 = vpop.permute.xlu0 %1897  ;;  %v8118_v10 = vld [vmem:[#allocation22_spill] sm:$0xff]  ;;  %v1460_v2 = vmul.f32 %v4849_v55, %v8114_v53  ;;  %v1526_v8 = vmul.f32 %v4865_v62, %v8117_v59  ;;  %v898_v59 = vmul.f32 %v3720_v44, %v4419_v35  ;;  %v8128_v44 = vld [vmem:[#allocation20_spill] sm:$0xff]  ;;  %v160_v62 = vsel %vm141_vm1, %v4819_v61, %v8010_v1 }
 0x215   :  { %v5605_v63 = vpop.permute.xlu1 %607  ;;  %8115 = vst [vmem:[#allocation102_spill] sm:$0xff] %v5610_v0  ;;  %v349_v25 = vmul.f32 %v8114_v53, %v8118_v10  ;;  %v1777_v0 = vadd.f32 %v1755_v34, %v1733_v54  ;;  %v524_v46 = vadd.f32 %v502_v38, %v436_v39  ;;  %v5632_v34 = vld [vmem:[#allocation2 + $0x108] sm:$0xff]  ;;  %v832_v54 = vmul.f32 %v4412_v22, %v5583_v9  ;;  %v8158_v10 = vld [vmem:[#allocation120_spill] sm:$0xff] }
 0x216   :  { %8122 = vst [vmem:[#allocation48_spill] sm:$0xff] %v5632_v34  ;;  %v986_v39 = vmul.f32 %v4445_v51, %v5597_v45  ;;  %v5728_v1 = vsel %vm67_vm3, %v160_v62, 0.0  ;;  %v8150_v62 = vld [vmem:[#allocation69_spill] sm:$0xff]  ;;  %v8159_v9 = vld [vmem:[#allocation40_spill] sm:$0xff] }
 0x217   :  { %1155 = vrot.lane.b32.xlu0 %v1018_v17, %s3830_s24  ;;  %v437_v48 = vadd.f32 %v415_v27, %v349_v25  ;;  %v1482_v17 = vmul.f32 %v5632_v34, %v8116_v13  ;;  %v8151_v34 = vld [vmem:[#allocation142_spill] sm:$0xff]  ;;  %v507_v29 = vmul.f32 %v8158_v10, %v8159_v9  ;;  %v8172_v9 = vld [vmem:[#allocation145_spill] sm:$0xff] }
 0x218   :  { %1919 = vrot.lane.b32.xlu1 %v1766_v32, %s3830_s24 }
 0x219   :  { %v5619_v5 = vpop.permute.xlu0 %719  ;;  %v525_v38 = vadd.f32 %v503_v20, %v437_v48  ;;  %v920_v20 = vadd.f32 %v898_v59, %v832_v54  ;;  %v8130_v54 = vld [vmem:[#allocation123_spill] sm:$0xff]  ;;  %v8131_v59 = vld [vmem:[#allocation74_spill] sm:$0xff] }
 0x21a   :  { %8119 = vst [vmem:[#allocation116_spill] sm:$0xff] %v5619_v5  ;;  %v5621_v41 = vpop.permute.xlu1 %545 }
 0x21b   :  { %1909 = vrot.lane.b32.xlu0 %v1777_v0, %s3830_s24  ;;  %v1504_v0 = vadd.f32 %v1482_v17, %v1460_v2  ;;  %v5660_v17 = vld [vmem:[#allocation2 + $0x100] sm:$0xff] }
 0x21c   :  { %1030 = vrot.lane.b32.xlu1 %v524_v46, %s3828_s21  ;;  %v8125_v46 = vld [vmem:[#allocation134_spill] sm:$0xff]  ;;  %8127 = vst [vmem:[#allocation183_spill] sm:$0xff] %v5660_v17 }
 0x21d   :  { %v5630_v49 = vpop.permute.xlu0 %1789  ;;  %v1548_v53 = vadd.f32 %v1526_v8, %v1504_v0  ;;  %v1679_v48 = vmul.f32 %v8125_v46, %v4412_v22  ;;  %v1701_v8 = vmul.f32 %v5660_v17, %v4419_v35  ;;  %v252_v22 = vsel %vm234_vm0, %v4732_v30, %v4349_v11 }
 0x21e   :  { %8121 = vst [vmem:[#allocation64_spill] sm:$0xff] %v5630_v49  ;;  %v5692_v30 = vsel %vm70_vm2, %v252_v22, 0.0  ;;  %v8143_v22 = vld [vmem:[#allocation8_spill] sm:$0xff] }
 0x21f   :  { %v5638_v32 = vpop.permute.xlu1 %611  ;;  %v1723_v5 = vadd.f32 %v1701_v8, %v1679_v48  ;;  %v8135_v48 = vld [vmem:[#allocation77_spill] sm:$0xff]  ;;  %v8138_v8 = vld [vmem:[#allocation58_spill] sm:$0xff] }
 0x220   :  { %1052 = vrot.lane.b32.xlu1 %v525_v38, %s3828_s21  ;;  %v1745_v38 = vmul.f32 %v8128_v44, %v4445_v51  ;;  %8137 = vst [vmem:[#allocation77_spill] sm:$0xff] %v5692_v30 }
 0x221   :  { %v5641_v25 = vpop.permute.xlu0 %1167 }
 0x222   :  { %8123 = vst [vmem:[#allocation83_spill] sm:$0xff] %v5641_v25  ;;  %v505_v25 = vmul.f32 %v8143_v22, %v5692_v30 }
 0x223   :  { %v5643_v27 = vpop.permute.xlu1 %1020 }
 0x224   :  { %1811 = vrot.lane.b32.xlu1 %v1548_v53, %s3828_s21  ;;  %v1008_v53 = vadd.f32 %v986_v39, %v920_v20  ;;  %v1767_v39 = vadd.f32 %v1745_v38, %v1723_v5  ;;  %v8134_v20 = vld [vmem:[#allocation10_spill] sm:$0xff]  ;;  %v3724_v38 = vld [vmem:[#allocation2 + $0x68] sm:$0xff] }
 0x225   :  { %v5648_v13 = vpop.permute.xlu0 %1921  ;;  %v5688_v11 = vsel %vm141_vm1, %v8135_v48, %v8134_v20 }
 0x226   :  { %8124 = vst [vmem:[#allocation117_spill] sm:$0xff] %v5648_v13  ;;  %8136 = vst [vmem:[#allocation10_spill] sm:$0xff] %v5688_v11  ;;  %v8142_v13 = vld [vmem:[#allocation98_spill] sm:$0xff]  ;;  %v1462_v48 = vmul.f32 %v5688_v11, %v8138_v8  ;;  %v1682_v61 = vmul.f32 %v5688_v11, %v8146_v23  ;;  %v8149_v11 = vld [vmem:[#allocation36_spill] sm:$0xff] }
 0x227   :  { %v5653_v50 = vpop.permute.xlu1 %1779  ;;  %v417_v20 = vmul.f32 %v3724_v38, %v8142_v13  ;;  %v353_v46 = vmul.f32 %v8150_v62, %v8149_v11 }
 0x228   :  { %635 = vperm.xlu1 %3647, %v5196_v6  }
 0x229   :  { %v5658_v2 = vpop.permute.xlu0 %1032 }
 0x22a   :  { %8126 = vst [vmem:[#allocation182_spill] sm:$0xff] %v5658_v2  ;;  %v5677_v2 = vsel %vm141_vm1, %v8131_v59, %v8130_v54  ;;  %v8139_v54 = vld [vmem:[#allocation80_spill] sm:$0xff]  ;;  %v8140_v59 = vld [vmem:[#allocation133_spill] sm:$0xff] }
 0x22b   :  { %v5666_v0 = vpop.permute.xlu1 %549  ;;  %8132 = vst [vmem:[#allocation123_spill] sm:$0xff] %v5677_v2  ;;  %v835_v45 = vmul.f32 %v8146_v23, %v5677_v2 }
 0x22c   :  { %8129 = vst [vmem:[#allocation184_spill] sm:$0xff] %v5666_v0  ;;  %1145 = vrot.lane.b32.xlu1 %v1008_v53, %s3830_s24  ;;  %v351_v53 = vmul.f32 %v8138_v8, %v5677_v2  ;;  %v8145_v8 = vld [vmem:[#allocation112_spill] sm:$0xff] }
 0x22d   :  { %v5679_v35 = vpop.permute.xlu0 %1791  ;;  %3648 = vset.pattern.permute.xlu1 %v7902_v42  ;;  %v901_v49 = vmul.f32 %v3724_v38, %v8145_v8  ;;  %v8148_v2 = vld [vmem:[#allocation68_spill] sm:$0xff] }
 0x22e   :  { %8133 = vst [vmem:[#allocation74_spill] sm:$0xff] %v5679_v35  ;;  %v1422_v35 = vsel %vm234_vm0, %v8140_v59, %v8139_v54  ;;  %v3725_v54 = vld [vmem:[#allocation2 + $0x118] sm:$0xff]  ;;  %v989_v55 = vmul.f32 %v8148_v2, %v5692_v30 }
 0x22f   :  { %v5682_v51 = vpop.permute.xlu1 %1135  ;;  %v1484_v59 = vmul.f32 %v3725_v54, %v8142_v13  ;;  %v1704_v13 = vmul.f32 %v3725_v54, %v8145_v8  ;;  %v47_v54 = vand.u32 15, %v4270_v28  ;;  %v8154_v8 = vld [vmem:[#allocation119_spill] sm:$0xff] }
 0x230   :  { %1899 = vrot.lane.b32.xlu1 %v1767_v39, %s3830_s24  ;;  %v5716_v39 = vsel %vm70_vm2, %v1422_v35, 0.0 }
 0x231   :  { %v5701_v5 = vpop.permute.xlu0 %1147  ;;  %8144 = vst [vmem:[#allocation80_spill] sm:$0xff] %v5716_v39  ;;  %v1748_v23 = vmul.f32 %v5716_v39, %v8148_v2  ;;  %v5756_v2 = vld [vmem:[#allocation2 + $0x70] sm:$0xff]  ;;  %v1726_v30 = vadd.f32 %v1704_v13, %v1682_v61  ;;  %vm5778_vm6 = vcmp.ge.s32.totalorder %v47_v54, 1  ;;  %vm5827_vm9 = vcmp.le.s32.totalorder %v47_v54, 14 }
 0x232   :  { %8141 = vst [vmem:[#allocation58_spill] sm:$0xff] %v5701_v5  ;;  %v439_v5 = vadd.f32 %v417_v20, %v351_v53  ;;  %v1506_v53 = vadd.f32 %v1484_v59, %v1462_v48  ;;  %v54_v59 = vand.u32 15, %v4273_v57  ;;  %v418_v11 = vmul.f32 %v5756_v2, %v8154_v8  ;;  %v8184_v54 = vld [vmem:[#allocation42_spill] sm:$0xff] }
 0x233   :  { %v5712_v44 = vpop.permute.xlu1 %1157  ;;  %v5774_v61 = vadd.f32 %v1748_v23, %v1726_v30  ;;  %v648_v0 = vmul.f32 %v8184_v54, %v5605_v63 }
 0x234   :  { %723 = vperm.xlu1 %3648, %v5196_v6   ;;  %v1528_v6 = vmul.f32 %v5716_v39, %v8143_v22  ;;  %v527_v38 = vadd.f32 %v505_v25, %v439_v5  ;;  %v352_v22 = vmul.f32 %v8150_v62, %v5728_v1  ;;  %v8153_v25 = vld [vmem:[#allocation47_spill] sm:$0xff]  ;;  %v923_v39 = vadd.f32 %v901_v49, %v835_v45 }
 0x235   :  { %v5730_v35 = vpop.permute.xlu0 %1901  ;;  %v1464_v5 = vmul.f32 %v8153_v25, %v8150_v62  ;;  %v8157_v62 = vld [vmem:[#allocation164_spill] sm:$0xff]  ;;  %vm5782_vm7 = vcmp.ge.s32.totalorder %v54_v59, 1  ;;  %vm5804_vm8 = vcmp.le.s32.totalorder %v54_v59, 14  ;;  %v3728_v59 = vld [vmem:[#allocation2 + $0xb0] sm:$0xff] }
 0x236   :  { %8147 = vst [vmem:[#allocation133_spill] sm:$0xff] %v5730_v35  ;;  %v8152_v35 = vld [vmem:[#allocation89_spill] sm:$0xff]  ;;  %v1486_v25 = vmul.f32 %v8157_v62, %v8154_v8  ;;  %v1550_v19 = vadd.f32 %v1528_v6, %v1506_v53  ;;  %v1011_v49 = vadd.f32 %v989_v55, %v923_v39  ;;  %v440_v13 = vadd.f32 %v418_v11, %v352_v22  ;;  %v8164_v53 = vld [vmem:[#allocation19_spill] sm:$0xff]  ;;  %v8167_v11 = vld [vmem:[#allocation104_spill] sm:$0xff] }
 0x237   :  { %v5735_v20 = vpop.permute.xlu1 %1911  ;;  %v5747_v48 = vsel %vm234_vm0, %v8152_v35, %v8151_v34  ;;  %v8155_v34 = vld [vmem:[#allocation160_spill] sm:$0xff]  ;;  %v8165_v6 = vld [vmem:[#allocation151_spill] sm:$0xff]  ;;  %v8166_v55 = vld [vmem:[#allocation105_spill] sm:$0xff]  ;;  %v1581_v15 = vmul.f32 %v3728_v59, %v5553_v58 }
 0x238   :  { %1054 = vrot.lane.b32.xlu1 %v527_v38, %s3828_s21  ;;  %v419_v35 = vmul.f32 %v8155_v34, %v8154_v8  ;;  %v506_v38 = vmul.f32 %v8158_v10, %v5747_v48  ;;  %v5789_v62 = vmul.f32 %v8165_v6, %v8164_v53  ;;  %v5797_v30 = vmul.f32 %v8167_v11, %v8165_v6  ;;  %v8168_v39 = vld [vmem:[#allocation109_spill] sm:$0xff]  ;;  %v3727_v22 = vld [vmem:[#allocation2] sm:$0xff]  ;;  %v8171_v11 = vld [vmem:[#allocation143_spill] sm:$0xff] }
 0x239   :  { %v5762_v17 = vpop.permute.xlu0 %727  ;;  %3649 = vset.pattern.permute.xlu1 %v7855_v4  ;;  %v5776_v4 = vadd.f32 %v1486_v25, %v1464_v5  ;;  %v5801_v23 = vmul.f32 %v8168_v39, %v8165_v6  ;;  %v646_v25 = vmul.f32 %v3727_v22, %v5553_v58  ;;  %v8173_v39 = vld [vmem:[#allocation70_spill] sm:$0xff] }
 0x23a   :  { %8156 = vst [vmem:[#allocation98_spill] sm:$0xff] %v5762_v17  ;;  %v441_v45 = vadd.f32 %v419_v35, %v353_v46  ;;  %v5793_v46 = vmul.f32 %v8165_v6, %v8166_v55  ;;  %v5808_v53 = vadd.f32 %v506_v38, %v440_v13  ;;  %v647_v17 = vmul.f32 %v8171_v11, %v5553_v58  ;;  %v8176_v38 = vld [vmem:[#allocation72_spill] sm:$0xff]  ;;  %v8180_v11 = vld [vmem:[#allocation149_spill] sm:$0xff] }
 0x23b   :  { %v5771_v26 = vpop.permute.xlu1 %1022  ;;  %v1582_v6 = vmul.f32 %v8172_v9, %v5553_v58 }
 0x23c   :  { %1813 = vrot.lane.b32.xlu1 %v1550_v19, %s3828_s21  ;;  %v5810_v55 = vadd.f32 %v507_v29, %v441_v45  ;;  %v735_v29 = vmul.f32 %v5576_v40, %v8176_v38  ;;  %v8177_v45 = vld [vmem:[#allocation18_spill] sm:$0xff] }
 0x23d   :  { %v1065_v13 = vsel %vm1064_vm4, %v5643_v27, %v8177_v45 }
 0x23e   :  { %v538_v5 = vpop.permute.xlu0 %537  ;;  %v1092_v14 = vsel %vm5782_vm7, %v1065_v13, 0.0 }
 0x23f   :  { %v1045_v35 = vpop.permute.xlu1 %1044  ;;  %v581_v36 = vmul.f32 %v538_v5, %v8173_v39  ;;  %v1560_v22 = vmul.f32 %v8174_v24, %v538_v5  ;;  %v8181_v24 = vld [vmem:[#allocation84_spill] sm:$0xff]  ;;  %v580_v33 = vmul.f32 %v538_v5, %v8185_v3 }
 0x240   :  { %639 = vperm.xlu1 %3649, %v8180_v11   ;;  %v1625_v58 = vmul.f32 %v8181_v24, %v5576_v40  ;;  %v8182_v39 = vld [vmem:[#allocation32_spill] sm:$0xff]  ;;  %v1559_v11 = vmul.f32 %v8186_v7, %v538_v5  ;;  %v1191_v40 = vsel %vm1179_vm5, %v5712_v44, %v5682_v51 }
 0x241   :  { %v1823_v12 = vsel %vm1064_vm4, %v5653_v50, %v8182_v39  ;;  %v669_v59 = vadd.f32 %v647_v17, %v581_v36  ;;  %v1604_v38 = vadd.f32 %v1582_v6, %v1560_v22  ;;  %v8187_v24 = vld [vmem:[#allocation148_spill] sm:$0xff]  ;;  %v1076_v36 = vsel %vm1064_vm4, %v8177_v45, %v5643_v27 }
 0x242   :  { %v542_v21 = vpop.permute.xlu0 %541  ;;  %v649_v16 = vmul.f32 %v8187_v24, %v5605_v63  ;;  %v1834_v3 = vsel %vm1064_vm4, %v8182_v39, %v5653_v50  ;;  %v1846_v7 = vsel %vm5782_vm7, %v1823_v12, 0.0  ;;  %v8188_v5 = vld [vmem:[#allocation24_spill] sm:$0xff]  ;;  %v8190_v50 = vld [vmem:[#allocation103_spill] sm:$0xff]  ;;  %v8191_v39 = vld [vmem:[#allocation101_spill] sm:$0xff]  ;;  %v668_v54 = vadd.f32 %v646_v25, %v580_v33 }
 0x243   :  { %v1804_v18 = vpop.permute.xlu1 %1803  ;;  %v757_v17 = vadd.f32 %v735_v29, %v669_v59  ;;  %v1648_v27 = vadd.f32 %v1626_v43, %v1604_v38  ;;  %v1944_v6 = vsel %vm1179_vm5, %v5735_v20, %v8188_v5  ;;  %v8189_v22 = vld [vmem:[#allocation144_spill] sm:$0xff]  ;;  %v583_v13 = vmul.f32 %v542_v21, %v8190_v50  ;;  %v8194_v38 = vld [vmem:[#allocation107_spill] sm:$0xff] }
 0x244   :  { %1169 = vrot.lane.b32.xlu1 %v1011_v49, %s3830_s24  ;;  %v582_v45 = vmul.f32 %v542_v21, %v8189_v22  ;;  %v1561_v12 = vmul.f32 %v8191_v39, %v542_v21  ;;  %v1603_v24 = vadd.f32 %v1581_v15, %v1559_v11  ;;  %v1583_v49 = vmul.f32 %v8192_v47, %v5605_v63  ;;  %v8193_v43 = vld [vmem:[#allocation152_spill] sm:$0xff] }
 0x245   :  { %v1114_v56 = vadd.f32 %v1092_v14, %v757_v17  ;;  %v1868_v52 = vadd.f32 %v1846_v7, %v1648_v27  ;;  %v1584_v29 = vmul.f32 %v8193_v43, %v5605_v63  ;;  %v1091_v59 = vsel %vm5778_vm6, %v1076_v36, 0.0 }
 0x246   :  { %v1562_v57 = vmul.f32 %v8194_v38, %v542_v21  ;;  %v1845_v50 = vsel %vm5778_vm6, %v1834_v3, 0.0  ;;  %v1180_v15 = vsel %vm1179_vm5, %v5682_v51, %v5712_v44  ;;  %v1207_v47 = vsel %vm5804_vm8, %v1191_v40, 0.0 }
 0x247   :  { %v5877_v22 = vpop.permute.xlu1 %619  ;;  %v1933_v33 = vsel %vm1179_vm5, %v8188_v5, %v5735_v20  ;;  %v1956_v21 = vsel %vm5804_vm8, %v1944_v6, 0.0  ;;  %v670_v63 = vadd.f32 %v648_v0, %v582_v45  ;;  %v671_v25 = vadd.f32 %v649_v16, %v583_v13 }
 0x248   :  { %1923 = vrot.lane.b32.xlu1 %v5774_v61, %s3830_s24  ;;  %v1605_v11 = vadd.f32 %v1583_v49, %v1561_v12  ;;  %v5895_v36 = vadd.f32 %v1207_v47, %v1114_v56  ;;  %v5897_v44 = vadd.f32 %v1956_v21, %v1868_v52  ;;  %v756_v51 = vadd.f32 %v734_v31, %v668_v54  ;;  %v8197_v52 = vld [vmem:[#allocation51_spill] sm:$0xff] }
 0x249   :  { %v1647_v14 = vadd.f32 %v1625_v58, %v1603_v24  ;;  %v1206_v3 = vsel %vm5827_vm9, %v1180_v15, 0.0  ;;  %v1066_v20 = vsel %vm1064_vm4, %v5771_v26, %v1045_v35  ;;  %v1077_v61 = vsel %vm1064_vm4, %v1045_v35, %v5771_v26  ;;  %v8198_v26 = vld [vmem:[#allocation91_spill] sm:$0xff] }
 0x24a   :  { %8195 = vst [vmem:[#allocation8_spill] sm:$0xff] %v5895_v36  ;;  %8196 = vst [vmem:[#allocation112_spill] sm:$0xff] %v5897_v44  ;;  %v1606_v0 = vadd.f32 %v1584_v29, %v1562_v57  ;;  %v1955_v56 = vsel %vm5827_vm9, %v1933_v33, 0.0  ;;  %v1835_v31 = vsel %vm1064_vm4, %v1804_v18, %v8197_v52  ;;  %2063 = vmatprep.mubr.f32.mxu0 %v5895_v36  ;;  %2183 = vmatprep.mubr.f32.mxu1 %v5897_v44  ;;  %v8339_v36 = vld [vmem:[#allocation74_spill] sm:$0xff] }
 0x24b   :  { %v1138_v16 = vpop.permute.xlu1 %1137  ;;  %v1113_v58 = vadd.f32 %v1091_v59, %v756_v51  ;;  %v1867_v7 = vadd.f32 %v1845_v50, %v1647_v14  ;;  %v1649_v40 = vadd.f32 %v5797_v30, %v1605_v11  ;;  %v1824_v57 = vsel %vm1064_vm4, %v8197_v52, %v1804_v18  ;;  %v8201_v18 = vld [vmem:[#allocation161_spill] sm:$0xff]  ;;  %v8207_v11 = vld [vmem:[#allocation127_spill] sm:$0xff]  ;;  %v8212_v52 = vld [vmem:[#allocation158_spill] sm:$0xff] }
 0x24c   :  { %v1192_v35 = vsel %vm1179_vm5, %v8198_v26, %v1138_v16  ;;  %1034 = vrot.lane.b32.xlu1 %v5808_v53, %s3828_s21  ;;  %v759_v17 = vadd.f32 %v5793_v46, %v671_v25  ;;  %v1181_v30 = vsel %vm1179_vm5, %v1138_v16, %v8198_v26  ;;  %v758_v6 = vadd.f32 %v5789_v62, %v670_v63  ;;  %v8202_v62 = vld [vmem:[#allocation159_spill] sm:$0xff]  ;;  %v8214_v26 = vld [vmem:[#allocation93_spill] sm:$0xff] }
 0x24d   :  { %v5924_v27 = vadd.f32 %v1206_v3, %v1113_v58  ;;  %v5926_v5 = vadd.f32 %v1955_v56, %v1867_v7  ;;  %v1530_v45 = vmul.f32 %v8201_v18, %v8158_v10  ;;  %v1093_v13 = vsel %vm5778_vm6, %v1077_v61, 0.0  ;;  %v8209_v3 = vld [vmem:[#allocation28_spill] sm:$0xff]  ;;  %v5991_v58 = vld [vmem:[#allocation2 + $0x88] sm:$0xff] }
 0x24e   :  { %v1650_v53 = vadd.f32 %v5801_v23, %v1606_v0  ;;  %v1847_v46 = vsel %vm5778_vm6, %v1835_v31, 0.0  ;;  %v1094_v12 = vsel %vm5782_vm7, %v1066_v20, 0.0  ;;  %v1848_v54 = vsel %vm5782_vm7, %v1824_v57, 0.0  ;;  %v8211_v0 = vld [vmem:[#allocation135_spill] sm:$0xff]  ;;  %v8213_v57 = vld [vmem:[#allocation150_spill] sm:$0xff] }
 0x24f   :  { %8199 = vst [vmem:[#allocation108_spill] sm:$0xff] %v5924_v27  ;;  %8200 = vst [vmem:[#allocation68_spill] sm:$0xff] %v5926_v5  ;;  %v1892_v39 = vpop.permute.xlu1 %1891  ;;  %2064 = vmatmul.mubr.f32.vlgmr.msra.gmra.mrb[0].mxu0 %v5924_v27  ;;  %2184 = vmatmul.mubr.f32.vlgmr.msra.gmra.mrb[0].mxu1 %v5926_v5  ;;  %v1209_v10 = vsel %vm5804_vm8, %v1192_v35, 0.0  ;;  %v1208_v24 = vsel %vm5827_vm9, %v1181_v30, 0.0  ;;  %v1116_v29 = vadd.f32 %v1094_v12, %v759_v17  ;;  %v8203_v59 = vmov 1.0|1.0  }
 0x250   :  { %v1934_v23 = vsel %vm1179_vm5, %v1892_v39, %v8202_v62  ;;  %v1945_v49 = vsel %vm1179_vm5, %v8202_v62, %v1892_v39  ;;  %1056 = vrot.lane.b32.xlu1 %v5810_v55, %s3828_s21  ;;  %3493 = vmatpush3.bf16.msra.mxu0 %v8203_v59  ;;  %v1869_v38 = vadd.f32 %v1847_v46, %v1649_v40  ;;  %v3730_v35 = vld [vmem:[#allocation2 + $0x20] sm:$0xff]  ;;  %v8215_v30 = vld [vmem:[#allocation163_spill] sm:$0xff]  ;;  %v8219_v12 = vld [vmem:[#allocation154_spill] sm:$0xff] }
 0x251   :  { %v1957_v43 = vsel %vm5827_vm9, %v1934_v23, 0.0  ;;  %v1958_v50 = vsel %vm5804_vm8, %v1945_v49, 0.0  ;;  %v1115_v15 = vadd.f32 %v1093_v13, %v758_v6  ;;  %3509 = vmatpush3.bf16.msra.mxu1 %v8203_v59  ;;  %3494 = vmatprep.subr.bf16.mxu0 %v8203_v59  ;;  %v1870_v47 = vadd.f32 %v1848_v54, %v1650_v53  ;;  %v8217_v53 = vld [vmem:[#allocation33_spill] sm:$0xff]  ;;  %v8218_v39 = vld [vmem:[#allocation115_spill] sm:$0xff]  ;;  %v8272_v5 = vld [vmem:[#allocation46_spill] sm:$0xff] }
 0x252   :  { %v5964_v33 = vadd.f32 %v1209_v10, %v1116_v29  ;;  %v1552_v63 = vadd.f32 %v1530_v45, %v5776_v4  ;;  %3510 = vmatprep.subr.bf16.mxu1 %v8203_v59  ;;  %v5972_v25 = vadd.f32 %v1957_v43, %v1869_v38  ;;  %v836_v51 = vmul.f32 %v8207_v11, %v5728_v1  ;;  %v8210_v4 = vld [vmem:[#allocation131_spill] sm:$0xff]  ;;  %v8216_v45 = vld [vmem:[#allocation106_spill] sm:$0xff]  ;;  %v8382_v9 = vld [vmem:[#allocation112_spill] sm:$0xff] }
 0x253   :  { %v5966_v21 = vpop.permute.xlu1 %707  ;;  %v5970_v55 = vadd.f32 %v1208_v24, %v1115_v15  ;;  %v5978_v14 = vadd.f32 %v1958_v50, %v1870_v47  ;;  %v1683_v20 = vmul.f32 %v8209_v3, %v8207_v11  ;;  %v902_v61 = vmul.f32 %v5756_v2, %v8210_v4  ;;  %v8220_v10 = vld [vmem:[#allocation23_spill] sm:$0xff]  ;;  %v8222_v29 = vld [vmem:[#allocation118_spill] sm:$0xff]  ;;  %v8223_v15 = vld [vmem:[#allocation97_spill] sm:$0xff] }
 0x254   :  { %8204 = vst [vmem:[#allocation69_spill] sm:$0xff] %v5964_v33  ;;  %8206 = vst [vmem:[#allocation89_spill] sm:$0xff] %v5972_v25  ;;  %2068 = vmatprep.mubr.f32.mxu0 %v5964_v33  ;;  %1815 = vrot.lane.b32.xlu1 %v1552_v63, %s3828_s21  ;;  %v990_v16 = vmul.f32 %v8211_v0, %v5747_v48  ;;  %v1705_v31 = vmul.f32 %v8212_v52, %v8210_v4  ;;  %v8221_v23 = vld [vmem:[#allocation111_spill] sm:$0xff]  ;;  %v8224_v47 = vld [vmem:[#allocation156_spill] sm:$0xff] }
 0x255   :  { %8205 = vst [vmem:[#allocation142_spill] sm:$0xff] %v5970_v55  ;;  %8208 = vst [vmem:[#allocation119_spill] sm:$0xff] %v5978_v14  ;;  %2069 = vmatmul.mubr.f32.gmra.mrb[2].mxu0 %v5970_v55  ;;  %3511 = vmatpush3.bf16.msra.mxu1 %v8203_v59  ;;  %v421_v7 = vmul.f32 %v5991_v58, %v4759_v60  ;;  %v924_v40 = vadd.f32 %v902_v61, %v836_v51  ;;  %v8225_v11 = vld [vmem:[#allocation49_spill] sm:$0xff]  ;;  %v8227_v52 = vld [vmem:[#allocation59_spill] sm:$0xff] }
 0x256   :  { %2188 = vmatprep.mubr.f32.mxu1 %v5978_v14  ;;  %v6000_v2 = vsel %vm141_vm1, %v8214_v26, %v8213_v57  ;;  %v650_v17 = vmul.f32 %v3730_v35, %v5638_v32  ;;  %3495 = vmatpush3.bf16.msra.mxu0 %v8203_v59  ;;  %v1727_v6 = vadd.f32 %v1705_v31, %v1683_v20  ;;  %v3731_v20 = vld [vmem:[#allocation2 + $0xd0] sm:$0xff]  ;;  %v8228_v26 = vld [vmem:[#allocation37_spill] sm:$0xff]  ;;  %v8383_v19 = vld [vmem:[#allocation68_spill] sm:$0xff] }
 0x257   :  { %v1047_v56 = vpop.permute.xlu1 %1046  ;;  %2189 = vmatmul.mubr.f32.gmra.mrb[2].mxu1 %v5972_v25  ;;  %v1749_v13 = vmul.f32 %v8216_v45, %v8211_v0  ;;  %v651_v46 = vmul.f32 %v8217_v53, %v5638_v32  ;;  %3496 = vmatprep.subr.bf16.mxu0 %v8203_v59  ;;  %v738_v54 = vmul.f32 %v8219_v12, %v8218_v39  ;;  %v8226_v0 = vld [vmem:[#allocation162_spill] sm:$0xff]  ;;  %v8230_v53 = vld [vmem:[#allocation95_spill] sm:$0xff]  ;;  %v8269_v25 = vld [vmem:[#allocation25_spill] sm:$0xff] }
 0x258   :  { %643 = vperm.xlu1 %3649, %v8215_v30   ;;  %3512 = vmatprep.subr.bf16.mxu1 %v8203_v59  ;;  %v739_v62 = vmul.f32 %v8219_v12, %v8220_v10  ;;  %v584_v24 = vmul.f32 %v5621_v41, %v8221_v23  ;;  %v1012_v43 = vadd.f32 %v990_v16, %v924_v40  ;;  %v8270_v14 = vld [vmem:[#allocation121_spill] sm:$0xff] }
 0x259   :  { %3513 = vmatpush3.bf16.msra.mxu1 %v8203_v59  ;;  %v1629_v38 = vmul.f32 %v8222_v29, %v8219_v12  ;;  %v355_v50 = vmul.f32 %v8039_v37, %v6000_v2  ;;  %v254_v63 = vsel %vm234_vm0, %v8224_v47, %v8223_v15  ;;  %v585_v51 = vmul.f32 %v5621_v41, %v8225_v11  ;;  %v8235_v29 = vld [vmem:[#allocation57_spill] sm:$0xff] }
 0x25a   :  { %3514 = vmatprep.subr.bf16.mxu1 %v8203_v59  ;;  %v1585_v4 = vmul.f32 %v3731_v20, %v5638_v32  ;;  %v672_v61 = vadd.f32 %v650_v17, %v584_v24  ;;  %v1078_v16 = vsel %vm1064_vm4, %v1047_v56, %v8226_v0  ;;  %3497 = vmatpush3.bf16.msra.mxu0 %v8203_v59  ;;  %v8229_v17 = vld [vmem:[#allocation153_spill] sm:$0xff]  ;;  %v8233_v24 = vld [vmem:[#allocation99_spill] sm:$0xff] }
 0x25b   :  { %v1806_v49 = vpop.permute.xlu1 %1805  ;;  %v1586_v31 = vmul.f32 %v8227_v52, %v5638_v32  ;;  %v673_v40 = vadd.f32 %v651_v46, %v585_v51  ;;  %v1067_v57 = vsel %vm1064_vm4, %v8226_v0, %v1047_v56  ;;  %3498 = vmatprep.subr.bf16.mxu0 %v8203_v59  ;;  %v1630_v35 = vmul.f32 %v8228_v26, %v8219_v12  ;;  %v8231_v32 = vld [vmem:[#allocation114_spill] sm:$0xff]  ;;  %v8381_v28 = vld [vmem:[#allocation69_spill] sm:$0xff] }
 0x25c   :  { %1149 = vrot.lane.b32.xlu1 %v1012_v43, %s3830_s24  ;;  %v6048_v39 = vsel %vm141_vm1, %v8230_v53, %v8229_v17  ;;  %v1563_v46 = vmul.f32 %v8231_v32, %v5621_v41  ;;  %v1771_v23 = vadd.f32 %v1749_v13, %v1727_v6  ;;  %v6057_v56 = vsel %vm70_vm2, %v254_v63, 0.0  ;;  %v8234_v12 = vld [vmem:[#allocation34_spill] sm:$0xff]  ;;  %v8236_v63 = vld [vmem:[#allocation81_spill] sm:$0xff] }
 0x25d   :  { %3651 = vset.pattern.permute.xlu1 %v7902_v42  ;;  %3515 = vmatpush3.bf16.msra.mxu1 %v8203_v59  ;;  %v1424_v43 = vsel %vm234_vm0, %v8234_v12, %v8233_v24  ;;  %v1564_v15 = vmul.f32 %v8235_v29, %v5621_v41  ;;  %v1095_v47 = vsel %vm5778_vm6, %v1078_v16, 0.0  ;;  %v760_v6 = vadd.f32 %v738_v54, %v672_v61 }
 0x25e   :  { %3516 = vmatprep.subr.bf16.mxu1 %v8203_v59  ;;  %v1096_v13 = vsel %vm5782_vm7, %v1067_v57, 0.0  ;;  %v1607_v11 = vadd.f32 %v1585_v4, %v1563_v46  ;;  %v1836_v51 = vsel %vm1064_vm4, %v1806_v49, %v8236_v63  ;;  %3499 = vmatpush3.bf16.msra.mxu0 %v8203_v59  ;;  %v443_v20 = vadd.f32 %v421_v7, %v355_v50  ;;  %v8237_v4 = vld [vmem:[#allocation43_spill] sm:$0xff]  ;;  %v8238_v50 = vld [vmem:[#allocation170_spill] sm:$0xff] }
 0x25f   :  { %v6052_v10 = vpop.permute.xlu1 %623  ;;  %v761_v41 = vadd.f32 %v739_v62, %v673_v40  ;;  %v1608_v0 = vadd.f32 %v1586_v31, %v1564_v15  ;;  %v1825_v16 = vsel %vm1064_vm4, %v8236_v63, %v1806_v49  ;;  %3500 = vmatprep.subr.bf16.mxu0 %v8203_v59  ;;  %v1466_v54 = vmul.f32 %v6048_v39, %v8039_v37  ;;  %v8241_v15 = vld [vmem:[#allocation172_spill] sm:$0xff] }
 0x260   :  { %1903 = vrot.lane.b32.xlu1 %v1771_v23, %s3830_s24  ;;  %v509_v61 = vmul.f32 %v8237_v4, %v6057_v56  ;;  %v6085_v52 = vsel %vm70_vm2, %v1424_v43, 0.0  ;;  %v1117_v57 = vadd.f32 %v1095_v47, %v760_v6  ;;  %v1849_v49 = vsel %vm5778_vm6, %v1836_v51, 0.0 }
 0x261   :  { %3517 = vmatpush3.bf16.msra.mxu1 %v8203_v59  ;;  %v1118_v62 = vadd.f32 %v1096_v13, %v761_v41  ;;  %v1651_v40 = vadd.f32 %v1629_v38, %v1607_v11  ;;  %v1850_v26 = vsel %vm5782_vm7, %v1825_v16, 0.0  ;;  %v1652_v32 = vadd.f32 %v1630_v35, %v1608_v0  ;;  %v6110_v38 = vld [vmem:[#allocation2 + $0x138] sm:$0xff]  ;;  %v8245_v0 = vld [vmem:[#allocation141_spill] sm:$0xff] }
 0x262   :  { %3518 = vmatprep.subr.bf16.mxu1 %v8203_v59  ;;  %3501 = vmatpush3.bf16.msra.mxu0 %v8203_v59  ;;  %v1488_v24 = vmul.f32 %v6110_v38, %v4759_v60  ;;  %v1532_v12 = vmul.f32 %v6085_v52, %v8237_v4  ;;  %v8242_v60 = vld [vmem:[#allocation38_spill] sm:$0xff]  ;;  %v905_v16 = vmul.f32 %v5991_v58, %v8245_v0 }
 0x263   :  { %v1162_v7 = vpop.permute.xlu1 %1161  ;;  %3502 = vmatprep.subr.bf16.mxu0 %v8203_v59  ;;  %v1871_v43 = vadd.f32 %v1849_v49, %v1651_v40  ;;  %v1872_v35 = vadd.f32 %v1850_v26, %v1652_v32  ;;  %v839_v13 = vmul.f32 %v8242_v60, %v6000_v2  ;;  %v8247_v49 = vld [vmem:[#allocation11_spill] sm:$0xff]  ;;  %v8250_v40 = vld [vmem:[#allocation9_spill] sm:$0xff] }
 0x264   :  { %v1182_v31 = vsel %vm1179_vm5, %v8238_v50, %v1162_v7  ;;  %v1193_v37 = vsel %vm1179_vm5, %v1162_v7, %v8238_v50  ;;  %731 = vperm.xlu1 %3651, %v8215_v30   ;;  %v531_v30 = vadd.f32 %v509_v61, %v443_v20  ;;  %v1510_v11 = vadd.f32 %v1488_v24, %v1466_v54  ;;  %v8246_v54 = vld [vmem:[#allocation147_spill] sm:$0xff]  ;;  %v8248_v50 = vld [vmem:[#allocation168_spill] sm:$0xff] }
 0x265   :  { %v1210_v17 = vsel %vm5827_vm9, %v1182_v31, 0.0  ;;  %v1211_v53 = vsel %vm5804_vm8, %v1193_v37, 0.0  ;;  %3519 = vmatpush3.bf16.msra.mxu1 %v8203_v59  ;;  %v993_v4 = vmul.f32 %v8246_v54, %v6057_v56  ;;  %v927_v7 = vadd.f32 %v905_v16, %v839_v13  ;;  %v8249_v37 = vld [vmem:[#allocation85_spill] sm:$0xff]  ;;  %v8254_v13 = vld [vmem:[#allocation92_spill] sm:$0xff] }
 0x266   :  { %v6105_v46 = vadd.f32 %v1211_v53, %v1118_v62  ;;  %v6107_v23 = vadd.f32 %v1210_v17, %v1117_v57  ;;  %3520 = vmatprep.subr.bf16.mxu1 %v8203_v59  ;;  %3503 = vmatpush3.bf16.msra.mxu0 %v8203_v59  ;;  %v1554_v57 = vadd.f32 %v1532_v12, %v1510_v11  ;;  %v3733_v12 = vld [vmem:[#allocation2 + $0x30] sm:$0xff]  ;;  %v8257_v16 = vld [vmem:[#allocation12_spill] sm:$0xff] }
 0x267   :  { %v1916_v29 = vpop.permute.xlu1 %1915  ;;  %3504 = vmatprep.subr.bf16.mxu0 %v8203_v59  ;;  %v1686_v62 = vmul.f32 %v6048_v39, %v8242_v60  ;;  %v255_v31 = vsel %vm234_vm0, %v8248_v50, %v8247_v49  ;;  %v6158_v26 = vsel %vm141_vm1, %v8250_v40, %v8249_v37  ;;  %v1708_v17 = vmul.f32 %v6110_v38, %v8245_v0  ;;  %v8260_v49 = vld [vmem:[#allocation146_spill] sm:$0xff]  ;;  %v8262_v37 = vld [vmem:[#allocation184_spill] sm:$0xff] }
 0x268   :  { %8239 = vst [vmem:[#allocation160_spill] sm:$0xff] %v6105_v46  ;;  %8240 = vst [vmem:[#allocation164_spill] sm:$0xff] %v6107_v23  ;;  %v1935_v47 = vsel %vm1179_vm5, %v8241_v15, %v1916_v29  ;;  %v1946_v6 = vsel %vm1179_vm5, %v1916_v29, %v8241_v15  ;;  %2073 = vmatprep.mubr.f32.mxu0 %v6105_v46  ;;  %1058 = vrot.lane.b32.xlu1 %v531_v30, %s3828_s21  ;;  %v8252_v30 = vld [vmem:[#allocation166_spill] sm:$0xff]  ;;  %v8253_v15 = vld [vmem:[#allocation176_spill] sm:$0xff] }
 0x269   :  { %v1959_v63 = vsel %vm5827_vm9, %v1935_v47, 0.0  ;;  %v1960_v51 = vsel %vm5804_vm8, %v1946_v6, 0.0  ;;  %2074 = vmatmul.mubr.f32.gmra.mrb[4].mxu0 %v6107_v23  ;;  %3521 = vmatpush3.bf16.msra.mxu1 %v8203_v59  ;;  %v1752_v53 = vmul.f32 %v6085_v52, %v8246_v54  ;;  %v1015_v24 = vadd.f32 %v993_v4, %v927_v7  ;;  %v8258_v54 = vld [vmem:[#allocation171_spill] sm:$0xff] }
 0x26a   :  { %v6133_v20 = vadd.f32 %v1960_v51, %v1872_v35  ;;  %v6135_v41 = vadd.f32 %v1959_v63, %v1871_v43  ;;  %3522 = vmatprep.subr.bf16.mxu1 %v8203_v59  ;;  %3505 = vmatpush3.bf16.msra.mxu0 %v8203_v59  ;;  %v8251_v43 = vld [vmem:[#allocation27_spill] sm:$0xff]  ;;  %v6174_v6 = vsel %vm70_vm2, %v255_v31, 0.0  ;;  %v1730_v60 = vadd.f32 %v1708_v17, %v1686_v62  ;;  %v8255_v63 = vld [vmem:[#allocation41_spill] sm:$0xff]  ;;  %v8256_v51 = vld [vmem:[#allocation126_spill] sm:$0xff] }
 0x26b   :  { %v1027_v61 = vpop.permute.xlu1 %1026  ;;  %3506 = vmatprep.subr.bf16.mxu0 %v8203_v59  ;;  %v652_v29 = vmul.f32 %v3733_v12, %v8251_v43  ;;  %v653_v35 = vmul.f32 %v8252_v30, %v8251_v43  ;;  %v1587_v47 = vmul.f32 %v8253_v15, %v8251_v43  ;;  %v357_v11 = vmul.f32 %v8254_v13, %v6158_v26  ;;  %v6191_v62 = vld [vmem:[#allocation2 + $0x98] sm:$0xff]  ;;  %v8261_v31 = vld [vmem:[#allocation66_spill] sm:$0xff]  ;;  %v8263_v17 = vld [vmem:[#allocation124_spill] sm:$0xff] }
 0x26c   :  { %8243 = vst [vmem:[#allocation120_spill] sm:$0xff] %v6133_v20  ;;  %8244 = vst [vmem:[#allocation19_spill] sm:$0xff] %v6135_v41  ;;  %2193 = vmatprep.mubr.f32.mxu1 %v6133_v20  ;;  %1817 = vrot.lane.b32.xlu1 %v1554_v57, %s3828_s21  ;;  %v6182_v0 = vsel %vm141_vm1, %v8256_v51, %v8255_v63  ;;  %v1425_v4 = vsel %vm234_vm0, %v8258_v54, %v8257_v16  ;;  %v8259_v57 = vld [vmem:[#allocation169_spill] sm:$0xff]  ;;  %v8266_v51 = vld [vmem:[#allocation122_spill] sm:$0xff] }
 0x26d   :  { %2194 = vmatmul.mubr.f32.gmra.mrb[4].mxu1 %v6135_v41  ;;  %v1588_v7 = vmul.f32 %v8259_v57, %v8251_v43  ;;  %v423_v50 = vmul.f32 %v6191_v62, %v8260_v49  ;;  %v586_v40 = vmul.f32 %v8262_v37, %v8261_v31  ;;  %v587_v12 = vmul.f32 %v8262_v37, %v8263_v17  ;;  %v6200_v30 = vld [vmem:[#allocation2 + $0x148] sm:$0xff]  ;;  %v8265_v43 = vld [vmem:[#allocation31_spill] sm:$0xff] }
 0x26e   :  { %3523 = vmatpush3.bf16.msra.mxu1 %v8203_v59  ;;  %3507 = vmatpush3.bf16.msra.mxu0 %v8203_v59  ;;  %v8264_v15 = vld [vmem:[#allocation29_spill] sm:$0xff]  ;;  %v511_v16 = vmul.f32 %v8266_v51, %v6174_v6  ;;  %v1774_v57 = vadd.f32 %v1752_v53, %v1730_v60  ;;  %v8267_v41 = vld [vmem:[#allocation71_spill] sm:$0xff]  ;;  %v1468_v59 = vmul.f32 %v6182_v0, %v8254_v13 }
 0x26f   :  { %v1049_v32 = vpop.permute.xlu1 %1048  ;;  %v740_v63 = vmul.f32 %v8265_v43, %v8264_v15  ;;  %v741_v31 = vmul.f32 %v8265_v43, %v8267_v41  ;;  %v8268_v17 = vld [vmem:[#allocation155_spill] sm:$0xff]  ;;  %v907_v15 = vmul.f32 %v6191_v62, %v8269_v25  ;;  %v445_v23 = vadd.f32 %v423_v50, %v357_v11  ;;  %v8271_v60 = vld [vmem:[#allocation125_spill] sm:$0xff]  ;;  %v8273_v11 = vld [vmem:[#allocation14_spill] sm:$0xff] }
 0x270   :  { %1173 = vrot.lane.b32.xlu1 %v1015_v24, %s3830_s24  ;;  %v1490_v24 = vmul.f32 %v6200_v30, %v8260_v49  ;;  %v841_v20 = vmul.f32 %v8268_v17, %v6158_v26  ;;  %v6216_v49 = vsel %vm70_vm2, %v1425_v4, 0.0  ;;  %v1565_v53 = vmul.f32 %v8270_v14, %v8262_v37 }
 0x271   :  { %v1566_v41 = vmul.f32 %v8271_v60, %v8262_v37  ;;  %v674_v46 = vadd.f32 %v652_v29, %v586_v40  ;;  %v675_v55 = vadd.f32 %v653_v35, %v587_v12  ;;  %v1068_v13 = vsel %vm1064_vm4, %v1027_v61, %v1049_v32 }
 0x272   :  { %v1079_v4 = vsel %vm1064_vm4, %v1049_v32, %v1027_v61  ;;  %v1631_v44 = vmul.f32 %v8272_v5, %v8265_v43  ;;  %v1632_v50 = vmul.f32 %v8273_v11, %v8265_v43  ;;  %v1534_v14 = vmul.f32 %v6216_v49, %v8266_v51 }
 0x273   :  { %v1808_v54 = vpop.permute.xlu1 %1807  ;;  %v1710_v29 = vmul.f32 %v6200_v30, %v8269_v25  ;;  %v929_v35 = vadd.f32 %v907_v15, %v841_v20  ;;  %v1512_v40 = vadd.f32 %v1490_v24, %v1468_v59  ;;  %v1688_v61 = vmul.f32 %v6182_v0, %v8268_v17  ;;  %v8275_v24 = vld [vmem:[#allocation157_spill] sm:$0xff]  ;;  %v8276_v59 = vld [vmem:[#allocation175_spill] sm:$0xff] }
 0x274   :  { %1927 = vrot.lane.b32.xlu1 %v1774_v57, %s3830_s24  ;;  %v533_v57 = vadd.f32 %v511_v16, %v445_v23  ;;  %v1097_v5 = vsel %vm5778_vm6, %v1079_v4, 0.0  ;;  %v1098_v32 = vsel %vm5782_vm7, %v1068_v13, 0.0  ;;  %v1609_v12 = vadd.f32 %v1587_v47, %v1565_v53  ;;  %v8274_v16 = vld [vmem:[#allocation50_spill] sm:$0xff]  ;;  %v8277_v15 = vld [vmem:[#allocation173_spill] sm:$0xff] }
 0x275   :  { %v1610_v43 = vadd.f32 %v1588_v7, %v1566_v41  ;;  %v762_v51 = vadd.f32 %v740_v63, %v674_v46  ;;  %v763_v23 = vadd.f32 %v741_v31, %v675_v55  ;;  %v1826_v25 = vsel %vm1064_vm4, %v8274_v16, %v1808_v54  ;;  %v8278_v7 = vld [vmem:[#allocation35_spill] sm:$0xff]  ;;  %v8279_v46 = vld [vmem:[#allocation52_spill] sm:$0xff]  ;;  %v8280_v41 = vld [vmem:[#allocation90_spill] sm:$0xff] }
 0x276   :  { %v1837_v20 = vsel %vm1064_vm4, %v1808_v54, %v8274_v16  ;;  %v995_v17 = vmul.f32 %v8275_v24, %v6174_v6  ;;  %v6258_v47 = vsel %vm141_vm1, %v8277_v15, %v8276_v59  ;;  %v256_v55 = vsel %vm234_vm0, %v8279_v46, %v8278_v7  ;;  %v8283_v46 = vld [vmem:[#allocation61_spill] sm:$0xff] }
 0x277   :  { %v6235_v37 = vpop.permute.xlu1 %627  ;;  %v1556_v31 = vadd.f32 %v1534_v14, %v1512_v40  ;;  %v1119_v53 = vadd.f32 %v1097_v5, %v762_v51  ;;  %v1120_v60 = vadd.f32 %v1098_v32, %v763_v23  ;;  %v1851_v4 = vsel %vm5778_vm6, %v1837_v20, 0.0 }
 0x278   :  { %1060 = vrot.lane.b32.xlu1 %v533_v57, %s3828_s21  ;;  %v1852_v11 = vsel %vm5782_vm7, %v1826_v25, 0.0  ;;  %v1653_v40 = vadd.f32 %v1631_v44, %v1609_v12  ;;  %v1654_v5 = vadd.f32 %v1632_v50, %v1610_v43  ;;  %v1732_v23 = vadd.f32 %v1710_v29, %v1688_v61  ;;  %v8284_v29 = vld [vmem:[#allocation100_spill] sm:$0xff]  ;;  %v8286_v43 = vld [vmem:[#allocation113_spill] sm:$0xff] }
 0x279   :  { %v1754_v16 = vmul.f32 %v6216_v49, %v8275_v24  ;;  %v6287_v25 = vsel %vm70_vm2, %v256_v55, 0.0  ;;  %v1017_v59 = vadd.f32 %v995_v17, %v929_v35  ;;  %v359_v61 = vmul.f32 %v8284_v29, %v6258_v47  ;;  %v8285_v12 = vld [vmem:[#allocation140_spill] sm:$0xff]  ;;  %v8287_v55 = vld [vmem:[#allocation54_spill] sm:$0xff] }
 0x27a   :  { %v1873_v15 = vadd.f32 %v1851_v4, %v1653_v40  ;;  %v1874_v7 = vadd.f32 %v1852_v11, %v1654_v5  ;;  %v1426_v35 = vsel %vm234_vm0, %v8286_v43, %v8285_v12  ;;  %v8292_v4 = vld [vmem:[#allocation15_spill] sm:$0xff] }
 0x27b   :  { %v1142_v63 = vpop.permute.xlu1 %1141  ;;  %v513_v11 = vmul.f32 %v8292_v4, %v6287_v25  ;;  %v6328_v40 = vsel %vm70_vm2, %v1426_v35, 0.0  ;;  %v8295_v35 = vld [vmem:[#allocation62_spill] sm:$0xff] }
 0x27c   :  { %v1183_v54 = vsel %vm1179_vm5, %v1142_v63, %v8280_v41  ;;  %v1194_v13 = vsel %vm1179_vm5, %v8280_v41, %v1142_v63  ;;  %1819 = vrot.lane.b32.xlu1 %v1556_v31, %s3828_s21  ;;  %v8288_v63 = vld [vmem:[#allocation67_spill] sm:$0xff]  ;;  %v6318_v41 = vld [vmem:[#allocation2 + $0xa8] sm:$0xff]  ;;  %v1536_v42 = vmul.f32 %v6328_v40, %v8292_v4 }
 0x27d   :  { %v1212_v57 = vsel %vm5827_vm9, %v1183_v54, 0.0  ;;  %v1213_v14 = vsel %vm5804_vm8, %v1194_v13, 0.0  ;;  %v6312_v31 = vsel %vm141_vm1, %v8288_v63, %v8287_v55  ;;  %v8291_v54 = vld [vmem:[#allocation87_spill] sm:$0xff]  ;;  %v3738_v63 = vld [vmem:[#allocation2 + $0x40] sm:$0xff] }
 0x27e   :  { %v6279_v32 = vadd.f32 %v1213_v14, %v1120_v60  ;;  %v6281_v51 = vadd.f32 %v1212_v57, %v1119_v53  ;;  %v425_v13 = vmul.f32 %v6318_v41, %v8291_v54  ;;  %v1776_v14 = vadd.f32 %v1754_v16, %v1732_v23 }
 0x27f   :  { %v1896_v20 = vpop.permute.xlu1 %1895 }
 0x280   :  { %8281 = vst [vmem:[#allocation151_spill] sm:$0xff] %v6279_v32  ;;  %8282 = vst [vmem:[#allocation105_spill] sm:$0xff] %v6281_v51  ;;  %v1936_v44 = vsel %vm1179_vm5, %v1896_v20, %v8283_v46  ;;  %v1947_v50 = vsel %vm1179_vm5, %v8283_v46, %v1896_v20  ;;  %2078 = vmatprep.mubr.f32.mxu0 %v6279_v32  ;;  %1175 = vrot.lane.b32.xlu1 %v1017_v59, %s3830_s24  ;;  %v6335_v59 = vld [vmem:[#allocation2 + $0x158] sm:$0xff] }
 0x281   :  { %v1961_v24 = vsel %vm5827_vm9, %v1936_v44, 0.0  ;;  %v1962_v17 = vsel %vm5804_vm8, %v1947_v50, 0.0  ;;  %2079 = vmatmul.mubr.f32.gmra.mrb[6].mxu0 %v6281_v51  ;;  %v447_v5 = vadd.f32 %v425_v13, %v359_v61  ;;  %v1470_v20 = vmul.f32 %v6312_v31, %v8284_v29  ;;  %v554_v29 = vpop.permute.xlu0 %553  ;;  %v8294_v61 = vld [vmem:[#allocation165_spill] sm:$0xff] }
 0x282   :  { %v6314_v53 = vadd.f32 %v1962_v17, %v1874_v7  ;;  %v6316_v60 = vadd.f32 %v1961_v24, %v1873_v15  ;;  %v1492_v15 = vmul.f32 %v6335_v59, %v8291_v54  ;;  %v8293_v7 = vld [vmem:[#allocation44_spill] sm:$0xff]  ;;  %v909_v12 = vmul.f32 %v6318_v41, %v8294_v61  ;;  %v3739_v13 = vld [vmem:[#allocation2 + $0x48] sm:$0xff] }
 0x283   :  { %v6324_v57 = vpop.permute.xlu1 %715  ;;  %v535_v16 = vadd.f32 %v513_v11, %v447_v5  ;;  %v843_v46 = vmul.f32 %v8293_v7, %v6258_v47  ;;  %v1690_v50 = vmul.f32 %v6312_v31, %v8293_v7  ;;  %v1712_v43 = vmul.f32 %v6335_v59, %v8294_v61  ;;  %v8296_v5 = vld [vmem:[#allocation128_spill] sm:$0xff]  ;;  %v8298_v7 = vld [vmem:[#allocation130_spill] sm:$0xff] }
 0x284   :  { %8289 = vst [vmem:[#allocation104_spill] sm:$0xff] %v6314_v53  ;;  %8290 = vst [vmem:[#allocation109_spill] sm:$0xff] %v6316_v60  ;;  %2198 = vmatprep.mubr.f32.mxu1 %v6314_v53  ;;  %1929 = vrot.lane.b32.xlu1 %v1776_v14, %s3830_s24  ;;  %v1514_v44 = vadd.f32 %v1492_v15, %v1470_v20  ;;  %v997_v24 = vmul.f32 %v8295_v35, %v6287_v25  ;;  %v8297_v15 = vld [vmem:[#allocation88_spill] sm:$0xff]  ;;  %v8302_v53 = vld [vmem:[#allocation94_spill] sm:$0xff] }
 0x285   :  { %2199 = vmatmul.mubr.f32.gmra.mrb[6].mxu1 %v6316_v60  ;;  %v654_v54 = vmul.f32 %v3738_v63, %v5877_v22  ;;  %v655_v4 = vmul.f32 %v3739_v13, %v5877_v22  ;;  %v931_v11 = vadd.f32 %v909_v12, %v843_v46  ;;  %v1734_v14 = vadd.f32 %v1712_v43, %v1690_v50  ;;  %v8299_v60 = vld [vmem:[#allocation39_spill] sm:$0xff]  ;;  %v3740_v12 = vld [vmem:[#allocation2 + $0xf0] sm:$0xff] }
 0x286   :  { %v1558_v55 = vadd.f32 %v1536_v42, %v1514_v44  ;;  %v588_v20 = vmul.f32 %v554_v29, %v8296_v5  ;;  %v742_v61 = vmul.f32 %v5966_v21, %v8298_v7  ;;  %v743_v42 = vmul.f32 %v5966_v21, %v8299_v60  ;;  %v8300_v44 = vld [vmem:[#allocation180_spill] sm:$0xff] }
 0x287   :  { %v1051_v23 = vpop.permute.xlu1 %1050  ;;  %v1756_v50 = vmul.f32 %v6328_v40, %v8295_v35  ;;  %v1589_v43 = vmul.f32 %v3740_v12, %v5877_v22  ;;  %v1019_v60 = vadd.f32 %v997_v24, %v931_v11  ;;  %v1568_v51 = vmul.f32 %v8302_v53, %v554_v29  ;;  %v8304_v35 = vld [vmem:[#allocation56_spill] sm:$0xff] }
 0x288   :  { %1062 = vrot.lane.b32.xlu1 %v535_v16, %s3828_s21  ;;  %v589_v16 = vmul.f32 %v554_v29, %v8297_v15  ;;  %v1069_v63 = vsel %vm1064_vm4, %v8300_v44, %v1051_v23  ;;  %v1080_v46 = vsel %vm1064_vm4, %v1051_v23, %v8300_v44  ;;  %v8301_v15 = vld [vmem:[#allocation129_spill] sm:$0xff]  ;;  %v676_v32 = vadd.f32 %v654_v54, %v588_v20  ;;  %v8303_v23 = vld [vmem:[#allocation132_spill] sm:$0xff] }
 0x289   :  { %v1567_v7 = vmul.f32 %v8301_v15, %v554_v29  ;;  %v1633_v44 = vmul.f32 %v8303_v23, %v5966_v21  ;;  %v1634_v27 = vmul.f32 %v8304_v35, %v5966_v21  ;;  %v1099_v12 = vsel %vm5778_vm6, %v1080_v46, 0.0  ;;  %v8306_v15 = vld [vmem:[#allocation86_spill] sm:$0xff] }
 0x28a   :  { %v677_v33 = vadd.f32 %v655_v4, %v589_v16  ;;  %v764_v24 = vadd.f32 %v742_v61, %v676_v32  ;;  %v1778_v20 = vadd.f32 %v1756_v50, %v1734_v14  ;;  %v8309_v23 = vld [vmem:[#allocation102_spill] sm:$0xff] }
 0x28b   :  { %v1810_v17 = vpop.permute.xlu1 %1809  ;;  %v1611_v54 = vadd.f32 %v1589_v43, %v1567_v7 }
 0x28c   :  { %1821 = vrot.lane.b32.xlu1 %v1558_v55, %s3828_s21  ;;  %v3741_v55 = vld [vmem:[#allocation2 + $0xf8] sm:$0xff]  ;;  %v765_v11 = vadd.f32 %v743_v42, %v677_v33  ;;  %v1121_v16 = vadd.f32 %v1099_v12, %v764_v24 }
 0x28d   :  { %v1590_v13 = vmul.f32 %v3741_v55, %v5877_v22  ;;  %v1100_v22 = vsel %vm5782_vm7, %v1069_v63, 0.0  ;;  %v8305_v55 = vld [vmem:[#allocation73_spill] sm:$0xff]  ;;  %v1655_v61 = vadd.f32 %v1633_v44, %v1611_v54  ;;  %v3742_v54 = vld [vmem:[#allocation2 + $0x50] sm:$0xff] }
 0x28e   :  { %v1827_v53 = vsel %vm1064_vm4, %v8305_v55, %v1810_v17  ;;  %v1838_v29 = vsel %vm1064_vm4, %v1810_v17, %v8305_v55  ;;  %v1122_v46 = vadd.f32 %v1100_v22, %v765_v11  ;;  %v558_v55 = vpop.permute.xlu0 %557 }
 0x28f   :  { %v6371_v5 = vpop.permute.xlu1 %631  ;;  %v1612_v21 = vadd.f32 %v1590_v13, %v1568_v51  ;;  %v1853_v32 = vsel %vm5778_vm6, %v1838_v29, 0.0  ;;  %v1854_v17 = vsel %vm5782_vm7, %v1827_v53, 0.0 }
 0x290   :  { %1177 = vrot.lane.b32.xlu1 %v1019_v60, %s3830_s24  ;;  %v1875_v60 = vadd.f32 %v1853_v32, %v1655_v61  ;;  %v8314_v32 = vld [vmem:[#allocation183_spill] sm:$0xff] }
 0x291   :  { %v1656_v42 = vadd.f32 %v1634_v27, %v1612_v21  ;;  %v656_v21 = vmul.f32 %v3742_v54, %v6052_v10  ;;  %v8319_v54 = vld [vmem:[#allocation174_spill] sm:$0xff] }
 0x292   :  { %v6427_v29 = vpop.permute.xlu0 %561 }
 0x293   :  { %v1166_v4 = vpop.permute.xlu1 %1165  ;;  %v1876_v7 = vadd.f32 %v1854_v17, %v1656_v42  ;;  %v1591_v17 = vmul.f32 %v8314_v32, %v6052_v10 }
 0x294   :  { %v1184_v63 = vsel %vm1179_vm5, %v8306_v15, %v1166_v4  ;;  %v1195_v33 = vsel %vm1179_vm5, %v1166_v4, %v8306_v15  ;;  %1931 = vrot.lane.b32.xlu1 %v1778_v20, %s3830_s24  ;;  %v3743_v4 = vld [vmem:[#allocation2 + $0x58] sm:$0xff]  ;;  %s3834_s24 = smov 119  }
 0x295   :  { %v1214_v51 = vsel %vm5827_vm9, %v1184_v63, 0.0  ;;  %v1215_v14 = vsel %vm5804_vm8, %v1195_v33, 0.0  ;;  %v657_v20 = vmul.f32 %v3743_v4, %v6052_v10  ;;  %v8313_v63 = vld [vmem:[#allocation22_spill] sm:$0xff] }
 0x296   :  { %v6405_v50 = vadd.f32 %v1215_v14, %v1122_v46  ;;  %v6407_v43 = vadd.f32 %v1214_v51, %v1121_v16  ;;  %v8312_v46 = vld [vmem:[#allocation78_spill] sm:$0xff]  ;;  %v591_v33 = vmul.f32 %v558_v55, %v8313_v63  ;;  %v8315_v51 = vld [vmem:[#allocation48_spill] sm:$0xff] }
 0x297   :  { %v1920_v13 = vpop.permute.xlu1 %1919  ;;  %v590_v15 = vmul.f32 %v558_v55, %v8312_v46  ;;  %v1592_v14 = vmul.f32 %v8315_v51, %v6052_v10  ;;  %v8320_v46 = vld [vmem:[#allocation26_spill] sm:$0xff] }
 0x298   :  { %8307 = vst [vmem:[#allocation143_spill] sm:$0xff] %v6405_v50  ;;  %8308 = vst [vmem:[#allocation145_spill] sm:$0xff] %v6407_v43  ;;  %v1937_v35 = vsel %vm1179_vm5, %v8309_v23, %v1920_v13  ;;  %v1948_v12 = vsel %vm1179_vm5, %v1920_v13, %v8309_v23  ;;  %2083 = vmatprep.mubr.f32.mxu0 %v6405_v50  ;;  %v679_v42 = vadd.f32 %v657_v20, %v591_v33  ;;  %v8321_v33 = vld [vmem:[#allocation64_spill] sm:$0xff] }
 0x299   :  { %v1963_v27 = vsel %vm5827_vm9, %v1937_v35, 0.0  ;;  %v1964_v44 = vsel %vm5804_vm8, %v1948_v12, 0.0  ;;  %2084 = vmatmul.mubr.f32.gmra.mrb[8].mxu0 %v6407_v43  ;;  %v678_v61 = vadd.f32 %v656_v21, %v590_v15  ;;  %v8317_v35 = vld [vmem:[#allocation21_spill] sm:$0xff]  ;;  %v745_v10 = vmul.f32 %v8319_v54, %v8320_v46  ;;  %v6449_v21 = vpop.permute.xlu0 %565 }
 0x29a   :  { %v6421_v22 = vadd.f32 %v1964_v44, %v1876_v7  ;;  %v6423_v24 = vadd.f32 %v1963_v27, %v1875_v60  ;;  %v8316_v7 = vld [vmem:[#allocation134_spill] sm:$0xff]  ;;  %v1570_v12 = vmul.f32 %v8317_v35, %v558_v55  ;;  %v8318_v44 = vld [vmem:[#allocation60_spill] sm:$0xff] }
 0x29b   :  { %v1031_v11 = vpop.permute.xlu1 %1030  ;;  %v1569_v23 = vmul.f32 %v8316_v7, %v558_v55  ;;  %v744_v4 = vmul.f32 %v8319_v54, %v8318_v44  ;;  %v767_v55 = vadd.f32 %v745_v10, %v679_v42  ;;  %v8322_v7 = vld [vmem:[#allocation20_spill] sm:$0xff] }
 0x29c   :  { %8310 = vst [vmem:[#allocation70_spill] sm:$0xff] %v6421_v22  ;;  %8311 = vst [vmem:[#allocation75_spill] sm:$0xff] %v6423_v24  ;;  %2203 = vmatprep.mubr.f32.mxu1 %v6421_v22  ;;  %v1614_v15 = vadd.f32 %v1592_v14, %v1570_v12  ;;  %v1635_v35 = vmul.f32 %v8322_v7, %v8319_v54  ;;  %v8324_v14 = vld [vmem:[#allocation83_spill] sm:$0xff]  ;;  %v8327_v7 = vld [vmem:[#allocation117_spill] sm:$0xff] }
 0x29d   :  { %2204 = vmatmul.mubr.f32.gmra.mrb[8].mxu1 %v6423_v24  ;;  %v766_v63 = vadd.f32 %v744_v4, %v678_v61  ;;  %v6479_v4 = vpop.permute.xlu0 %569 }
 0x29f   :  { %v1053_v53 = vpop.permute.xlu1 %1052 }
 0x2a0   :  { %v1070_v13 = vsel %vm1064_vm4, %v1031_v11, %v1053_v53  ;;  %v1081_v60 = vsel %vm1064_vm4, %v1053_v53, %v1031_v11  ;;  %v1613_v53 = vadd.f32 %v1591_v17, %v1569_v23 }
 0x2a1   :  { %v1101_v20 = vsel %vm5778_vm6, %v1081_v60, 0.0  ;;  %v1102_v11 = vsel %vm5782_vm7, %v1070_v13, 0.0  ;;  %v8323_v60 = vld [vmem:[#allocation16_spill] sm:$0xff] }
 0x2a2   :  { %v1636_v44 = vmul.f32 %v8323_v60, %v8319_v54  ;;  %v1123_v13 = vadd.f32 %v1101_v20, %v766_v63  ;;  %v1124_v17 = vadd.f32 %v1102_v11, %v767_v55  ;;  %v1657_v10 = vadd.f32 %v1635_v35, %v1613_v53 }
 0x2a3   :  { %v1812_v16 = vpop.permute.xlu1 %1811 }
 0x2a4   :  { %v1828_v32 = vsel %vm1064_vm4, %v8321_v33, %v1812_v16  ;;  %v1839_v51 = vsel %vm1064_vm4, %v1812_v16, %v8321_v33  ;;  %v1658_v20 = vadd.f32 %v1636_v44, %v1614_v15 }
 0x2a5   :  { %v1855_v16 = vsel %vm5778_vm6, %v1839_v51, 0.0  ;;  %v1856_v23 = vsel %vm5782_vm7, %v1828_v32, 0.0 }
 0x2a6   :  { %v1877_v33 = vadd.f32 %v1855_v16, %v1657_v10  ;;  %v1878_v51 = vadd.f32 %v1856_v23, %v1658_v20  ;;  %v3745_v23 = vld [vmem:[#allocation2 + $0x68] sm:$0xff]  ;;  %v8331_v20 = vld [vmem:[#allocation123_spill] sm:$0xff] }
 0x2a7   :  { %v6443_v27 = vpop.permute.xlu1 %635 }
 0x2ab   :  { %v1146_v46 = vpop.permute.xlu1 %1145 }
 0x2ac   :  { %v1185_v61 = vsel %vm1179_vm5, %v1146_v46, %v8324_v14  ;;  %v1196_v42 = vsel %vm1179_vm5, %v8324_v14, %v1146_v46 }
 0x2ad   :  { %v1216_v12 = vsel %vm5827_vm9, %v1185_v61, 0.0  ;;  %v1217_v54 = vsel %vm5804_vm8, %v1196_v42, 0.0  ;;  %v3744_v42 = vld [vmem:[#allocation2 + $0x60] sm:$0xff] }
 0x2ae   :  { %v6481_v11 = vadd.f32 %v1217_v54, %v1124_v17  ;;  %v6483_v63 = vadd.f32 %v1216_v12, %v1123_v13  ;;  %v6503_v13 = vpop.permute.xlu0 %573  ;;  %v658_v16 = vmul.f32 %v3744_v42, %v6235_v37  ;;  %v659_v12 = vmul.f32 %v3745_v23, %v6235_v37  ;;  %v8330_v54 = vld [vmem:[#allocation137_spill] sm:$0xff]  ;;  %v3746_v42 = vld [vmem:[#allocation2 + $0x110] sm:$0xff] }
 0x2af   :  { %v1900_v55 = vpop.permute.xlu1 %1899  ;;  %v592_v10 = vmul.f32 %v6427_v29, %v8330_v54  ;;  %v1593_v23 = vmul.f32 %v3746_v42, %v6235_v37  ;;  %v3747_v54 = vld [vmem:[#allocation2 + $0x118] sm:$0xff]  ;;  %v8338_v42 = vld [vmem:[#allocation80_spill] sm:$0xff] }
 0x2b0   :  { %8325 = vst [vmem:[#allocation13_spill] sm:$0xff] %v6481_v11  ;;  %8326 = vst [vmem:[#allocation72_spill] sm:$0xff] %v6483_v63  ;;  %v1938_v32 = vsel %vm1179_vm5, %v1900_v55, %v8327_v7  ;;  %v1949_v60 = vsel %vm1179_vm5, %v8327_v7, %v1900_v55  ;;  %2088 = vmatprep.mubr.f32.mxu0 %v6481_v11  ;;  %v593_v55 = vmul.f32 %v6427_v29, %v8331_v20  ;;  %v8333_v7 = vld [vmem:[#allocation77_spill] sm:$0xff] }
 0x2b1   :  { %v1965_v53 = vsel %vm5827_vm9, %v1938_v32, 0.0  ;;  %v1966_v15 = vsel %vm5804_vm8, %v1949_v60, 0.0  ;;  %2089 = vmatmul.mubr.f32.gmra.mrb[10].mxu0 %v6483_v63  ;;  %v747_v32 = vmul.f32 %v6324_v57, %v8333_v7  ;;  %v8334_v60 = vld [vmem:[#allocation182_spill] sm:$0xff]  ;;  %v1594_v20 = vmul.f32 %v3747_v54, %v6235_v37 }
 0x2b2   :  { %v6497_v35 = vadd.f32 %v1966_v15, %v1878_v51  ;;  %v6499_v44 = vadd.f32 %v1965_v53, %v1877_v33  ;;  %v6507_v14 = vpop.permute.xlu0 %1793  ;;  %v8332_v33 = vld [vmem:[#allocation138_spill] sm:$0xff]  ;;  %v680_v22 = vadd.f32 %v658_v16, %v592_v10  ;;  %v681_v11 = vadd.f32 %v659_v12, %v593_v55 }
 0x2b3   :  { %v6501_v46 = vpop.permute.xlu1 %723  ;;  %v746_v51 = vmul.f32 %v6324_v57, %v8332_v33  ;;  %v8335_v33 = vld [vmem:[#allocation139_spill] sm:$0xff]  ;;  %v8336_v7 = vld [vmem:[#allocation10_spill] sm:$0xff]  ;;  %v1638_v43 = vmul.f32 %v8338_v42, %v6324_v57 }
 0x2b4   :  { %8328 = vst [vmem:[#allocation18_spill] sm:$0xff] %v6497_v35  ;;  %8329 = vst [vmem:[#allocation149_spill] sm:$0xff] %v6499_v44  ;;  %2208 = vmatprep.mubr.f32.mxu1 %v6497_v35  ;;  %v1571_v35 = vmul.f32 %v8335_v33, %v6427_v29  ;;  %v1572_v24 = vmul.f32 %v8336_v7, %v6427_v29  ;;  %v769_v50 = vadd.f32 %v747_v32, %v681_v11 }
 0x2b5   :  { %2209 = vmatmul.mubr.f32.gmra.mrb[10].mxu1 %v6499_v44  ;;  %v768_v33 = vadd.f32 %v746_v51, %v680_v22 }
 0x2b6   :  { %v6533_v63 = vpop.permute.xlu0 %577  ;;  %v1615_v12 = vadd.f32 %v1593_v23, %v1571_v35  ;;  %v1616_v10 = vadd.f32 %v1594_v20, %v1572_v24 }
 0x2b7   :  { %v1055_v17 = vpop.permute.xlu1 %1054 }
 0x2b8   :  { %v1071_v53 = vsel %vm1064_vm4, %v8334_v60, %v1055_v17  ;;  %v1082_v15 = vsel %vm1064_vm4, %v1055_v17, %v8334_v60  ;;  %v8337_v17 = vld [vmem:[#allocation17_spill] sm:$0xff] }
 0x2b9   :  { %v1637_v60 = vmul.f32 %v8337_v17, %v6324_v57  ;;  %v1103_v37 = vsel %vm5778_vm6, %v1082_v15, 0.0  ;;  %v1104_v54 = vsel %vm5782_vm7, %v1071_v53, 0.0  ;;  %v8340_v17 = vld [vmem:[#allocation58_spill] sm:$0xff] }
 0x2ba   :  { %v1125_v57 = vadd.f32 %v1103_v37, %v768_v33  ;;  %v1126_v7 = vadd.f32 %v1104_v54, %v769_v50  ;;  %v1172_v24 = vpop.permute.xlu0 %1171  ;;  %v8343_v37 = vld [vmem:[#allocation133_spill] sm:$0xff] }
 0x2bb   :  { %v1814_v61 = vpop.permute.xlu1 %1813  ;;  %v1659_v35 = vadd.f32 %v1637_v60, %v1615_v12 }
 0x2bc   :  { %v1829_v29 = vsel %vm1064_vm4, %v8339_v36, %v1814_v61  ;;  %v1840_v16 = vsel %vm1064_vm4, %v1814_v61, %v8339_v36  ;;  %v1660_v61 = vadd.f32 %v1638_v43, %v1616_v10 }
 0x2bd   :  { %v1857_v11 = vsel %vm5778_vm6, %v1840_v16, 0.0  ;;  %v1858_v51 = vsel %vm5782_vm7, %v1829_v29, 0.0 }
 0x2be   :  { %v1879_v20 = vadd.f32 %v1857_v11, %v1659_v35  ;;  %v1880_v42 = vadd.f32 %v1858_v51, %v1660_v61  ;;  %v1926_v10 = vpop.permute.xlu0 %1925  ;;  %v594_v51 = vmul.f32 %v6449_v21, %v5728_v1  ;;  %v3750_v35 = vld [vmem:[#allocation2 + $0x120] sm:$0xff]  ;;  %v1573_v1 = vmul.f32 %v8209_v3, %v6449_v21 }
 0x2bf   :  { %v6527_v44 = vpop.permute.xlu1 %639  ;;  %v1595_v61 = vmul.f32 %v3750_v35, %v6371_v5 }
 0x2c1   :  { %v1617_v3 = vadd.f32 %v1595_v61, %v1573_v1 }
 0x2c3   :  { %v1170_v55 = vpop.permute.xlu1 %1169 }
 0x2c4   :  { %v1186_v15 = vsel %vm1179_vm5, %v8340_v17, %v1170_v55  ;;  %v1197_v22 = vsel %vm1179_vm5, %v1170_v55, %v8340_v17 }
 0x2c5   :  { %v1218_v36 = vsel %vm5827_vm9, %v1186_v15, 0.0  ;;  %v1219_v50 = vsel %vm5804_vm8, %v1197_v22, 0.0  ;;  %v3749_v15 = vld [vmem:[#allocation2 + $0x78] sm:$0xff] }
 0x2c6   :  { %v6563_v32 = vadd.f32 %v1219_v50, %v1126_v7  ;;  %v6565_v53 = vadd.f32 %v1218_v36, %v1125_v57  ;;  %v6585_v57 = vpop.permute.xlu0 %1036  ;;  %v3748_v7 = vld [vmem:[#allocation2 + $0x70] sm:$0xff]  ;;  %v661_v22 = vmul.f32 %v3749_v15, %v6371_v5  ;;  %v8346_v36 = vld [vmem:[#allocation36_spill] sm:$0xff] }
 0x2c7   :  { %v1924_v23 = vpop.permute.xlu1 %1923  ;;  %v660_v17 = vmul.f32 %v3748_v7, %v6371_v5  ;;  %v595_v50 = vmul.f32 %v6449_v21, %v8346_v36 }
 0x2c8   :  { %8341 = vst [vmem:[#allocation84_spill] sm:$0xff] %v6563_v32  ;;  %8342 = vst [vmem:[#allocation32_spill] sm:$0xff] %v6565_v53  ;;  %v1939_v54 = vsel %vm1179_vm5, %v8343_v37, %v1924_v23  ;;  %v1950_v33 = vsel %vm1179_vm5, %v1924_v23, %v8343_v37  ;;  %2093 = vmatprep.mubr.f32.mxu0 %v6563_v32  ;;  %v3751_v23 = vld [vmem:[#allocation2 + $0x128] sm:$0xff] }
 0x2c9   :  { %v1967_v43 = vsel %vm5827_vm9, %v1939_v54, 0.0  ;;  %v1968_v60 = vsel %vm5804_vm8, %v1950_v33, 0.0  ;;  %2094 = vmatmul.mubr.f32.gmra.mrb[12].mxu0 %v6565_v53  ;;  %v683_v37 = vadd.f32 %v661_v22, %v595_v50  ;;  %v8349_v22 = vld [vmem:[#allocation40_spill] sm:$0xff] }
 0x2ca   :  { %v6579_v29 = vadd.f32 %v1968_v60, %v1880_v42  ;;  %v6581_v16 = vadd.f32 %v1967_v43, %v1879_v20  ;;  %v1596_v20 = vmul.f32 %v3751_v23, %v6371_v5  ;;  %v682_v42 = vadd.f32 %v660_v17, %v594_v51  ;;  %v8347_v43 = vld [vmem:[#allocation47_spill] sm:$0xff]  ;;  %v6603_v7 = vpop.permute.xlu0 %1795  ;;  %v8348_v5 = vld [vmem:[#allocation116_spill] sm:$0xff] }
 0x2cb   :  { %v1035_v12 = vpop.permute.xlu1 %1034  ;;  %v1574_v60 = vmul.f32 %v8347_v43, %v6449_v21  ;;  %v748_v17 = vmul.f32 %v8348_v5, %v5747_v48  ;;  %v749_v51 = vmul.f32 %v8348_v5, %v8349_v22  ;;  %v1639_v23 = vmul.f32 %v8216_v45, %v8348_v5 }
 0x2cc   :  { %8344 = vst [vmem:[#allocation76_spill] sm:$0xff] %v6579_v29  ;;  %8345 = vst [vmem:[#allocation42_spill] sm:$0xff] %v6581_v16  ;;  %2213 = vmatprep.mubr.f32.mxu1 %v6579_v29 }
 0x2cd   :  { %2214 = vmatmul.mubr.f32.gmra.mrb[12].mxu1 %v6581_v16  ;;  %v770_v50 = vadd.f32 %v748_v17, %v682_v42  ;;  %v771_v21 = vadd.f32 %v749_v51, %v683_v37 }
 0x2ce   :  { %v1152_v37 = vpop.permute.xlu0 %1151 }
 0x2cf   :  { %v1057_v55 = vpop.permute.xlu1 %1056 }
 0x2d0   :  { %v1072_v54 = vsel %vm1064_vm4, %v1035_v12, %v1057_v55  ;;  %v1083_v33 = vsel %vm1064_vm4, %v1057_v55, %v1035_v12  ;;  %v1618_v55 = vadd.f32 %v1596_v20, %v1574_v60 }
 0x2d1   :  { %v1105_v36 = vsel %vm5778_vm6, %v1083_v33, 0.0  ;;  %v1106_v12 = vsel %vm5782_vm7, %v1072_v54, 0.0  ;;  %v1640_v33 = vmul.f32 %v8201_v18, %v8348_v5 }
 0x2d2   :  { %v1127_v54 = vadd.f32 %v1105_v36, %v770_v50  ;;  %v1128_v61 = vadd.f32 %v1106_v12, %v771_v21 }
 0x2d3   :  { %v1816_v11 = vpop.permute.xlu1 %1815  ;;  %v1662_v60 = vadd.f32 %v1640_v33, %v1618_v55 }
 0x2d4   :  { %v1830_v35 = vsel %vm1064_vm4, %v6507_v14, %v1816_v11  ;;  %v1841_v48 = vsel %vm1064_vm4, %v1816_v11, %v6507_v14  ;;  %v1661_v11 = vadd.f32 %v1639_v23, %v1617_v3  ;;  %v3752_v23 = vld [vmem:[#allocation2 + $0x80] sm:$0xff] }
 0x2d5   :  { %v1859_v1 = vsel %vm5778_vm6, %v1841_v48, 0.0  ;;  %v1860_v14 = vsel %vm5782_vm7, %v1830_v35, 0.0  ;;  %v1906_v35 = vpop.permute.xlu0 %1905  ;;  %v662_v33 = vmul.f32 %v3752_v23, %v6443_v27 }
 0x2d6   :  { %v1881_v22 = vadd.f32 %v1859_v1, %v1661_v11  ;;  %v1882_v51 = vadd.f32 %v1860_v14, %v1662_v60  ;;  %v8355_v1 = vld [vmem:[#allocation45_spill] sm:$0xff]  ;;  %v3753_v11 = vld [vmem:[#allocation2 + $0x130] sm:$0xff] }
 0x2d7   :  { %v6605_v15 = vpop.permute.xlu1 %643  ;;  %v750_v14 = vmul.f32 %v6501_v46, %v8355_v1  ;;  %v1597_v60 = vmul.f32 %v3753_v11, %v6443_v27 }
 0x2db   :  { %v1150_v43 = vpop.permute.xlu1 %1149 }
 0x2dc   :  { %v1187_v20 = vsel %vm1179_vm5, %v1150_v43, %v1172_v24  ;;  %v1198_v42 = vsel %vm1179_vm5, %v1172_v24, %v1150_v43  ;;  %v663_v43 = vmul.f32 %v5991_v58, %v6443_v27 }
 0x2dd   :  { %v1220_v45 = vsel %vm5827_vm9, %v1187_v20, 0.0  ;;  %v1221_v18 = vsel %vm5804_vm8, %v1198_v42, 0.0  ;;  %v597_v20 = vmul.f32 %v6479_v4, %v6000_v2  ;;  %v6666_v42 = vpop.permute.xlu0 %1038  ;;  %v1598_v2 = vmul.f32 %v6110_v38, %v6443_v27 }
 0x2de   :  { %v6637_v5 = vadd.f32 %v1220_v45, %v1127_v54  ;;  %v6639_v17 = vadd.f32 %v1221_v18, %v1128_v61  ;;  %v8354_v54 = vld [vmem:[#allocation79_spill] sm:$0xff]  ;;  %v751_v45 = vmul.f32 %v6501_v46, %v6057_v56  ;;  %v1576_v56 = vmul.f32 %v6048_v39, %v6479_v4 }
 0x2df   :  { %v1904_v24 = vpop.permute.xlu1 %1903  ;;  %v596_v61 = vmul.f32 %v6479_v4, %v8354_v54  ;;  %v1642_v38 = vmul.f32 %v6085_v52, %v6501_v46 }
 0x2e0   :  { %8350 = vst [vmem:[#allocation136_spill] sm:$0xff] %v6637_v5  ;;  %8351 = vst [vmem:[#allocation82_spill] sm:$0xff] %v6639_v17  ;;  %v1940_v36 = vsel %vm1179_vm5, %v1904_v24, %v1926_v10  ;;  %v1951_v12 = vsel %vm1179_vm5, %v1926_v10, %v1904_v24  ;;  %2098 = vmatprep.mubr.f32.mxu0 %v6639_v17  ;;  %v1620_v54 = vadd.f32 %v1598_v2, %v1576_v56 }
 0x2e1   :  { %v1969_v50 = vsel %vm5827_vm9, %v1940_v36, 0.0  ;;  %v1970_v3 = vsel %vm5804_vm8, %v1951_v12, 0.0  ;;  %2099 = vmatmul.mubr.f32.gmra.mrb[14].mxu0 %v6637_v5  ;;  %v684_v36 = vadd.f32 %v662_v33, %v596_v61  ;;  %v685_v12 = vadd.f32 %v663_v43, %v597_v20  ;;  %v1798_v33 = vpop.permute.xlu0 %1797 }
 0x2e2   :  { %v6651_v55 = vadd.f32 %v1969_v50, %v1881_v22  ;;  %v6653_v21 = vadd.f32 %v1970_v3, %v1882_v51  ;;  %v8356_v22 = vld [vmem:[#allocation110_spill] sm:$0xff]  ;;  %v8357_v3 = vld [vmem:[#allocation167_spill] sm:$0xff]  ;;  %v1664_v11 = vadd.f32 %v1642_v38, %v1620_v54 }
 0x2e3   :  { %v6655_v48 = vpop.permute.xlu1 %731  ;;  %v1575_v51 = vmul.f32 %v8356_v22, %v6479_v4  ;;  %v772_v27 = vadd.f32 %v750_v14, %v684_v36  ;;  %v773_v23 = vadd.f32 %v751_v45, %v685_v12 }
 0x2e4   :  { %8352 = vst [vmem:[#allocation148_spill] sm:$0xff] %v6651_v55  ;;  %8353 = vst [vmem:[#allocation24_spill] sm:$0xff] %v6653_v21  ;;  %2218 = vmatprep.mubr.f32.mxu1 %v6653_v21 }
 0x2e5   :  { %2219 = vmatmul.mubr.f32.gmra.mrb[14].mxu1 %v6651_v55  ;;  %v1619_v43 = vadd.f32 %v1597_v60, %v1575_v51  ;;  %v1154_v36 = vpop.permute.xlu0 %1153 }
 0x2e7   :  { %v1059_v10 = vpop.permute.xlu1 %1058 }
 0x2e8   :  { %v1073_v18 = vsel %vm1064_vm4, %v6585_v57, %v1059_v10  ;;  %v1084_v58 = vsel %vm1064_vm4, %v1059_v10, %v6585_v57  ;;  %v1641_v10 = vmul.f32 %v8357_v3, %v6501_v46 }
 0x2e9   :  { %v1107_v50 = vsel %vm5778_vm6, %v1084_v58, 0.0  ;;  %v1108_v57 = vsel %vm5782_vm7, %v1073_v18, 0.0 }
 0x2ea   :  { %v1129_v20 = vadd.f32 %v1107_v50, %v772_v27  ;;  %v1130_v1 = vadd.f32 %v1108_v57, %v773_v23  ;;  %v1663_v58 = vadd.f32 %v1641_v10, %v1619_v43  ;;  %v3754_v57 = vld [vmem:[#allocation2 + $0x90] sm:$0xff]  ;;  %v665_v10 = vmul.f32 %v6191_v62, %v6527_v44  ;;  %v8362_v23 = vld [vmem:[#allocation53_spill] sm:$0xff]  ;;  %v3755_v43 = vld [vmem:[#allocation2 + $0x140] sm:$0xff] }
 0x2eb   :  { %v1818_v24 = vpop.permute.xlu1 %1817  ;;  %v664_v3 = vmul.f32 %v3754_v57, %v6527_v44  ;;  %v1599_v54 = vmul.f32 %v3755_v43, %v6527_v44 }
 0x2ec   :  { %v1831_v39 = vsel %vm1064_vm4, %v6603_v7, %v1818_v24  ;;  %v1842_v4 = vsel %vm1064_vm4, %v1818_v24, %v6603_v7 }
 0x2ed   :  { %v1861_v46 = vsel %vm5778_vm6, %v1842_v4, 0.0  ;;  %v1862_v14 = vsel %vm5782_vm7, %v1831_v39, 0.0  ;;  %v598_v39 = vmul.f32 %v6503_v13, %v8362_v23  ;;  %v599_v4 = vmul.f32 %v6503_v13, %v6158_v26 }
 0x2ee   :  { %v1884_v22 = vadd.f32 %v1862_v14, %v1664_v11  ;;  %v1908_v14 = vpop.permute.xlu0 %1907 }
 0x2ef   :  { %v1174_v61 = vpop.permute.xlu1 %1173  ;;  %v686_v62 = vadd.f32 %v664_v3, %v598_v39 }
 0x2f0   :  { %v1188_v18 = vsel %vm1179_vm5, %v1152_v37, %v1174_v61  ;;  %v1199_v52 = vsel %vm1179_vm5, %v1174_v61, %v1152_v37  ;;  %v1883_v37 = vadd.f32 %v1861_v46, %v1663_v58  ;;  %v1600_v61 = vmul.f32 %v6200_v30, %v6527_v44  ;;  %v8364_v44 = vld [vmem:[#allocation55_spill] sm:$0xff] }
 0x2f1   :  { %v1222_v7 = vsel %vm5827_vm9, %v1188_v18, 0.0  ;;  %v1223_v45 = vsel %vm5804_vm8, %v1199_v52, 0.0  ;;  %v8363_v18 = vld [vmem:[#allocation63_spill] sm:$0xff]  ;;  %v1578_v46 = vmul.f32 %v6182_v0, %v6503_v13 }
 0x2f2   :  { %v6711_v60 = vadd.f32 %v1222_v7, %v1129_v20  ;;  %v6713_v2 = vadd.f32 %v1223_v45, %v1130_v1  ;;  %v687_v20 = vadd.f32 %v665_v10, %v599_v4  ;;  %v1577_v52 = vmul.f32 %v8363_v18, %v6503_v13  ;;  %v8365_v7 = vld [vmem:[#allocation98_spill] sm:$0xff]  ;;  %v1041_v23 = vpop.permute.xlu0 %1040 }
 0x2f3   :  { %v1928_v24 = vpop.permute.xlu1 %1927  ;;  %v752_v45 = vmul.f32 %v8365_v7, %v8364_v44  ;;  %v753_v58 = vmul.f32 %v8365_v7, %v6174_v6  ;;  %v1644_v6 = vmul.f32 %v6216_v49, %v8365_v7 }
 0x2f4   :  { %8358 = vst [vmem:[#allocation144_spill] sm:$0xff] %v6711_v60  ;;  %8359 = vst [vmem:[#allocation103_spill] sm:$0xff] %v6713_v2  ;;  %v1941_v51 = vsel %vm1179_vm5, %v1906_v35, %v1928_v24  ;;  %v1952_v56 = vsel %vm1179_vm5, %v1928_v24, %v1906_v35  ;;  %2103 = vmatprep.mubr.f32.mxu0 %v6713_v2  ;;  %v1621_v24 = vadd.f32 %v1599_v54, %v1577_v52 }
 0x2f5   :  { %v1971_v12 = vsel %vm5827_vm9, %v1941_v51, 0.0  ;;  %v1972_v50 = vsel %vm5804_vm8, %v1952_v56, 0.0  ;;  %2104 = vmatmul.mubr.f32.gmra.mrb[16].mxu0 %v6711_v60  ;;  %v775_v51 = vadd.f32 %v753_v58, %v687_v20  ;;  %v8366_v56 = vld [vmem:[#allocation177_spill] sm:$0xff]  ;;  %v3756_v58 = vld [vmem:[#allocation2 + $0xa0] sm:$0xff] }
 0x2f6   :  { %v6728_v38 = vadd.f32 %v1971_v12, %v1883_v37  ;;  %v6730_v35 = vadd.f32 %v1972_v50, %v1884_v22  ;;  %v1622_v37 = vadd.f32 %v1600_v61, %v1578_v46  ;;  %v774_v22 = vadd.f32 %v752_v45, %v686_v62 }
 0x2f7   :  { %v1061_v27 = vpop.permute.xlu1 %1060  ;;  %v1643_v12 = vmul.f32 %v8366_v56, %v8365_v7  ;;  %v1800_v7 = vpop.permute.xlu0 %1799  ;;  %v3757_v56 = vld [vmem:[#allocation2 + $0x150] sm:$0xff] }
 0x2f8   :  { %8360 = vst [vmem:[#allocation101_spill] sm:$0xff] %v6728_v38  ;;  %8361 = vst [vmem:[#allocation30_spill] sm:$0xff] %v6730_v35  ;;  %2223 = vmatprep.mubr.f32.mxu1 %v6730_v35  ;;  %v1074_v1 = vsel %vm1064_vm4, %v6666_v42, %v1061_v27  ;;  %v1085_v26 = vsel %vm1064_vm4, %v1061_v27, %v6666_v42  ;;  %v1666_v54 = vadd.f32 %v1644_v6, %v1622_v37 }
 0x2f9   :  { %2224 = vmatmul.mubr.f32.gmra.mrb[16].mxu1 %v6728_v38  ;;  %v1109_v11 = vsel %vm5778_vm6, %v1085_v26, 0.0  ;;  %v1110_v42 = vsel %vm5782_vm7, %v1074_v1, 0.0  ;;  %v1665_v43 = vadd.f32 %v1643_v12, %v1621_v24  ;;  %v601_v37 = vmul.f32 %v6533_v63, %v6258_v47 }
 0x2fa   :  { %v1131_v57 = vadd.f32 %v1109_v11, %v774_v22  ;;  %v1132_v3 = vadd.f32 %v1110_v42, %v775_v51  ;;  %v666_v11 = vmul.f32 %v3756_v58, %v6605_v15  ;;  %v8371_v42 = vld [vmem:[#allocation96_spill] sm:$0xff]  ;;  %v8372_v22 = vld [vmem:[#allocation178_spill] sm:$0xff]  ;;  %v1601_v12 = vmul.f32 %v3757_v56, %v6605_v15 }
 0x2fb   :  { %v1820_v30 = vpop.permute.xlu1 %1819  ;;  %v600_v24 = vmul.f32 %v6533_v63, %v8371_v42  ;;  %v754_v51 = vmul.f32 %v6655_v48, %v8372_v22  ;;  %v1602_v47 = vmul.f32 %v6335_v59, %v6605_v15 }
 0x2fc   :  { %v1832_v0 = vsel %vm1064_vm4, %v1798_v33, %v1820_v30  ;;  %v1843_v13 = vsel %vm1064_vm4, %v1820_v30, %v1798_v33 }
 0x2fd   :  { %v1863_v39 = vsel %vm5778_vm6, %v1843_v13, 0.0  ;;  %v1864_v33 = vsel %vm5782_vm7, %v1832_v0, 0.0  ;;  %v755_v0 = vmul.f32 %v6655_v48, %v6287_v25  ;;  %v688_v25 = vadd.f32 %v666_v11, %v600_v24  ;;  %v8377_v24 = vld [vmem:[#allocation8_spill] sm:$0xff] }
 0x2fe   :  { %v1885_v20 = vadd.f32 %v1863_v39, %v1665_v43  ;;  %v1886_v1 = vadd.f32 %v1864_v33, %v1666_v54  ;;  %v8374_v39 = vld [vmem:[#allocation181_spill] sm:$0xff]  ;;  %v2240_v8 = vmul.f32 %v8377_v24, %v8377_v24 }
 0x2ff   :  { %v1176_v50 = vpop.permute.xlu1 %1175  ;;  %v1645_v33 = vmul.f32 %v8374_v39, %v6655_v48  ;;  %v8386_v39 = vld [vmem:[#allocation119_spill] sm:$0xff] }
 0x300   :  { %v1189_v10 = vsel %vm1179_vm5, %v1154_v36, %v1176_v50  ;;  %v1200_v27 = vsel %vm1179_vm5, %v1176_v50, %v1154_v36  ;;  %v8373_v50 = vld [vmem:[#allocation179_spill] sm:$0xff] }
 0x301   :  { %v1224_v4 = vsel %vm5827_vm9, %v1189_v10, 0.0  ;;  %v1225_v49 = vsel %vm5804_vm8, %v1200_v27, 0.0  ;;  %v1156_v27 = vpop.permute.xlu0 %1155 }
 0x302   :  { %v6779_v61 = vadd.f32 %v1224_v4, %v1131_v57  ;;  %v6781_v62 = vadd.f32 %v1225_v49, %v1132_v3  ;;  %v1579_v57 = vmul.f32 %v8373_v50, %v6533_v63  ;;  %v1580_v3 = vmul.f32 %v6312_v31, %v6533_v63 }
 0x303   :  { %v1930_v36 = vpop.permute.xlu1 %1929  ;;  %v2242_v50 = vmul.f32 %v8382_v9, %v8382_v9 }
 0x304   :  { %8367 = vst [vmem:[#allocation152_spill] sm:$0xff] %v6779_v61  ;;  %8368 = vst [vmem:[#allocation107_spill] sm:$0xff] %v6781_v62  ;;  %v1942_v26 = vsel %vm1179_vm5, %v1908_v14, %v1930_v36  ;;  %v1953_v18 = vsel %vm1179_vm5, %v1930_v36, %v1908_v14  ;;  %2108 = vmatprep.mubr.f32.mxu0 %v6781_v62  ;;  %v667_v14 = vmul.f32 %v6318_v41, %v6605_v15 }
 0x305   :  { %v1973_v52 = vsel %vm5827_vm9, %v1942_v26, 0.0  ;;  %v1974_v46 = vsel %vm5804_vm8, %v1953_v18, 0.0  ;;  %2109 = vmatmul.mubr.f32.gmra.mrb[18].mxu0 %v6779_v61  ;;  %v776_v15 = vadd.f32 %v754_v51, %v688_v25  ;;  %v1623_v43 = vadd.f32 %v1601_v12, %v1579_v57  ;;  %v8380_v12 = vld [vmem:[#allocation108_spill] sm:$0xff] }
 0x306   :  { %v6793_v30 = vadd.f32 %v1973_v52, %v1885_v20  ;;  %v6795_v44 = vadd.f32 %v1974_v46, %v1886_v1  ;;  %v689_v10 = vadd.f32 %v667_v14, %v601_v37  ;;  %v1624_v54 = vadd.f32 %v1602_v47, %v1580_v3  ;;  %v1910_v14 = vpop.permute.xlu0 %1909  ;;  %v8384_v3 = vld [vmem:[#allocation142_spill] sm:$0xff] }
 0x307   :  { %v1063_v45 = vpop.permute.xlu1 %1062  ;;  %v2239_v47 = vmul.f32 %v8380_v12, %v8380_v12  ;;  %v2241_v57 = vmul.f32 %v8383_v19, %v8383_v19  ;;  %v2243_v25 = vmul.f32 %v8384_v3, %v8384_v3 }
 0x308   :  { %8369 = vst [vmem:[#allocation51_spill] sm:$0xff] %v6793_v30  ;;  %8370 = vst [vmem:[#allocation91_spill] sm:$0xff] %v6795_v44  ;;  %2228 = vmatprep.mubr.f32.mxu1 %v6795_v44  ;;  %v1075_v13 = vsel %vm1064_vm4, %v1041_v23, %v1063_v45  ;;  %v1086_v41 = vsel %vm1064_vm4, %v1063_v45, %v1041_v23  ;;  %v1646_v23 = vmul.f32 %v6328_v40, %v6655_v48 }
 0x309   :  { %2229 = vmatmul.mubr.f32.gmra.mrb[18].mxu1 %v6793_v30  ;;  %v1111_v4 = vsel %vm5778_vm6, %v1086_v41, 0.0  ;;  %v1112_v59 = vsel %vm5782_vm7, %v1075_v13, 0.0  ;;  %v777_v49 = vadd.f32 %v755_v0, %v689_v10  ;;  %v8385_v10 = vld [vmem:[#allocation160_spill] sm:$0xff] }
 0x30a   :  { %v1133_v20 = vadd.f32 %v1111_v4, %v776_v15  ;;  %v1668_v45 = vadd.f32 %v1646_v23, %v1624_v54  ;;  %v8387_v23 = vld [vmem:[#allocation164_spill] sm:$0xff] }
 0x30b   :  { %v1822_v6 = vpop.permute.xlu1 %1821  ;;  %v1134_v1 = vadd.f32 %v1112_v59, %v777_v49  ;;  %v2247_v4 = vmul.f32 %v8387_v23, %v8387_v23  ;;  %v8388_v59 = vld [vmem:[#allocation89_spill] sm:$0xff]  ;;  %v8389_v49 = vld [vmem:[#allocation151_spill] sm:$0xff] }
 0x30c   :  { %v1833_v31 = vsel %vm1064_vm4, %v1800_v7, %v1822_v6  ;;  %v1844_v63 = vsel %vm1064_vm4, %v1822_v6, %v1800_v7  ;;  %v1667_v7 = vadd.f32 %v1645_v33, %v1623_v43  ;;  %v2244_v6 = vmul.f32 %v8381_v28, %v8381_v28 }
 0x30d   :  { %v1865_v26 = vsel %vm5778_vm6, %v1844_v63, 0.0  ;;  %v1866_v18 = vsel %vm5782_vm7, %v1833_v31, 0.0  ;;  %v2246_v33 = vmul.f32 %v8386_v39, %v8386_v39  ;;  %v2245_v15 = vmul.f32 %v8388_v59, %v8388_v59  ;;  %v8390_v63 = vld [vmem:[#allocation120_spill] sm:$0xff] }
 0x30e   :  { %v1887_v37 = vadd.f32 %v1865_v26, %v1667_v7  ;;  %v1888_v34 = vadd.f32 %v1866_v18, %v1668_v45  ;;  %v2252_v31 = vmul.f32 %v8389_v49, %v8389_v49  ;;  %v2250_v43 = vmul.f32 %v8390_v63, %v8390_v63  ;;  %v8392_v26 = vld [vmem:[#allocation19_spill] sm:$0xff] }
 0x30f   :  { %v1178_v36 = vpop.permute.xlu1 %1177  ;;  %v2249_v18 = vmul.f32 %v8392_v26, %v8392_v26  ;;  %v8393_v7 = vld [vmem:[#allocation143_spill] sm:$0xff] }
 0x310   :  { %v1190_v40 = vsel %vm1179_vm5, %v1156_v27, %v1178_v36  ;;  %v1201_v48 = vsel %vm1179_vm5, %v1178_v36, %v1156_v27  ;;  %v2248_v27 = vmul.f32 %v8385_v10, %v8385_v10  ;;  %v2256_v45 = vmul.f32 %v8393_v7, %v8393_v7 }
 0x311   :  { %v1226_v52 = vsel %vm5827_vm9, %v1190_v40, 0.0  ;;  %v1227_v46 = vsel %vm5804_vm8, %v1201_v48, 0.0  ;;  %v8391_v40 = vld [vmem:[#allocation105_spill] sm:$0xff] }
 0x312   :  { %v6845_v58 = vadd.f32 %v1226_v52, %v1133_v20  ;;  %v6847_v11 = vadd.f32 %v1227_v46, %v1134_v1  ;;  %v2251_v48 = vmul.f32 %v8391_v40, %v8391_v40 }
 0x313   :  { %v1932_v42 = vpop.permute.xlu1 %1931 }
 0x314   :  { %8375 = vst [vmem:[#allocation161_spill] sm:$0xff] %v6845_v58  ;;  %8376 = vst [vmem:[#allocation159_spill] sm:$0xff] %v6847_v11  ;;  %v1943_v22 = vsel %vm1179_vm5, %v1910_v14, %v1932_v42  ;;  %v1954_v51 = vsel %vm1179_vm5, %v1932_v42, %v1910_v14  ;;  %2113 = vmatprep.mubr.f32.mxu0 %v6847_v11  ;;  %v8394_v14 = vld [vmem:[#allocation104_spill] sm:$0xff] }
 0x315   :  { %v1975_v0 = vsel %vm5827_vm9, %v1943_v22, 0.0  ;;  %v1976_v13 = vsel %vm5804_vm8, %v1954_v51, 0.0  ;;  %2114 = vmatmul.mubr.f32.gmra.mrb[20].mxu0 %v6845_v58  ;;  %v2254_v42 = vmul.f32 %v8394_v14, %v8394_v14  ;;  %v8396_v22 = vld [vmem:[#allocation109_spill] sm:$0xff] }
 0x316   :  { %v6861_v41 = vadd.f32 %v1975_v0, %v1887_v37  ;;  %v6863_v56 = vadd.f32 %v1976_v13, %v1888_v34  ;;  %2347 = vmatprep.mubr.f32.mxu0 %v2240_v8  ;;  %v8395_v37 = vld [vmem:[#allocation145_spill] sm:$0xff]  ;;  %v2253_v51 = vmul.f32 %v8396_v22, %v8396_v22 }
 0x317   :  { %v2255_v34 = vmul.f32 %v8395_v37, %v8395_v37  ;;  %v8397_v13 = vld [vmem:[#allocation13_spill] sm:$0xff] }
 0x318   :  { %8378 = vst [vmem:[#allocation127_spill] sm:$0xff] %v6861_v41  ;;  %8379 = vst [vmem:[#allocation28_spill] sm:$0xff] %v6863_v56  ;;  %2233 = vmatprep.mubr.f32.mxu1 %v6863_v56 }
 0x319   :  { %2234 = vmatmul.mubr.f32.gmra.mrb[20].mxu1 %v6861_v41  ;;  %2348 = vmatmul.mubr.f32.vlgmr.msra.gmra.mrb[22].mxu0 %v2239_v47  ;;  %v2260_v47 = vmul.f32 %v8397_v13, %v8397_v13 }
 0x31a   :  { %2352 = vmatprep.mubr.f32.mxu0 %v2244_v6  ;;  %2467 = vmatprep.mubr.f32.mxu1 %v2242_v50  ;;  %v8398_v6 = vld [vmem:[#allocation70_spill] sm:$0xff] }
 0x31b   :  { %v2258_v50 = vmul.f32 %v8398_v6, %v8398_v6 }
 0x31d   :  { %2353 = vmatmul.mubr.f32.gmra.mrb[24].mxu0 %v2243_v25  ;;  %2468 = vmatmul.mubr.f32.vlgmr.msra.gmra.mrb[22].mxu1 %v2241_v57 }
 0x31e   :  { %2357 = vmatprep.mubr.f32.mxu0 %v2248_v27  ;;  %2472 = vmatprep.mubr.f32.mxu1 %v2246_v33 }
 0x321   :  { %2358 = vmatmul.mubr.f32.gmra.mrb[26].mxu0 %v2247_v4  ;;  %2473 = vmatmul.mubr.f32.gmra.mrb[24].mxu1 %v2245_v15  ;;  %v8399_v4 = vld [vmem:[#allocation72_spill] sm:$0xff] }
 0x322   :  { %v3232_v54 = vpop.f32.mrb[0].mxu0  ;;  %v3297_v36 = vpop.f32.mrb[0].mxu1  ;;  %2362 = vmatprep.mubr.f32.mxu0 %v2252_v31  ;;  %2477 = vmatprep.mubr.f32.mxu1 %v2250_v43  ;;  %v2259_v15 = vmul.f32 %v8399_v4, %v8399_v4  ;;  %v8400_v31 = vld [vmem:[#allocation75_spill] sm:$0xff] }
 0x323   :  { %v3233_v20 = vpop.f32.mrb[1].mxu0  ;;  %v3298_v1 = vpop.f32.mrb[1].mxu1  ;;  %v2257_v43 = vmul.f32 %v8400_v31, %v8400_v31 }
 0x324   :  { %v3234_v52 = vadd.f32 %v3233_v20, %v3232_v54  ;;  %v3299_v46 = vadd.f32 %v3298_v1, %v3297_v36  ;;  %v2264_v36 = vmul.f32 %v6563_v32, %v6563_v32  ;;  %v8401_v20 = vld [vmem:[#allocation18_spill] sm:$0xff] }
 0x325   :  { %2363 = vmatmul.mubr.f32.gmra.mrb[28].mxu0 %v2251_v48  ;;  %2478 = vmatmul.mubr.f32.gmra.mrb[26].mxu1 %v2249_v18  ;;  %v2262_v1 = vmul.f32 %v8401_v20, %v8401_v20  ;;  %v2263_v18 = vmul.f32 %v6565_v53, %v6565_v53 }
 0x326   :  { %v6897_v8 = vadd.f32 %v3299_v46, %v3234_v52  ;;  %2367 = vmatprep.mubr.f32.mxu0 %v2256_v45  ;;  %2482 = vmatprep.mubr.f32.mxu1 %v2254_v42  ;;  %v8402_v52 = vld [vmem:[#allocation149_spill] sm:$0xff]  ;;  %v2268_v45 = vmul.f32 %v6639_v17, %v6639_v17  ;;  %v2266_v42 = vmul.f32 %v6579_v29, %v6579_v29  ;;  %v7137_v17 = vld [vmem:[%s7298_s1 + $0x50] sm:$0xff] }
 0x327   :  { %v2261_v46 = vmul.f32 %v8402_v52, %v8402_v52 }
 0x328   :  { %v3235_v0 = vpop.f32.mrb[2].mxu0 }
 0x329   :  { %v3236_v57 = vpop.f32.mrb[3].mxu0  ;;  %2368 = vmatmul.mubr.f32.gmra.mrb[30].mxu0 %v2255_v34  ;;  %2483 = vmatmul.mubr.f32.gmra.mrb[28].mxu1 %v2253_v51  ;;  %v2267_v34 = vmul.f32 %v6637_v5, %v6637_v5  ;;  %v2265_v51 = vmul.f32 %v6581_v16, %v6581_v16 }
 0x32a   :  { %v3237_v25 = vadd.f32 %v3236_v57, %v3235_v0  ;;  %v3300_v27 = vpop.f32.mrb[2].mxu1  ;;  %2372 = vmatprep.mubr.f32.mxu0 %v2260_v47  ;;  %2487 = vmatprep.mubr.f32.mxu1 %v2258_v50  ;;  %v2272_v0 = vmul.f32 %v6713_v2, %v6713_v2  ;;  %v2270_v47 = vmul.f32 %v6653_v21, %v6653_v21 }
 0x32b   :  { %v3301_v33 = vpop.f32.mrb[3].mxu1  ;;  %v2271_v50 = vmul.f32 %v6711_v60, %v6711_v60  ;;  %v2269_v57 = vmul.f32 %v6651_v55, %v6651_v55 }
 0x32c   :  { %v3302_v54 = vadd.f32 %v3301_v33, %v3300_v27  ;;  %v2274_v27 = vmul.f32 %v6730_v35, %v6730_v35 }
 0x32d   :  { %2373 = vmatmul.mubr.f32.gmra.mrb[32].mxu0 %v2259_v15  ;;  %2488 = vmatmul.mubr.f32.gmra.mrb[30].mxu1 %v2257_v43  ;;  %v2275_v15 = vmul.f32 %v6779_v61, %v6779_v61  ;;  %v2273_v43 = vmul.f32 %v6728_v38, %v6728_v38 }
 0x32e   :  { %v6915_v48 = vadd.f32 %v3302_v54, %v3237_v25  ;;  %2377 = vmatprep.mubr.f32.mxu0 %v2264_v36  ;;  %2492 = vmatprep.mubr.f32.mxu1 %v2262_v1  ;;  %v2276_v25 = vmul.f32 %v6781_v62, %v6781_v62  ;;  %v2280_v36 = vmul.f32 %v6847_v11, %v6847_v11 }
 0x32f   :  { %v2278_v1 = vmul.f32 %v6795_v44, %v6795_v44 }
 0x331   :  { %2378 = vmatmul.mubr.f32.gmra.mrb[34].mxu0 %v2263_v18  ;;  %2493 = vmatmul.mubr.f32.gmra.mrb[32].mxu1 %v2261_v46 }
 0x332   :  { %2382 = vmatprep.mubr.f32.mxu0 %v2268_v45  ;;  %2497 = vmatprep.mubr.f32.mxu1 %v2266_v42  ;;  %v2279_v45 = vmul.f32 %v6845_v58, %v6845_v58  ;;  %v2277_v42 = vmul.f32 %v6793_v30, %v6793_v30 }
 0x335   :  { %2383 = vmatmul.mubr.f32.gmra.mrb[36].mxu0 %v2267_v34  ;;  %2498 = vmatmul.mubr.f32.gmra.mrb[34].mxu1 %v2265_v51  ;;  %v2282_v51 = vmul.f32 %v6863_v56, %v6863_v56 }
 0x336   :  { %2387 = vmatprep.mubr.f32.mxu0 %v2272_v0  ;;  %2502 = vmatprep.mubr.f32.mxu1 %v2270_v47 }
 0x339   :  { %2388 = vmatmul.mubr.f32.gmra.mrb[38].mxu0 %v2271_v50  ;;  %2503 = vmatmul.mubr.f32.gmra.mrb[36].mxu1 %v2269_v57  ;;  %v2281_v50 = vmul.f32 %v6861_v41, %v6861_v41 }
 0x33a   :  { %2392 = vmatprep.mubr.f32.mxu0 %v2276_v25  ;;  %2507 = vmatprep.mubr.f32.mxu1 %v2274_v27 }
 0x33c   :  { %v3238_v33 = vpop.f32.mrb[4].mxu0 }
 0x33d   :  { %v3239_v54 = vpop.f32.mrb[5].mxu0  ;;  %2393 = vmatmul.mubr.f32.gmra.mrb[40].mxu0 %v2275_v15  ;;  %2508 = vmatmul.mubr.f32.gmra.mrb[38].mxu1 %v2273_v43 }
 0x33e   :  { %v3240_v18 = vadd.f32 %v3239_v54, %v3238_v33  ;;  %2397 = vmatprep.mubr.f32.mxu0 %v2280_v36  ;;  %2512 = vmatprep.mubr.f32.mxu1 %v2278_v1 }
 0x340   :  { %v3303_v46 = vpop.f32.mrb[4].mxu1 }
 0x341   :  { %v3304_v34 = vpop.f32.mrb[5].mxu1  ;;  %2398 = vmatmul.mubr.f32.gmra.mrb[42].mxu0 %v2279_v45  ;;  %2513 = vmatmul.mubr.f32.gmra.mrb[40].mxu1 %v2277_v42 }
 0x342   :  { %v3305_v0 = vadd.f32 %v3304_v34, %v3303_v46  ;;  %2517 = vmatprep.mubr.f32.mxu1 %v2282_v51 }
 0x344   :  { %v6955_v47 = vadd.f32 %v3305_v0, %v3240_v18 }
 0x345   :  { %2518 = vmatmul.mubr.f32.gmra.mrb[42].mxu1 %v2281_v50 }
 0x354   :  { %v3241_v57 = vpop.f32.mrb[6].mxu0 }
 0x355   :  { %v3242_v25 = vpop.f32.mrb[7].mxu0 }
 0x356   :  { %v3243_v27 = vadd.f32 %v3242_v25, %v3241_v57 }
 0x358   :  { %v3306_v33 = vpop.f32.mrb[6].mxu1 }
 0x359   :  { %v3307_v15 = vpop.f32.mrb[7].mxu1 }
 0x35a   :  { %v3308_v43 = vadd.f32 %v3307_v15, %v3306_v33 }
 0x35c   :  { %v6959_v54 = vadd.f32 %v3308_v43, %v3243_v27 }
 0x36c   :  { %v3244_v36 = vpop.f32.mrb[8].mxu0 }
 0x36d   :  { %v3245_v1 = vpop.f32.mrb[9].mxu0 }
 0x36e   :  { %v3246_v46 = vadd.f32 %v3245_v1, %v3244_v36 }
 0x370   :  { %v3309_v45 = vpop.f32.mrb[8].mxu1 }
 0x371   :  { %v3310_v42 = vpop.f32.mrb[9].mxu1 }
 0x372   :  { %v3311_v34 = vadd.f32 %v3310_v42, %v3309_v45 }
 0x374   :  { %v6961_v18 = vadd.f32 %v3311_v34, %v3246_v46 }
 0x384   :  { %v3247_v51 = vpop.f32.mrb[10].mxu0 }
 0x385   :  { %v3248_v0 = vpop.f32.mrb[11].mxu0 }
 0x386   :  { %v3249_v41 = vadd.f32 %v3248_v0, %v3247_v51 }
 0x388   :  { %v3312_v50 = vpop.f32.mrb[10].mxu1 }
 0x389   :  { %v3313_v58 = vpop.f32.mrb[11].mxu1 }
 0x38a   :  { %v3314_v56 = vadd.f32 %v3313_v58, %v3312_v50 }
 0x38c   :  { %v6963_v57 = vadd.f32 %v3314_v56, %v3249_v41 }
 0x39c   :  { %v3250_v25 = vpop.f32.mrb[12].mxu0 }
 0x39d   :  { %v3251_v33 = vpop.f32.mrb[13].mxu0 }
 0x39e   :  { %v3252_v27 = vadd.f32 %v3251_v33, %v3250_v25 }
 0x3a0   :  { %v3315_v15 = vpop.f32.mrb[12].mxu1 }
 0x3a1   :  { %v3316_v43 = vpop.f32.mrb[13].mxu1 }
 0x3a2   :  { %v3317_v11 = vadd.f32 %v3316_v43, %v3315_v15 }
 0x3a4   :  { %v6965_v36 = vadd.f32 %v3317_v11, %v3252_v27 }
 0x3b4   :  { %v3253_v1 = vpop.f32.mrb[14].mxu0 }
 0x3b5   :  { %v3254_v45 = vpop.f32.mrb[15].mxu0 }
 0x3b6   :  { %v3255_v46 = vadd.f32 %v3254_v45, %v3253_v1 }
 0x3b8   :  { %v3318_v42 = vpop.f32.mrb[14].mxu1 }
 0x3b9   :  { %v3319_v34 = vpop.f32.mrb[15].mxu1 }
 0x3ba   :  { %v3320_v44 = vadd.f32 %v3319_v34, %v3318_v42 }
 0x3bc   :  { %v6967_v51 = vadd.f32 %v3320_v44, %v3255_v46 }
 0x3c8   :  { %v3256_v0 = vpop.f32.mrb[16].mxu0 }
 0x3c9   :  { %v3257_v58 = vpop.f32.mrb[17].mxu0 }
 0x3ca   :  { %v3258_v41 = vadd.f32 %v3257_v58, %v3256_v0 }
 0x3cc   :  { %v3321_v56 = vpop.f32.mrb[16].mxu1 }
 0x3cd   :  { %v3322_v50 = vpop.f32.mrb[17].mxu1 }
 0x3ce   :  { %v3323_v30 = vadd.f32 %v3322_v50, %v3321_v56 }
 0x3d0   :  { %v6969_v25 = vadd.f32 %v3323_v30, %v3258_v41 }
 0x3d8   :  { %v3259_v33 = vpop.f32.mrb[18].mxu0 }
 0x3d9   :  { %v3260_v15 = vpop.f32.mrb[19].mxu0 }
 0x3da   :  { %v3261_v11 = vadd.f32 %v3260_v15, %v3259_v33  ;;  %v6976_v15 = vmul.f32 0.001953125, %v6897_v8 }
 0x3dc   :  { %v3324_v27 = vpop.f32.mrb[18].mxu1 }
 0x3dd   :  { %v3325_v43 = vpop.f32.mrb[19].mxu1 }
 0x3de   :  { %v3326_v62 = vadd.f32 %v3325_v43, %v3324_v27 }
 0x3e0   :  { %v6971_v1 = vadd.f32 %v3326_v62, %v3261_v11 }
 0x3e8   :  { %v3262_v45 = vpop.f32.mrb[20].mxu0 }
 0x3e9   :  { %v3263_v42 = vpop.f32.mrb[21].mxu0 }
 0x3ea   :  { %v3264_v44 = vadd.f32 %v3263_v42, %v3262_v45  ;;  %v6979_v42 = vmul.f32 0.001953125, %v6915_v48 }
 0x3ec   :  { %v3327_v46 = vpop.f32.mrb[20].mxu1  ;;  %v3362_v34 = vpop.f32.mrb[22].mxu0 }
 0x3ed   :  { %v3328_v61 = vpop.f32.mrb[21].mxu1  ;;  %v3363_v0 = vpop.f32.mrb[23].mxu0 }
 0x3ee   :  { %v3329_v58 = vadd.f32 %v3328_v61, %v3327_v46  ;;  %v3364_v35 = vadd.f32 %v3363_v0, %v3362_v34 }
 0x3f0   :  { %v6973_v56 = vadd.f32 %v3329_v58, %v3264_v44  ;;  %v3365_v30 = vpop.f32.mrb[24].mxu0  ;;  %v3427_v41 = vpop.f32.mrb[22].mxu1  ;;  %v2545_v44 = vmul.f32 %v6976_v15, %v6976_v15 }
 0x3f1   :  { %v3366_v50 = vpop.f32.mrb[25].mxu0  ;;  %v3428_v33 = vpop.f32.mrb[23].mxu1 }
 0x3f2   :  { %v3367_v62 = vadd.f32 %v3366_v50, %v3365_v30  ;;  %v3429_v11 = vadd.f32 %v3428_v33, %v3427_v41  ;;  %v6986_v30 = vmul.f32 0.001953125, %v6955_v47 }
 0x3f4   :  { %v2470_v27 = vadd.f32 %v3429_v11, %v3364_v35  ;;  %v3368_v43 = vpop.f32.mrb[26].mxu0  ;;  %v3430_v45 = vpop.f32.mrb[24].mxu1  ;;  %v2546_v35 = vmul.f32 %v6979_v42, %v6979_v42 }
 0x3f5   :  { %v3369_v38 = vpop.f32.mrb[27].mxu0  ;;  %v3431_v61 = vpop.f32.mrb[25].mxu1 }
 0x3f6   :  { %v2534_v46 = vmul.f32 0.001953125, %v2470_v27  ;;  %v3370_v34 = vadd.f32 %v3369_v38, %v3368_v43  ;;  %v3432_v0 = vadd.f32 %v3431_v61, %v3430_v45  ;;  %v6991_v61 = vmul.f32 0.001953125, %v6959_v54 }
 0x3f8   :  { %v2556_v58 = vsub.f32 %v2534_v46, %v2545_v44  ;;  %v2475_v2 = vadd.f32 %v3432_v0, %v3367_v62  ;;  %v3371_v8 = vpop.f32.mrb[28].mxu0  ;;  %v3433_v60 = vpop.f32.mrb[26].mxu1  ;;  %v2547_v62 = vmul.f32 %v6986_v30, %v6986_v30 }
 0x3f9   :  { %v3372_v48 = vpop.f32.mrb[29].mxu0  ;;  %v3434_v41 = vpop.f32.mrb[27].mxu1 }
 0x3fa   :  { %v2567_v50 = vadd.f32 0.001, %v2556_v58  ;;  %v2535_v33 = vmul.f32 0.001953125, %v2475_v2  ;;  %v3373_v11 = vadd.f32 %v3372_v48, %v3371_v8  ;;  %v3435_v21 = vadd.f32 %v3434_v41, %v3433_v60 }
 0x3fc   :  { %3660 = vrsqrt.f32 %v2567_v50  ;;  %v2557_v27 = vsub.f32 %v2535_v33, %v2546_v35  ;;  %v2480_v38 = vadd.f32 %v3435_v21, %v3370_v34  ;;  %v3374_v43 = vpop.f32.mrb[30].mxu0  ;;  %v3436_v45 = vpop.f32.mrb[28].mxu1  ;;  %v2548_v21 = vmul.f32 %v6991_v61, %v6991_v61 }
 0x3fd   :  { %v3375_v44 = vpop.f32.mrb[31].mxu0  ;;  %v3437_v47 = vpop.f32.mrb[29].mxu1  ;;  %v6996_v34 = vmul.f32 0.001953125, %v6961_v18 }
 0x3fe   :  { %v2568_v46 = vadd.f32 0.001, %v2557_v27  ;;  %v2536_v0 = vmul.f32 0.001953125, %v2480_v38  ;;  %v3376_v55 = vadd.f32 %v3375_v44, %v3374_v43  ;;  %v3438_v58 = vadd.f32 %v3437_v47, %v3436_v45 }
 0x3ff   :  { %v7001_v44 = vmul.f32 0.001953125, %v6963_v57  ;;  %v7007_v57 = vmul.f32 0.001953125, %v6965_v36  ;;  %v7013_v36 = vmul.f32 0.001953125, %v6967_v51  ;;  %v7019_v51 = vmul.f32 0.001953125, %v6969_v25 }
 0x400   :  { %3662 = vrsqrt.f32 %v2568_v46  ;;  %v2558_v2 = vsub.f32 %v2536_v0, %v2547_v62  ;;  %v2485_v60 = vadd.f32 %v3438_v58, %v3373_v11  ;;  %v3377_v8 = vpop.f32.mrb[32].mxu0  ;;  %v3439_v35 = vpop.f32.mrb[30].mxu1  ;;  %v2549_v11 = vmul.f32 %v6996_v34, %v6996_v34 }
 0x401   :  { %v3378_v48 = vpop.f32.mrb[33].mxu0  ;;  %v3440_v54 = vpop.f32.mrb[31].mxu1  ;;  %v7025_v25 = vmul.f32 0.001953125, %v6971_v1  ;;  %v7031_v1 = vmul.f32 0.001953125, %v6973_v56 }
 0x402   :  { %v2569_v41 = vadd.f32 0.001, %v2558_v2  ;;  %v2537_v50 = vmul.f32 0.001953125, %v2485_v60  ;;  %v3379_v33 = vadd.f32 %v3378_v48, %v3377_v8  ;;  %v3441_v27 = vadd.f32 %v3440_v54, %v3439_v35 }
 0x403   :  { %v2550_v48 = vmul.f32 %v7001_v44, %v7001_v44 }
 0x404   :  { %3664 = vrsqrt.f32 %v2569_v41  ;;  %v2559_v38 = vsub.f32 %v2537_v50, %v2548_v21  ;;  %v2490_v43 = vadd.f32 %v3441_v27, %v3376_v55  ;;  %v3380_v45 = vpop.f32.mrb[34].mxu0  ;;  %v3442_v62 = vpop.f32.mrb[32].mxu1 }
 0x405   :  { %v3381_v47 = vpop.f32.mrb[35].mxu0  ;;  %v3443_v18 = vpop.f32.mrb[33].mxu1 }
 0x406   :  { %v3661_v46 = vpop.eup %3660  ;;  %v2570_v0 = vadd.f32 0.001, %v2559_v38  ;;  %v2538_v58 = vmul.f32 0.001953125, %v2490_v43  ;;  %v3382_v2 = vadd.f32 %v3381_v47, %v3380_v45  ;;  %v3444_v60 = vadd.f32 %v3443_v18, %v3442_v62 }
 0x407   :  { %2600 = vrot.lane.b32.xlu0 %v3661_v46, %s3833_s19  ;;  %v2551_v18 = vmul.f32 %v7007_v57, %v7007_v57 }
 0x408   :  { %3666 = vrsqrt.f32 %v2570_v0  ;;  %v2560_v55 = vsub.f32 %v2538_v58, %v2549_v11  ;;  %v2495_v8 = vadd.f32 %v3444_v60, %v3379_v33  ;;  %v3383_v35 = vpop.f32.mrb[36].mxu0  ;;  %v3445_v21 = vpop.f32.mrb[34].mxu1 }
 0x409   :  { %v3384_v54 = vpop.f32.mrb[37].mxu0  ;;  %v3446_v41 = vpop.f32.mrb[35].mxu1 }
 0x40a   :  { %v3663_v50 = vpop.eup %3662  ;;  %v2571_v27 = vadd.f32 0.001, %v2560_v55  ;;  %v2539_v38 = vmul.f32 0.001953125, %v2495_v8  ;;  %v3385_v43 = vadd.f32 %v3384_v54, %v3383_v35  ;;  %v3447_v45 = vadd.f32 %v3446_v41, %v3445_v21 }
 0x40b   :  { %2602 = vrot.lane.b32.xlu1 %v3663_v50, %s3833_s19  ;;  %v2552_v41 = vmul.f32 %v7013_v36, %v7013_v36 }
 0x40c   :  { %3668 = vrsqrt.f32 %v2571_v27  ;;  %v2561_v62 = vsub.f32 %v2539_v38, %v2550_v48  ;;  %v2500_v33 = vadd.f32 %v3447_v45, %v3382_v2  ;;  %v3386_v11 = vpop.f32.mrb[38].mxu0  ;;  %v3448_v47 = vpop.f32.mrb[36].mxu1 }
 0x40d   :  { %v3387_v46 = vpop.f32.mrb[39].mxu0  ;;  %v3449_v0 = vpop.f32.mrb[37].mxu1 }
 0x40e   :  { %v3665_v58 = vpop.eup %3664  ;;  %v2572_v60 = vadd.f32 0.001, %v2561_v62  ;;  %v2540_v55 = vmul.f32 0.001953125, %v2500_v33  ;;  %v3388_v8 = vadd.f32 %v3387_v46, %v3386_v11  ;;  %v3450_v35 = vadd.f32 %v3449_v0, %v3448_v47 }
 0x40f   :  { %2604 = vrot.lane.b32.xlu0 %v3665_v58, %s3833_s19  ;;  %v2553_v0 = vmul.f32 %v7019_v51, %v7019_v51 }
 0x410   :  { %3670 = vrsqrt.f32 %v2572_v60  ;;  %v2562_v21 = vsub.f32 %v2540_v55, %v2551_v18  ;;  %v2505_v2 = vadd.f32 %v3450_v35, %v3385_v43  ;;  %v3389_v48 = vpop.f32.mrb[40].mxu0  ;;  %v3451_v54 = vpop.f32.mrb[38].mxu1 }
 0x411   :  { %v3390_v50 = vpop.f32.mrb[41].mxu0  ;;  %v3452_v27 = vpop.f32.mrb[39].mxu1 }
 0x412   :  { %v3667_v38 = vpop.eup %3666  ;;  %v2573_v45 = vadd.f32 0.001, %v2562_v21  ;;  %v2541_v62 = vmul.f32 0.001953125, %v2505_v2  ;;  %v3391_v33 = vadd.f32 %v3390_v50, %v3389_v48  ;;  %v3453_v11 = vadd.f32 %v3452_v27, %v3451_v54 }
 0x413   :  { %2606 = vrot.lane.b32.xlu1 %v3667_v38, %s3833_s19  ;;  %v2554_v50 = vmul.f32 %v7025_v25, %v7025_v25 }
 0x414   :  { %3672 = vrsqrt.f32 %v2573_v45  ;;  %v2563_v47 = vsub.f32 %v2541_v62, %v2552_v41  ;;  %v2510_v43 = vadd.f32 %v3453_v11, %v3388_v8  ;;  %v3392_v18 = vpop.f32.mrb[42].mxu0  ;;  %v3454_v46 = vpop.f32.mrb[40].mxu1 }
 0x415   :  { %v3393_v58 = vpop.f32.mrb[43].mxu0  ;;  %v3455_v60 = vpop.f32.mrb[41].mxu1 }
 0x416   :  { %v3669_v55 = vpop.eup %3668  ;;  %v2574_v35 = vadd.f32 0.001, %v2563_v47  ;;  %v2542_v21 = vmul.f32 0.001953125, %v2510_v43  ;;  %v3394_v2 = vadd.f32 %v3393_v58, %v3392_v18  ;;  %v3456_v48 = vadd.f32 %v3455_v60, %v3454_v46 }
 0x417   :  { %2608 = vrot.lane.b32.xlu0 %v3669_v55, %s3833_s19 }
 0x418   :  { %3674 = vrsqrt.f32 %v2574_v35  ;;  %v2564_v54 = vsub.f32 %v2542_v21, %v2553_v0  ;;  %v2515_v8 = vadd.f32 %v3456_v48, %v3391_v33  ;;  %v3457_v41 = vpop.f32.mrb[42].mxu1  ;;  %v2555_v33 = vmul.f32 %v7031_v1, %v7031_v1  ;;  %v7044_v48 = vld [vmem:[%s7298_s1] sm:$0xff] }
 0x419   :  { %v3458_v27 = vpop.f32.mrb[43].mxu1 }
 0x41a   :  { %v3671_v38 = vpop.eup %3670  ;;  %v2575_v45 = vadd.f32 0.001, %v2564_v54  ;;  %v2543_v62 = vmul.f32 0.001953125, %v2515_v8  ;;  %v3459_v11 = vadd.f32 %v3458_v27, %v3457_v41  ;;  %v7054_v41 = vld [vmem:[%s7298_s1 + $0x8] sm:$0xff] }
 0x41b   :  { %2610 = vrot.lane.b32.xlu1 %v3671_v38, %s3833_s19  ;;  %v7064_v38 = vld [vmem:[%s7298_s1 + $0x10] sm:$0xff] }
 0x41c   :  { %3676 = vrsqrt.f32 %v2575_v45  ;;  %v2565_v47 = vsub.f32 %v2543_v62, %v2554_v50  ;;  %v2520_v43 = vadd.f32 %v3459_v11, %v3394_v2  ;;  %v7074_v11 = vld [vmem:[%s7298_s1 + $0x18] sm:$0xff] }
 0x41e   :  { %v3673_v18 = vpop.eup %3672  ;;  %v2576_v46 = vadd.f32 0.001, %v2565_v47  ;;  %v2544_v0 = vmul.f32 0.001953125, %v2520_v43 }
 0x41f   :  { %2612 = vrot.lane.b32.xlu0 %v3673_v18, %s3833_s19  ;;  %v7084_v18 = vld [vmem:[%s7298_s1 + $0x20] sm:$0xff] }
 0x420   :  { %3678 = vrsqrt.f32 %v2576_v46  ;;  %v2566_v58 = vsub.f32 %v2544_v0, %v2555_v33  ;;  %v7094_v0 = vld [vmem:[%s7298_s1 + $0x28] sm:$0xff] }
 0x422   :  { %v3675_v56 = vpop.eup %3674  ;;  %v2577_v60 = vadd.f32 0.001, %v2566_v58 }
 0x423   :  { %2614 = vrot.lane.b32.xlu1 %v3675_v56, %s3833_s19 }
 0x424   :  { %3680 = vrsqrt.f32 %v2577_v60  ;;  %v7104_v60 = vld [vmem:[%s7298_s1 + $0x30] sm:$0xff] }
 0x426   :  { %v3677_v55 = vpop.eup %3676 }
 0x427   :  { %2616 = vrot.lane.b32.xlu0 %v3677_v55, %s3833_s19 }
 0x42a   :  { %v3679_v35 = vpop.eup %3678 }
 0x42b   :  { %2618 = vrot.lane.b32.xlu1 %v3679_v35, %s3833_s19 }
 0x42e   :  { %v3681_v21 = vpop.eup %3680 }
 0x42f   :  { %2620 = vrot.lane.b32.xlu0 %v3681_v21, %s3833_s19  ;;  %v7111_v21 = vld [vmem:[%s7298_s1 + $0x38] sm:$0xff] }
 0x479   :  { %v2601_v2 = vpop.permute.xlu0 %2600 }
 0x47a   :  { %v7047_v54 = vmul.f32 %v7044_v48, %v2601_v2 }
 0x47c   :  { %2655 = vrot.lane.b32.xlu1 %v7047_v54, %s3834_s24 }
 0x47d   :  { %v2603_v8 = vpop.permute.xlu1 %2602 }
 0x47e   :  { %v7057_v50 = vmul.f32 %v7054_v41, %v2603_v8  ;;  %v7720_v8 = vmov 9  }
 0x47f   :  { %3652 = vset.pattern.permute.xlu1 %v7720_v8  ;;  %3653 = vset.pattern.permute.xlu0 %v7720_v8 }
 0x480   :  { %2657 = vrot.lane.b32.xlu0 %v7057_v50, %s3834_s24 }
 0x481   :  { %v2605_v27 = vpop.permute.xlu0 %2604 }
 0x482   :  { %v7067_v45 = vmul.f32 %v7064_v38, %v2605_v27 }
 0x484   :  { %2659 = vrot.lane.b32.xlu1 %v7067_v45, %s3834_s24 }
 0x485   :  { %v2607_v62 = vpop.permute.xlu1 %2606 }
 0x486   :  { %v7077_v47 = vmul.f32 %v7074_v11, %v2607_v62  ;;  %v7120_v62 = vld [vmem:[%s7298_s1 + $0x40] sm:$0xff] }
 0x488   :  { %2661 = vrot.lane.b32.xlu0 %v7077_v47, %s3834_s24 }
 0x489   :  { %v2609_v43 = vpop.permute.xlu0 %2608 }
 0x48a   :  { %v7087_v33 = vmul.f32 %v7084_v18, %v2609_v43 }
 0x48c   :  { %2663 = vrot.lane.b32.xlu1 %v7087_v33, %s3834_s24 }
 0x48d   :  { %v2611_v46 = vpop.permute.xlu1 %2610 }
 0x48e   :  { %v7097_v58 = vmul.f32 %v7094_v0, %v2611_v46 }
 0x490   :  { %2665 = vrot.lane.b32.xlu0 %v7097_v58, %s3834_s24 }
 0x491   :  { %v2613_v56 = vpop.permute.xlu0 %2612 }
 0x492   :  { %v2639_v55 = vmul.f32 %v7104_v60, %v2613_v56  ;;  %v7127_v56 = vld [vmem:[%s7298_s1 + $0x48] sm:$0xff] }
 0x494   :  { %2667 = vrot.lane.b32.xlu1 %v2639_v55, %s3834_s24 }
 0x495   :  { %v2615_v35 = vpop.permute.xlu1 %2614 }
 0x496   :  { %v2640_v2 = vmul.f32 %v7111_v21, %v2615_v35 }
 0x498   :  { %2669 = vrot.lane.b32.xlu0 %v2640_v2, %s3834_s24 }
 0x499   :  { %v2617_v27 = vpop.permute.xlu0 %2616 }
 0x49a   :  { %v2641_v43 = vmul.f32 %v7120_v62, %v2617_v27 }
 0x49c   :  { %2671 = vrot.lane.b32.xlu1 %v2641_v43, %s3834_s24 }
 0x49d   :  { %v2619_v46 = vpop.permute.xlu1 %2618 }
 0x49e   :  { %v7130_v35 = vmul.f32 %v7127_v56, %v2619_v46 }
 0x4a0   :  { %2673 = vrot.lane.b32.xlu0 %v7130_v35, %s3834_s24 }
 0x4a1   :  { %v2621_v8 = vpop.permute.xlu0 %2620 }
 0x4a2   :  { %v7140_v27 = vmul.f32 %v7137_v17, %v2621_v8 }
 0x4a4   :  { %2675 = vrot.lane.b32.xlu1 %v7140_v27, %s3834_s24 }
 0x4ee   :  { %v2656_v29 = vpop.permute.xlu1 %2655 }
 0x4ef   :  { %v2688_v16 = vmul.f32 %v2656_v29, %v6976_v15 }
 0x4f1   :  { %2710 = vrot.lane.b32.xlu0 %v2688_v16, %s3836_s17 }
 0x4f2   :  { %v2658_v46 = vpop.permute.xlu0 %2657 }
 0x4f3   :  { %v2689_v32 = vmul.f32 %v2658_v46, %v6979_v42 }
 0x4f5   :  { %2712 = vrot.lane.b32.xlu1 %v2689_v32, %s3836_s17 }
 0x4f6   :  { %v2660_v53 = vpop.permute.xlu1 %2659 }
 0x4f7   :  { %v2690_v5 = vmul.f32 %v2660_v53, %v6986_v30 }
 0x4f9   :  { %2714 = vrot.lane.b32.xlu0 %v2690_v5, %s3836_s17 }
 0x4fa   :  { %v2662_v8 = vpop.permute.xlu0 %2661 }
 0x4fb   :  { %v2691_v20 = vmul.f32 %v2662_v8, %v6991_v61 }
 0x4fd   :  { %2716 = vrot.lane.b32.xlu1 %v2691_v20, %s3836_s17 }
 0x4fe   :  { %v2664_v52 = vpop.permute.xlu1 %2663 }
 0x4ff   :  { %v2692_v29 = vmul.f32 %v2664_v52, %v6996_v34 }
 0x501   :  { %2718 = vrot.lane.b32.xlu0 %v2692_v29, %s3836_s17  ;;  %v3838_v29 = vmov 0.0  }
 0x502   :  { %v2666_v16 = vpop.permute.xlu0 %2665  ;;  %3062 = vmatprep.mubr.f32.mxu0 %v3838_v29  ;;  %3145 = vmatprep.mubr.f32.mxu1 %v3838_v29 }
 0x503   :  { %v2693_v15 = vmul.f32 %v2666_v16, %v7001_v44 }
 0x505   :  { %2720 = vrot.lane.b32.xlu1 %v2693_v15, %s3836_s17 }
 0x506   :  { %v2668_v32 = vpop.permute.xlu1 %2667 }
 0x507   :  { %v2694_v53 = vmul.f32 %v2668_v32, %v7007_v57  ;;  %v3837_v57 = vmov 10  }
 0x509   :  { %2722 = vrot.lane.b32.xlu0 %v2694_v53, %s3836_s17 }
 0x50a   :  { %v2670_v5 = vpop.permute.xlu0 %2669 }
 0x50b   :  { %v2695_v42 = vmul.f32 %v2670_v5, %v7013_v36 }
 0x50d   :  { %2724 = vrot.lane.b32.xlu1 %v2695_v42, %s3836_s17 }
 0x50e   :  { %v2672_v20 = vpop.permute.xlu1 %2671 }
 0x50f   :  { %v2696_v52 = vmul.f32 %v2672_v20, %v7019_v51 }
 0x511   :  { %2726 = vrot.lane.b32.xlu0 %v2696_v52, %s3836_s17 }
 0x512   :  { %v2674_v30 = vpop.permute.xlu0 %2673 }
 0x513   :  { %v2697_v61 = vmul.f32 %v2674_v30, %v7025_v25 }
 0x515   :  { %2728 = vrot.lane.b32.xlu1 %v2697_v61, %s3836_s17 }
 0x516   :  { %v2676_v34 = vpop.permute.xlu1 %2675 }
 0x517   :  { %v2698_v44 = vmul.f32 %v2676_v34, %v7031_v1 }
 0x519   :  { %2730 = vrot.lane.b32.xlu0 %v2698_v44, %s3836_s17  ;;  %2755 = vperm.xlu1 %3652, %v7047_v54  }
 0x51d   :  { %2759 = vperm.xlu0 %3653, %v7057_v50   ;;  %2767 = vperm.xlu1 %3652, %v7077_v47  }
 0x521   :  { %2763 = vperm.xlu0 %3653, %v7067_v45   ;;  %2771 = vperm.xlu1 %3652, %v7087_v33   ;;  %v8403_v33 = vmov 9  }
 0x525   :  { %2775 = vperm.xlu0 %3653, %v7097_v58   ;;  %2783 = vperm.xlu1 %3652, %v2640_v2  }
 0x529   :  { %2779 = vperm.xlu0 %3653, %v2639_v55   ;;  %2787 = vperm.xlu1 %3652, %v2641_v43  }
 0x52d   :  { %3654 = vset.pattern.permute.xlu1 %v3837_v57  ;;  %3655 = vset.pattern.permute.xlu0 %v3837_v57 }
 0x563   :  { %v2711_v36 = vpop.permute.xlu0 %2710 }
 0x564   :  { %v2743_v51 = vsub.f32 %v7044_v48, %v2711_v36 }
 0x566   :  { %2844 = vperm.xlu1 %3654, %v2743_v51  }
 0x567   :  { %v2713_v25 = vpop.permute.xlu1 %2712 }
 0x568   :  { %v2744_v1 = vsub.f32 %v7054_v41, %v2713_v25 }
 0x56a   :  { %2849 = vperm.xlu1 %3654, %v2744_v1  }
 0x56b   :  { %v2715_v54 = vpop.permute.xlu0 %2714 }
 0x56c   :  { %v2745_v50 = vsub.f32 %v7064_v38, %v2715_v54 }
 0x56e   :  { %2854 = vperm.xlu0 %3655, %v2745_v50  }
 0x56f   :  { %v2717_v45 = vpop.permute.xlu1 %2716 }
 0x570   :  { %v2746_v47 = vsub.f32 %v7074_v11, %v2717_v45 }
 0x572   :  { %2859 = vperm.xlu1 %3654, %v2746_v47   ;;  %3656 = vset.pattern.permute.xlu0 %v8403_v33 }
 0x573   :  { %2791 = vperm.xlu0 %3656, %v7130_v35   ;;  %v2719_v58 = vpop.permute.xlu0 %2718 }
 0x574   :  { %v2747_v48 = vsub.f32 %v7084_v18, %v2719_v58 }
 0x576   :  { %2864 = vperm.xlu1 %3654, %v2747_v48  }
 0x577   :  { %v2721_v55 = vpop.permute.xlu1 %2720  ;;  %3657 = vset.pattern.permute.xlu0 %v3837_v57 }
 0x578   :  { %v2748_v41 = vsub.f32 %v7094_v0, %v2721_v55 }
 0x57a   :  { %2869 = vperm.xlu1 %3654, %v2748_v41  }
 0x57b   :  { %v2723_v2 = vpop.permute.xlu0 %2722 }
 0x57c   :  { %v2749_v38 = vsub.f32 %v7104_v60, %v2723_v2 }
 0x57e   :  { %2874 = vperm.xlu0 %3657, %v2749_v38  }
 0x57f   :  { %v2725_v43 = vpop.permute.xlu1 %2724 }
 0x580   :  { %v2750_v11 = vsub.f32 %v7111_v21, %v2725_v43 }
 0x582   :  { %2879 = vperm.xlu1 %3654, %v2750_v11   ;;  %3658 = vset.pattern.permute.xlu0 %v8403_v33 }
 0x583   :  { %2795 = vperm.xlu0 %3658, %v7140_v27   ;;  %v2727_v35 = vpop.permute.xlu0 %2726 }
 0x584   :  { %v2751_v18 = vsub.f32 %v7120_v62, %v2727_v35 }
 0x586   :  { %2884 = vperm.xlu1 %3654, %v2751_v18  }
 0x587   :  { %v2729_v46 = vpop.permute.xlu1 %2728  ;;  %3659 = vset.pattern.permute.xlu0 %v3837_v57 }
 0x588   :  { %v2752_v0 = vsub.f32 %v7127_v56, %v2729_v46 }
 0x58a   :  { %2889 = vperm.xlu1 %3654, %v2752_v0  }
 0x58b   :  { %v2731_v8 = vpop.permute.xlu0 %2730 }
 0x58c   :  { %v2753_v60 = vsub.f32 %v7137_v17, %v2731_v8 }
 0x58e   :  { %2894 = vperm.xlu1 %3654, %v2753_v60  }
 0x598   :  { %v2756_v21 = vpop.permute.xlu1 %2755 }
 0x599   :  { %v2798_v17 = vmul.f32 %v2756_v21, %v8380_v12  ;;  %v2799_v42 = vmul.f32 %v2756_v21, %v8377_v24  ;;  %v2800_v20 = vmul.f32 %v2756_v21, %v8383_v19  ;;  %v2801_v52 = vmul.f32 %v2756_v21, %v8382_v9 }
 0x59c   :  { %v2768_v27 = vpop.permute.xlu1 %2767  ;;  %v2760_v62 = vpop.permute.xlu0 %2759 }
 0x59d   :  { %v2802_v30 = vmul.f32 %v2760_v62, %v8384_v3  ;;  %v2803_v61 = vmul.f32 %v2760_v62, %v8381_v28  ;;  %v2804_v34 = vmul.f32 %v2760_v62, %v8388_v59  ;;  %v2805_v44 = vmul.f32 %v2760_v62, %v8386_v39 }
 0x59e   :  { %v2810_v9 = vmul.f32 %v2768_v27, %v8391_v40  ;;  %v2811_v18 = vmul.f32 %v2768_v27, %v8389_v49  ;;  %v2812_v46 = vmul.f32 %v2768_v27, %v8396_v22  ;;  %v2813_v0 = vmul.f32 %v2768_v27, %v8394_v14 }
 0x5a0   :  { %v7189_v16 = vpop.permute.xlu1 %2771  ;;  %v2764_v32 = vpop.permute.xlu0 %2763 }
 0x5a1   :  { %v2806_v55 = vmul.f32 %v2764_v32, %v8387_v23  ;;  %v2807_v41 = vmul.f32 %v2764_v32, %v8385_v10  ;;  %v2808_v2 = vmul.f32 %v2764_v32, %v8392_v26  ;;  %v2809_v38 = vmul.f32 %v2764_v32, %v8390_v63 }
 0x5a4   :  { %v7191_v15 = vpop.permute.xlu1 %2783  ;;  %v7195_v56 = vpop.permute.xlu0 %2775 }
 0x5a8   :  { %v7193_v53 = vpop.permute.xlu1 %2787  ;;  %v7205_v57 = vpop.permute.xlu0 %2779 }
 0x5e5   :  { %v2845_v5 = vpop.permute.xlu1 %2844 }
 0x5e6   :  { %v2897_v36 = vadd.f32 %v2845_v5, %v2798_v17  ;;  %v2898_v51 = vadd.f32 %v2845_v5, %v2799_v42  ;;  %v2899_v25 = vadd.f32 %v2845_v5, %v2800_v20  ;;  %v2900_v12 = vadd.f32 %v2845_v5, %v2801_v52 }
 0x5e7   :  { %v2814_v5 = vmul.f32 %v7189_v16, %v8395_v37  ;;  %v2818_v37 = vmul.f32 %v7195_v56, %v8399_v4 }
 0x5e8   :  { %v2941_v59 = vmax.f32 %v2897_v36, 0.0  ;;  %v2943_v33 = vmax.f32 %v2899_v25, 0.0  ;;  %v2942_v58 = vmax.f32 %v2898_v51, 0.0  ;;  %v2944_v48 = vmax.f32 %v2900_v12, 0.0 }
 0x5e9   :  { %v2850_v1 = vpop.permute.xlu1 %2849 }
 0x5ea   :  { %v2901_v24 = vadd.f32 %v2850_v1, %v2802_v30  ;;  %v2902_v54 = vadd.f32 %v2850_v1, %v2803_v61  ;;  %v2903_v19 = vadd.f32 %v2850_v1, %v2804_v34  ;;  %v2904_v50 = vadd.f32 %v2850_v1, %v2805_v44 }
 0x5eb   :  { %v2815_v61 = vmul.f32 %v7189_v16, %v8393_v7  ;;  %v2816_v34 = vmul.f32 %v7189_v16, %v8400_v31  ;;  %v2817_v44 = vmul.f32 %v7189_v16, %v8398_v6  ;;  %v2819_v1 = vmul.f32 %v7195_v56, %v8397_v13  ;;  %v8405_v7 = vld [vmem:[#allocation18_spill] sm:$0xff]  ;;  %v8406_v13 = vld [vmem:[#allocation136_spill] sm:$0xff] }
 0x5ec   :  { %v2945_v3 = vmax.f32 %v2901_v24, 0.0  ;;  %v2947_v45 = vmax.f32 %v2903_v19, 0.0  ;;  %v2946_v28 = vmax.f32 %v2902_v54, 0.0  ;;  %v2948_v47 = vmax.f32 %v2904_v50, 0.0  ;;  %v8404_v24 = vld [vmem:[#allocation149_spill] sm:$0xff] }
 0x5ed   :  { %v2855_v39 = vpop.permute.xlu0 %2854  ;;  %v2820_v54 = vmul.f32 %v7195_v56, %v8404_v24  ;;  %v2821_v19 = vmul.f32 %v7195_v56, %v8405_v7 }
 0x5ee   :  { %v3524_v43 = vpack.c.bf16 %v2946_v28, %v2942_v58  ;;  %v3544_v11 = vpack.c.bf16 %v2948_v47, %v2944_v48  ;;  %v3526_v40 = vpack.c.bf16 %v2945_v3, %v2941_v59  ;;  %v3546_v35 = vpack.c.bf16 %v2947_v45, %v2943_v33 }
 0x5ef   :  { %v2905_v8 = vadd.f32 %v2855_v39, %v2806_v55  ;;  %v2906_v60 = vadd.f32 %v2855_v39, %v2807_v41  ;;  %v2907_v21 = vadd.f32 %v2855_v39, %v2808_v2  ;;  %v2908_v23 = vadd.f32 %v2855_v39, %v2809_v38 }
 0x5f0   :  { %3525 = vmatprep.subr.bf16.mxu0 %v3524_v43  ;;  %3545 = vmatprep.subr.bf16.mxu1 %v3544_v11  ;;  %v2826_v59 = vmul.f32 %v7191_v15, %v8406_v13  ;;  %v8407_v43 = vld [vmem:[#allocation32_spill] sm:$0xff]  ;;  %v8419_v13 = vld [vmem:[#allocation107_spill] sm:$0xff] }
 0x5f1   :  { %v2860_v10 = vpop.permute.xlu1 %2859  ;;  %3527 = vmatpush1.bf16.msra.mxu0 %v3526_v40  ;;  %3547 = vmatpush1.bf16.msra.mxu1 %v3546_v35  ;;  %v2949_v27 = vmax.f32 %v2905_v8, 0.0  ;;  %v2951_v42 = vmax.f32 %v2907_v21, 0.0  ;;  %v2950_v52 = vmax.f32 %v2906_v60, 0.0  ;;  %v2952_v30 = vmax.f32 %v2908_v23, 0.0  ;;  %v8408_v40 = vld [vmem:[#allocation84_spill] sm:$0xff] }
 0x5f2   :  { %v2909_v26 = vadd.f32 %v2860_v10, %v2810_v9  ;;  %v2910_v62 = vadd.f32 %v2860_v10, %v2811_v18  ;;  %v2911_v63 = vadd.f32 %v2860_v10, %v2812_v46  ;;  %v2912_v32 = vadd.f32 %v2860_v10, %v2813_v0  ;;  %v7231_v50 = vpop.permute.xlu0 %2791  ;;  %v8409_v18 = vld [vmem:[#allocation42_spill] sm:$0xff]  ;;  %v8410_v0 = vld [vmem:[#allocation76_spill] sm:$0xff] }
 0x5f3   :  { %v2822_v11 = vmul.f32 %v7205_v57, %v8407_v43  ;;  %v2823_v35 = vmul.f32 %v7205_v57, %v8408_v40  ;;  %v2824_v46 = vmul.f32 %v7205_v57, %v8409_v18  ;;  %v2825_v8 = vmul.f32 %v7205_v57, %v8410_v0  ;;  %v8422_v18 = vld [vmem:[#allocation159_spill] sm:$0xff]  ;;  %v8423_v0 = vld [vmem:[#allocation28_spill] sm:$0xff] }
 0x5f4   :  { %v2953_v49 = vmax.f32 %v2909_v26, 0.0  ;;  %v2955_v22 = vmax.f32 %v2911_v63, 0.0  ;;  %v2954_v17 = vmax.f32 %v2910_v62, 0.0  ;;  %v2956_v14 = vmax.f32 %v2912_v32, 0.0  ;;  %v8411_v26 = vld [vmem:[#allocation82_spill] sm:$0xff]  ;;  %v8412_v63 = vld [vmem:[#allocation148_spill] sm:$0xff] }
 0x5f5   :  { %v2865_v20 = vpop.permute.xlu1 %2864  ;;  %v2827_v62 = vmul.f32 %v7191_v15, %v8411_v26  ;;  %v2828_v32 = vmul.f32 %v7191_v15, %v8412_v63 }
 0x5f6   :  { %v3528_v36 = vpack.c.bf16 %v2954_v17, %v2950_v52  ;;  %v3548_v51 = vpack.c.bf16 %v2956_v14, %v2952_v30  ;;  %v3530_v25 = vpack.c.bf16 %v2953_v49, %v2949_v27  ;;  %v3550_v12 = vpack.c.bf16 %v2955_v22, %v2951_v42 }
 0x5f7   :  { %v2913_v31 = vadd.f32 %v2865_v20, %v2814_v5  ;;  %v2914_v6 = vadd.f32 %v2865_v20, %v2815_v61  ;;  %v2915_v16 = vadd.f32 %v2865_v20, %v2816_v34  ;;  %v2916_v9 = vadd.f32 %v2865_v20, %v2817_v44  ;;  %v8413_v5 = vld [vmem:[#allocation24_spill] sm:$0xff] }
 0x5f8   :  { %3529 = vmatprep.subr.bf16.mxu0 %v3528_v36  ;;  %3549 = vmatprep.subr.bf16.mxu1 %v3548_v51  ;;  %v2829_v49 = vmul.f32 %v7191_v15, %v8413_v5  ;;  %v8414_v61 = vld [vmem:[#allocation144_spill] sm:$0xff]  ;;  %v8424_v5 = vld [vmem:[#allocation161_spill] sm:$0xff] }
 0x5f9   :  { %v2870_v4 = vpop.permute.xlu1 %2869  ;;  %3531 = vmatpush1.bf16.msra.mxu0 %v3530_v25  ;;  %3551 = vmatpush1.bf16.msra.mxu1 %v3550_v12  ;;  %v2957_v48 = vmax.f32 %v2913_v31, 0.0  ;;  %v2959_v55 = vmax.f32 %v2915_v16, 0.0  ;;  %v2958_v2 = vmax.f32 %v2914_v6, 0.0  ;;  %v2960_v38 = vmax.f32 %v2916_v9, 0.0  ;;  %v8417_v6 = vld [vmem:[#allocation30_spill] sm:$0xff]  ;;  %v8418_v9 = vld [vmem:[#allocation152_spill] sm:$0xff] }
 0x5fa   :  { %v2917_v3 = vadd.f32 %v2870_v4, %v2818_v37  ;;  %v2918_v45 = vadd.f32 %v2870_v4, %v2819_v1  ;;  %v2919_v28 = vadd.f32 %v2870_v4, %v2820_v54  ;;  %v2920_v47 = vadd.f32 %v2870_v4, %v2821_v19  ;;  %v8415_v54 = vld [vmem:[#allocation103_spill] sm:$0xff]  ;;  %v8416_v19 = vld [vmem:[#allocation101_spill] sm:$0xff] }
 0x5fb   :  { %v2830_v34 = vmul.f32 %v7193_v53, %v8414_v61  ;;  %v2831_v7 = vmul.f32 %v7193_v53, %v8415_v54  ;;  %v2832_v31 = vmul.f32 %v7193_v53, %v8416_v19  ;;  %v2833_v16 = vmul.f32 %v7193_v53, %v8417_v6 }
 0x5fc   :  { %v2961_v33 = vmax.f32 %v2917_v3, 0.0  ;;  %v2963_v56 = vmax.f32 %v2919_v28, 0.0  ;;  %v2962_v39 = vmax.f32 %v2918_v45, 0.0  ;;  %v2964_v58 = vmax.f32 %v2920_v47, 0.0 }
 0x5fd   :  { %v2875_v41 = vpop.permute.xlu0 %2874  ;;  %v2834_v4 = vmul.f32 %v7231_v50, %v8418_v9 }
 0x5fe   :  { %v3532_v60 = vpack.c.bf16 %v2962_v39, %v2958_v2  ;;  %v3552_v21 = vpack.c.bf16 %v2964_v58, %v2960_v38  ;;  %v3534_v23 = vpack.c.bf16 %v2961_v33, %v2957_v48  ;;  %v3554_v10 = vpack.c.bf16 %v2963_v56, %v2959_v55  ;;  %v8420_v33 = vld [vmem:[#allocation51_spill] sm:$0xff] }
 0x5ff   :  { %v2921_v22 = vadd.f32 %v2875_v41, %v2822_v11  ;;  %v2922_v17 = vadd.f32 %v2875_v41, %v2823_v35  ;;  %v2923_v14 = vadd.f32 %v2875_v41, %v2824_v46  ;;  %v2924_v27 = vadd.f32 %v2875_v41, %v2825_v8  ;;  %v8421_v39 = vld [vmem:[#allocation91_spill] sm:$0xff] }
 0x600   :  { %3533 = vmatprep.subr.bf16.mxu0 %v3532_v60  ;;  %3553 = vmatprep.subr.bf16.mxu1 %v3552_v21  ;;  %v2836_v56 = vmul.f32 %v7231_v50, %v8420_v33  ;;  %v2837_v58 = vmul.f32 %v7231_v50, %v8421_v39 }
 0x601   :  { %v2880_v57 = vpop.permute.xlu1 %2879  ;;  %3535 = vmatpush1.bf16.msra.mxu0 %v3534_v23  ;;  %3555 = vmatpush1.bf16.msra.mxu1 %v3554_v10  ;;  %v2965_v51 = vmax.f32 %v2921_v22, 0.0  ;;  %v2967_v25 = vmax.f32 %v2923_v14, 0.0  ;;  %v2966_v1 = vmax.f32 %v2922_v17, 0.0  ;;  %v2968_v24 = vmax.f32 %v2924_v27, 0.0  ;;  %v8425_v22 = vld [vmem:[#allocation127_spill] sm:$0xff] }
 0x602   :  { %v2925_v42 = vadd.f32 %v2880_v57, %v2826_v59  ;;  %v2926_v20 = vadd.f32 %v2880_v57, %v2827_v62  ;;  %v2927_v52 = vadd.f32 %v2880_v57, %v2828_v32  ;;  %v2928_v30 = vadd.f32 %v2880_v57, %v2829_v49  ;;  %v2796_v48 = vpop.permute.xlu0 %2795 }
 0x603   :  { %v2835_v59 = vmul.f32 %v7231_v50, %v8419_v13  ;;  %v2839_v46 = vmul.f32 %v2796_v48, %v8422_v18  ;;  %v2841_v8 = vmul.f32 %v2796_v48, %v8423_v0  ;;  %v2838_v49 = vmul.f32 %v2796_v48, %v8424_v5 }
 0x604   :  { %v2969_v44 = vmax.f32 %v2925_v42, 0.0  ;;  %v2971_v37 = vmax.f32 %v2927_v52, 0.0  ;;  %v2970_v36 = vmax.f32 %v2926_v20, 0.0  ;;  %v2972_v15 = vmax.f32 %v2928_v30, 0.0 }
 0x605   :  { %v2885_v12 = vpop.permute.xlu1 %2884  ;;  %v2840_v17 = vmul.f32 %v2796_v48, %v8425_v22 }
 0x606   :  { %v3536_v3 = vpack.c.bf16 %v2970_v36, %v2966_v1  ;;  %v3556_v45 = vpack.c.bf16 %v2972_v15, %v2968_v24  ;;  %v3538_v28 = vpack.c.bf16 %v2969_v44, %v2965_v51  ;;  %v3558_v47 = vpack.c.bf16 %v2971_v37, %v2967_v25  ;;  %v2985_v15 = vld [vmem:[%s7299_s2] sm:$0xff]  ;;  %v2986_v51 = vld [vmem:[%s7299_s2 + $0x8] sm:$0xff]  ;;  %v2987_v25 = vld [vmem:[%s7299_s2 + $0x10] sm:$0xff]  ;;  %s3791_s2 = scalar_lea.vmem %s3183_s26, 1536 }
 0x607   :  { %v2929_v55 = vadd.f32 %v2885_v12, %v2830_v34  ;;  %v2930_v41 = vadd.f32 %v2885_v12, %v2831_v7  ;;  %v2931_v53 = vadd.f32 %v2885_v12, %v2832_v31  ;;  %v2932_v2 = vadd.f32 %v2885_v12, %v2833_v16  ;;  %p3792_p8 = scmp.ne.s32.totalorder %s3183_s26, %s3791_s2  ;;  %p3797_p10 = scmp.lt.s32.totalorder %s3791_s2, %s3791_s2 }
 0x608   :  { %3537 = vmatprep.subr.bf16.mxu0 %v3536_v3  ;;  %3557 = vmatprep.subr.bf16.mxu1 %v3556_v45 }
 0x609   :  { %v2890_v38 = vpop.permute.xlu1 %2889  ;;  %3539 = vmatpush1.bf16.msra.mxu0 %v3538_v28  ;;  %3559 = vmatpush1.bf16.msra.mxu1 %v3558_v47  ;;  %v2973_v10 = vmax.f32 %v2929_v55, 0.0  ;;  %v2975_v26 = vmax.f32 %v2931_v53, 0.0  ;;  %v2974_v63 = vmax.f32 %v2930_v41, 0.0  ;;  %v2976_v32 = vmax.f32 %v2932_v2, 0.0  ;;  %p3798_p11 = por %p3797_p10, %p3796_p9 }
 0x60a   :  { %v2933_v43 = vadd.f32 %v2890_v38, %v2834_v4  ;;  %v2934_v11 = vadd.f32 %v2890_v38, %v2835_v59  ;;  %v2935_v40 = vadd.f32 %v2890_v38, %v2836_v56  ;;  %v2936_v35 = vadd.f32 %v2890_v38, %v2837_v58 }
 0x60b   :  { %p3799_p12 = pnand %p3798_p11, %p3792_p8 }
 0x60c   :  { %v2977_v60 = vmax.f32 %v2933_v43, 0.0  ;;  %v2979_v50 = vmax.f32 %v2935_v40, 0.0  ;;  %v2978_v21 = vmax.f32 %v2934_v11, 0.0  ;;  %v2980_v23 = vmax.f32 %v2936_v35, 0.0 }
 0x60d   :  { %v2895_v62 = vpop.permute.xlu1 %2894 }
 0x60e   :  { %v2938_v14 = vadd.f32 %v2895_v62, %v2839_v46  ;;  %v2940_v27 = vadd.f32 %v2895_v62, %v2841_v8  ;;  %v3540_v57 = vpack.c.bf16 %v2978_v21, %v2974_v63  ;;  %v3560_v42 = vpack.c.bf16 %v2980_v23, %v2976_v32 }
 0x60f   :  { %v3542_v20 = vpack.c.bf16 %v2977_v60, %v2973_v10  ;;  %v3562_v52 = vpack.c.bf16 %v2979_v50, %v2975_v26  ;;  %v2937_v30 = vadd.f32 %v2895_v62, %v2838_v49  ;;  %v2939_v61 = vadd.f32 %v2895_v62, %v2840_v17 }
 0x610   :  { %v2982_v34 = vmax.f32 %v2938_v14, 0.0  ;;  %v2984_v44 = vmax.f32 %v2940_v27, 0.0  ;;  %3541 = vmatprep.subr.bf16.mxu0 %v3540_v57  ;;  %3561 = vmatprep.subr.bf16.mxu1 %v3560_v42 }
 0x611   :  { %3543 = vmatpush1.bf16.msra.mxu0 %v3542_v20  ;;  %3563 = vmatpush1.bf16.msra.mxu1 %v3562_v52  ;;  %v2981_v37 = vmax.f32 %v2937_v30, 0.0  ;;  %v2983_v36 = vmax.f32 %v2939_v61, 0.0 }
 0x612   :  { %3018 = vmatprep.subr.mxu0 %v2982_v34  ;;  %3101 = vmatprep.subr.mxu1 %v2984_v44 }
 0x615   :  { %3019 = vmatpush1.msra.mxu0 %v2981_v37  ;;  %3102 = vmatpush1.msra.mxu1 %v2983_v36 }
 0x616   :  { %3194 = vmatmul.mubr.msk.f32.vlgmr.msra.gmra.mrb[44].mxu0 %vm2988_vm10, %v2985_v15  ;;  %3197 = vmatmul.mubr.msk.f32.vlgmr.msra.gmra.mrb[44].mxu1 %vm2988_vm10, %v2985_v15 }
 0x617   :  { %3068 = vmatprep.mubr.f32.mxu0 %v3838_v29  ;;  %3151 = vmatprep.mubr.f32.mxu1 %v3838_v29 }
 0x61a   :  { %3195 = vmatmul.mubr.msk.f32.gmra.mrb[46].mxu0 %vm2988_vm10, %v2986_v51  ;;  %3198 = vmatmul.mubr.msk.f32.gmra.mrb[46].mxu1 %vm2988_vm10, %v2986_v51 }
 0x61b   :  { %3074 = vmatprep.mubr.f32.mxu0 %v3838_v29  ;;  %3157 = vmatprep.mubr.f32.mxu1 %v3838_v29 }
 0x61e   :  { %3196 = vmatmul.mubr.msk.f32.gmra.mrb[48].mxu0 %vm2988_vm10, %v2987_v25  ;;  %3199 = vmatmul.mubr.msk.f32.gmra.mrb[48].mxu1 %vm2988_vm10, %v2987_v25 }
 0x6e9   :  { %v3064_v12 = vpop.f32.mrb[44].mxu0  ;;  %v3147_v1 = vpop.f32.mrb[44].mxu1 }
 0x6ea   :  { %3164 = vst [vmem:[#allocation5] sm:$0xff] %v3064_v12  ;;  %3171 = vst [vmem:[#allocation5 + $0x30] sm:$0xff] %v3147_v1  ;;  %v3066_v24 = vpop.f32.mrb[45].mxu0  ;;  %v3149_v54 = vpop.f32.mrb[45].mxu1 }
 0x6eb   :  { %3165 = vst [vmem:[#allocation5 + $0x8] sm:$0xff] %v3066_v24  ;;  %3172 = vst [vmem:[#allocation5 + $0x38] sm:$0xff] %v3149_v54 }
 0x6ed   :  { %v3070_v7 = vpop.f32.mrb[46].mxu0  ;;  %v3153_v19 = vpop.f32.mrb[46].mxu1 }
 0x6ee   :  { %3166 = vst [vmem:[#allocation5 + $0x10] sm:$0xff] %v3070_v7  ;;  %3173 = vst [vmem:[#allocation5 + $0x40] sm:$0xff] %v3153_v19  ;;  %v3072_v31 = vpop.f32.mrb[47].mxu0  ;;  %v3155_v29 = vpop.f32.mrb[47].mxu1 }
 0x6ef   :  { %3167 = vst [vmem:[#allocation5 + $0x18] sm:$0xff] %v3072_v31  ;;  %3174 = vst [vmem:[#allocation5 + $0x48] sm:$0xff] %v3155_v29 }
 0x6f1   :  { %v3076_v6 = vpop.f32.mrb[48].mxu0  ;;  %v3159_v16 = vpop.f32.mrb[48].mxu1 }
 0x6f2   :  { %3168 = vst [vmem:[#allocation5 + $0x20] sm:$0xff] %v3076_v6  ;;  %3175 = vst [vmem:[#allocation5 + $0x50] sm:$0xff] %v3159_v16  ;;  %v3078_v9 = vpop.f32.mrb[49].mxu0  ;;  %v3161_v4 = vpop.f32.mrb[49].mxu1 }
 0x6f3   :  { %3169 = vst [vmem:[#allocation5 + $0x28] sm:$0xff] %v3078_v9  ;;  %3176 = vst [vmem:[#allocation5 + $0x58] sm:$0xff] %v3161_v4 }
 0x6f4   :  { %3802 = shalt.err (!%p3799_p12)
}
 0x6f5   :  { %s3803_s28 = scalar_lea.hbm %s7300_s3, 1536 }
 0x6f6   :  { %p3804_p13 = scmp.ne.s32.totalorder %s7300_s3, %s3803_s28  ;;  %p3807_p0 = scmp.lt.u32.totalorder %s3803_s28, %s7300_s3 }
 0x6f8   :  { %p3809_p1 = pnand %p3807_p0, %p3804_p13 }
 0x6fa   :  { %3812 = shalt.err (!%p3809_p1)
}
 0x6fb   :  { %3188 = dma.vmem_to_hbm [thread:$0]  %s3183_s26, 1536, %s7300_s3, [#allocation4], %s3818_s22, %s3818_s22, %s3819_s23  }
 0x6fc   :  { %3815 = dma.done.wait [#allocation4], 1536  }
 0x6fd   :  { %3816 = vsyncadd [#allocation4], 4294965760 }
 0x6fe   :  { %3192 = vsyncpa [#allocation3], 1 }
 0x6ff   :  { %3193 = vsyncpa [#allocation4], 1 }

</bundles_post_ra>
